<compile_context>
chip_gen: v6e
topology: v6e:2x2x1
jax: 0.10.0
libtpu: 0.0.40
codegen_flags: <defaults>
</compile_context>

<pallas_src>
import jax
import jax.numpy as jnp
import numpy as np
from jax import lax
from jax.experimental import pallas as pl
from jax.experimental.pallas import tpu as pltpu


# ----------------------------------------------------------------------------
# Fused kernel: all LSTM layers + classifier + log_softmax in one pallas_call.
# ----------------------------------------------------------------------------
def _make_fused_kernel(T, B, In, H, C, L):
    H4 = 4 * H

    def kernel(x_ref, h0_ref, c0_ref, *args):
        # args = [wih_0, whh_0, b_0, ..., wih_{L-1}, whh_{L-1}, b_{L-1},
        #         cls_w, cls_b, out_ref, logits_ref, hseq_sc, gp_sc, h_sc, c_sc]
        w_refs = args[:3 * L]
        (cls_w_ref, cls_b_ref, out_ref, logits_ref,
         hseq_sc, gp_sc, h_sc, c_sc) = args[3 * L:]

        for layer in range(L):
            wih_ref = w_refs[3 * layer + 0]   # (In_l, 4H)  gate order [i,f,o,g]
            whh_ref = w_refs[3 * layer + 1]   # (H, 4H)
            b_ref = w_refs[3 * layer + 2]     # (1, 4H)     b_ih + b_hh, reordered

            if layer == 0:
                inp = x_ref[...].reshape(T * B, In)
            else:
                inp = hseq_sc[...].reshape(T * B, H)

            # Hoisted, time-parallel input projection: one big MXU matmul.
            gp = (jnp.dot(inp, wih_ref[...], preferred_element_type=jnp.float32)
                  + b_ref[...])
            gp_sc[...] = gp.reshape(T, B, H4)

            whh = whh_ref[...]                # hoisted load, reused every step
            h_sc[...] = h0_ref[layer]         # (B, H)
            c_sc[...] = c0_ref[layer]         # (B, H)

            @pl.loop(0, T, unroll=True)
            def _(t):
                h = h_sc[...]
                c = c_sc[...]
                # Only the recurrent matmul stays on the serial chain.
                gates = gp_sc[t] + jnp.dot(h, whh,
                                           preferred_element_type=jnp.float32)
                # Gate order is [i, f, o, g]: one sigmoid over the contiguous
                # 3H slab, one tanh over the last H slab.
                ifo = jax.nn.sigmoid(gates[:, :3 * H])
                g = jnp.tanh(gates[:, 3 * H:])
                i_g = ifo[:, 0:H]
                f_g = ifo[:, H:2 * H]
                o_g = ifo[:, 2 * H:3 * H]
                c_new = f_g * c + i_g * g
                h_new = o_g * jnp.tanh(c_new)
                c_sc[...] = c_new
                h_sc[...] = h_new
                hseq_sc[t] = h_new            # stays in VMEM for the next layer

        # Classifier over all timesteps at once, then log_softmax over axis=1
        # (the batch axis), matching F.log_softmax(out, dim=1) in the module.
        hflat = hseq_sc[...].reshape(T * B, H)
        logits = (jnp.dot(hflat, cls_w_ref[...],
                          preferred_element_type=jnp.float32)
                  + cls_b_ref[...]).reshape(T, B, C)
        logits_ref[...] = logits
        m = jnp.max(logits, axis=1, keepdims=True)
        z = logits - m
        lse = jnp.log(jnp.sum(jnp.exp(z), axis=1, keepdims=True))
        out_ref[...] = z - lse

    return kernel


def lstm_model_forward(x, prepped):
    """x: (T, B=1, input_size) -> (log_probs (T,B,C), logits (T,B,C))."""
    T, B, In = x.shape
    L = len(prepped["layers"])
    H = prepped["h0"].shape[-1]
    C = prepped["cls_w"].shape[-1]

    kernel = _make_fused_kernel(T, B, In, H, C, L)

    weight_args = []
    weight_specs = []
    for (wih, whh, b) in prepped["layers"]:
        weight_args += [wih, whh, b]
        weight_specs += [
            pl.BlockSpec(wih.shape, lambda i: (0, 0)),
            pl.BlockSpec(whh.shape, lambda i: (0, 0)),
            pl.BlockSpec(b.shape, lambda i: (0, 0)),
        ]

    in_specs = ([pl.BlockSpec((T, B, In), lambda i: (0, 0, 0)),
                 pl.BlockSpec((L, B, H), lambda i: (0, 0, 0)),
                 pl.BlockSpec((L, B, H), lambda i: (0, 0, 0))]
                + weight_specs
                + [pl.BlockSpec((H, C), lambda i: (0, 0)),
                   pl.BlockSpec((1, C), lambda i: (0, 0))])

    out_shape = (jax.ShapeDtypeStruct((T, B, C), jnp.float32),
                 jax.ShapeDtypeStruct((T, B, C), jnp.float32))
    out_specs = (pl.BlockSpec((T, B, C), lambda i: (0, 0, 0)),
                 pl.BlockSpec((T, B, C), lambda i: (0, 0, 0)))

    return pl.pallas_call(
        kernel,
        out_shape=out_shape,
        grid=(1,),
        in_specs=in_specs,
        out_specs=out_specs,
        scratch_shapes=[
            pltpu.VMEM((T, B, H), jnp.float32),       # hidden sequence (layer handoff)
            pltpu.VMEM((T, B, 4 * H), jnp.float32),   # hoisted input-projection gates
            pltpu.VMEM((B, H), jnp.float32),          # h_t
            pltpu.VMEM((B, H), jnp.float32),          # c_t
        ],
        compiler_params=pltpu.CompilerParams(
            dimension_semantics=("arbitrary",)),
    )(x, prepped["h0"], prepped["c0"], *weight_args,
      prepped["cls_w"], prepped["cls_b"])


# ----------------------------------------------------------------------------
# Parameter init (PyTorch layout) + one-time kernel-friendly prep.
# ----------------------------------------------------------------------------
def init_params(key, input_size, hidden_size, num_layers, num_class):
    """Deterministic init mirroring nn.LSTM / nn.Linear parameter shapes."""
    params = {"lstm": []}
    stdv = 1.0 / np.sqrt(hidden_size)
    for layer in range(num_layers):
        in_sz = input_size if layer == 0 else hidden_size
        key, k1, k2, k3, k4 = jax.random.split(key, 5)
        params["lstm"].append({
            "w_ih": jax.random.uniform(k1, (4 * hidden_size, in_sz),
                                       minval=-stdv, maxval=stdv),
            "w_hh": jax.random.uniform(k2, (4 * hidden_size, hidden_size),
                                       minval=-stdv, maxval=stdv),
            "b_ih": jax.random.uniform(k3, (4 * hidden_size,),
                                       minval=-stdv, maxval=stdv),
            "b_hh": jax.random.uniform(k4, (4 * hidden_size,),
                                       minval=-stdv, maxval=stdv),
        })
    key, k1, k2 = jax.random.split(key, 3)
    params["cls_w"] = jax.random.uniform(k1, (num_class, hidden_size),
                                         minval=-stdv, maxval=stdv)
    params["cls_b"] = jax.random.uniform(k2, (num_class,),
                                         minval=-stdv, maxval=stdv)

    # h_0/c_0: orthogonal-initialized (num_layers, 1, hidden_size), as in
    # the module's forward (deterministic here instead of per-call randn).
    key, k1, k2 = jax.random.split(key, 3)
    orth = jax.nn.initializers.orthogonal()
    params["h0"] = orth(k1, (num_layers, hidden_size)).reshape(
        num_layers, 1, hidden_size).astype(jnp.float32)
    params["c0"] = orth(k2, (num_layers, hidden_size)).reshape(
        num_layers, 1, hidden_size).astype(jnp.float32)
    return params


def _reorder_ifgo_to_ifog(w, H):
    """Reorder rows of a (4H, ...) stacked tensor from [i,f,g,o] to [i,f,o,g]."""
    return jnp.concatenate([w[:2 * H], w[3 * H:4 * H], w[2 * H:3 * H]], axis=0)


def prepare_params(params):
    """One-time weight prep: gate reorder, transpose, bias fusion."""
    H = params["h0"].shape[-1]
    prepped = {"layers": [], "h0": jnp.asarray(params["h0"], jnp.float32),
               "c0": jnp.asarray(params["c0"], jnp.float32)}
    for p in params["lstm"]:
        w_ih_t = _reorder_ifgo_to_ifog(jnp.asarray(p["w_ih"], jnp.float32), H).T
        w_hh_t = _reorder_ifgo_to_ifog(jnp.asarray(p["w_hh"], jnp.float32), H).T
        b = _reorder_ifgo_to_ifog(
            jnp.asarray(p["b_ih"] + p["b_hh"], jnp.float32), H).reshape(1, 4 * H)
        prepped["layers"].append((w_ih_t, w_hh_t, b))
    prepped["cls_w"] = jnp.asarray(params["cls_w"], jnp.float32).T   # (H, C)
    prepped["cls_b"] = jnp.asarray(params["cls_b"], jnp.float32).reshape(1, -1)
    return prepped


# ----------------------------------------------------------------------------
# Pure-JAX reference (correctness check only).
# ----------------------------------------------------------------------------
def reference_forward(x, params):
    hp = lax.Precision.HIGHEST
    H = params["h0"].shape[-1]
    h_seq = x
    for layer, p in enumerate(params["lstm"]):
        T = h_seq.shape[0]
        h = params["h0"][layer]
        c = params["c0"][layer]
        outs = []
        for t in range(T):
            gates = (jnp.dot(h_seq[t], p["w_ih"].T, precision=hp)
                     + jnp.dot(h, p["w_hh"].T, precision=hp)
                     + p["b_ih"] + p["b_hh"])
            i = jax.nn.sigmoid(gates[:, 0 * H:1 * H])
            f = jax.nn.sigmoid(gates[:, 1 * H:2 * H])
            g = jnp.tanh(gates[:, 2 * H:3 * H])
            o = jax.nn.sigmoid(gates[:, 3 * H:4 * H])
            c = f * c + i * g
            h = o * jnp.tanh(c)
            outs.append(h)
        h_seq = jnp.stack(outs, axis=0)
    logits = jnp.dot(h_seq, params["cls_w"].T, precision=hp) + params["cls_b"]
    return jax.nn.log_softmax(logits, axis=1), logits


if __name__ == "__main__":
    # Small shapes consistent with the module's forward (batch must be 1).
    SEQ_LEN, BATCH = 8, 1
    INPUT_SIZE, HIDDEN_SIZE, NUM_LAYERS, NUM_CLASS = 16, 32, 2, 10

    key = jax.random.PRNGKey(0)
    key, kx, kp = jax.random.split(key, 3)
    x = jax.random.normal(kx, (SEQ_LEN, BATCH, INPUT_SIZE), dtype=jnp.float32)
    params = init_params(kp, INPUT_SIZE, HIDDEN_SIZE, NUM_LAYERS, NUM_CLASS)
    prepped = prepare_params(params)

    logp, logits = lstm_model_forward(x, prepped)
    logp = jax.block_until_ready(logp)
    logits = jax.block_until_ready(logits)

    ref_logp, ref_logits = reference_forward(x, params)

    assert logp.shape == (SEQ_LEN, BATCH, NUM_CLASS)
    # Meaningful numeric check on the pre-softmax logits (the module's final
    # log_softmax over dim=1 with B=1 is identically zero by construction).
    np.testing.assert_allclose(np.asarray(logits), np.asarray(ref_logits),
                               rtol=1e-3, atol=1e-3)
    # Module-semantics output check (log_softmax over the batch axis).
    np.testing.assert_allclose(np.asarray(logp), np.asarray(ref_logp),
                               rtol=1e-5, atol=1e-5)
    print("KERNEL_OK")
</pallas_src>

<mosaic_0001>
module attributes {stable_mosaic.version = 11 : i64} {
  func.func @kernel(%arg0: i32, %arg1: memref<8x1x16xf32, #tpu.memory_space<vmem>>, %arg2: memref<2x1x32xf32, #tpu.memory_space<vmem>>, %arg3: memref<2x1x32xf32, #tpu.memory_space<vmem>>, %arg4: memref<16x128xf32, #tpu.memory_space<vmem>>, %arg5: memref<32x128xf32, #tpu.memory_space<vmem>>, %arg6: memref<1x128xf32, #tpu.memory_space<vmem>>, %arg7: memref<32x128xf32, #tpu.memory_space<vmem>>, %arg8: memref<32x128xf32, #tpu.memory_space<vmem>>, %arg9: memref<1x128xf32, #tpu.memory_space<vmem>>, %arg10: memref<32x10xf32, #tpu.memory_space<vmem>>, %arg11: memref<1x10xf32, #tpu.memory_space<vmem>>, %arg12: memref<8x1x10xf32, #tpu.memory_space<vmem>>, %arg13: memref<8x1x10xf32, #tpu.memory_space<vmem>>, %arg14: memref<8x1x32xf32, #tpu.memory_space<vmem>>, %arg15: memref<8x1x128xf32, #tpu.memory_space<vmem>>, %arg16: memref<1x32xf32, #tpu.memory_space<vmem>>, %arg17: memref<1x32xf32, #tpu.memory_space<vmem>>) attributes {dimension_semantics = [#tpu.dimension_semantics<arbitrary>], iteration_bounds = array<i64: 1>, scalar_prefetch = 0 : i64, scratch_operands = 4 : i64, tpu.core_type = #tpu.core_type<tc>, window_params = [{pipeline_mode = #tpu.pipeline_mode<synchronous>, transform_indices = @transform_0, window_bounds = array<i64: 8, 1, 16>}, {pipeline_mode = #tpu.pipeline_mode<synchronous>, transform_indices = @transform_1, window_bounds = array<i64: 2, 1, 32>}, {pipeline_mode = #tpu.pipeline_mode<synchronous>, transform_indices = @transform_2, window_bounds = array<i64: 2, 1, 32>}, {pipeline_mode = #tpu.pipeline_mode<synchronous>, transform_indices = @transform_3, window_bounds = array<i64: 16, 128>}, {pipeline_mode = #tpu.pipeline_mode<synchronous>, transform_indices = @transform_4, window_bounds = array<i64: 32, 128>}, {pipeline_mode = #tpu.pipeline_mode<synchronous>, transform_indices = @transform_5, window_bounds = array<i64: 1, 128>}, {pipeline_mode = #tpu.pipeline_mode<synchronous>, transform_indices = @transform_6, window_bounds = array<i64: 32, 128>}, {pipeline_mode = #tpu.pipeline_mode<synchronous>, transform_indices = @transform_7, window_bounds = array<i64: 32, 128>}, {pipeline_mode = #tpu.pipeline_mode<synchronous>, transform_indices = @transform_8, window_bounds = array<i64: 1, 128>}, {pipeline_mode = #tpu.pipeline_mode<synchronous>, transform_indices = @transform_9, window_bounds = array<i64: 32, 10>}, {pipeline_mode = #tpu.pipeline_mode<synchronous>, transform_indices = @transform_10, window_bounds = array<i64: 1, 10>}, {pipeline_mode = #tpu.pipeline_mode<synchronous>, transform_indices = @transform_11, window_bounds = array<i64: 8, 1, 10>}, {pipeline_mode = #tpu.pipeline_mode<synchronous>, transform_indices = @transform_12, window_bounds = array<i64: 8, 1, 10>}]} {
    %c0 = arith.constant 0 : index
    %c0_0 = arith.constant 0 : index
    %c0_1 = arith.constant 0 : index
    %0 = vector.load %arg1[%c0, %c0_0, %c0_1] : memref<8x1x16xf32, #tpu.memory_space<vmem>>, vector<8x1x16xf32>
    %1 = vector.shape_cast %0 : vector<8x1x16xf32> to vector<8x16xf32>
    %c0_2 = arith.constant 0 : index
    %c0_3 = arith.constant 0 : index
    %2 = vector.load %arg4[%c0_2, %c0_3] : memref<16x128xf32, #tpu.memory_space<vmem>>, vector<16x128xf32>
    %cst = arith.constant dense<0.000000e+00> : vector<8x128xf32>
    %3 = tpu.matmul %1, %2, %cst {dimension_numbers = #tpu.dot_dimension_numbers<[1], [0], [0], [1], [0, 0, 1, 1], [], []>} : vector<8x16xf32>, vector<16x128xf32>, vector<8x128xf32> -> vector<8x128xf32>
    %c0_4 = arith.constant 0 : index
    %c0_5 = arith.constant 0 : index
    %4 = vector.load %arg6[%c0_4, %c0_5] : memref<1x128xf32, #tpu.memory_space<vmem>>, vector<1x128xf32>
    %5 = vector.broadcast %4 : vector<1x128xf32> to vector<8x128xf32>
    %6 = arith.addf %3, %5 : vector<8x128xf32>
    %7 = vector.shape_cast %6 : vector<8x128xf32> to vector<8x1x128xf32>
    %c0_6 = arith.constant 0 : index
    %c0_7 = arith.constant 0 : index
    %c0_8 = arith.constant 0 : index
    %8 = vector.load %arg15[%c0_6, %c0_7, %c0_8] : memref<8x1x128xf32, #tpu.memory_space<vmem>>, vector<8x1x128xf32>
    tpu.vector_store %arg15[%c0_6, %c0_7, %c0_8], %7 {strides = array<i32>} : memref<8x1x128xf32, #tpu.memory_space<vmem>>, vector<8x1x128xf32>,
    %c0_9 = arith.constant 0 : index
    %c0_10 = arith.constant 0 : index
    %9 = vector.load %arg5[%c0_9, %c0_10] : memref<32x128xf32, #tpu.memory_space<vmem>>, vector<32x128xf32>
    %c0_11 = arith.constant 0 : index
    %c0_12 = arith.constant 0 : index
    %c0_13 = arith.constant 0 : index
    %10 = vector.load %arg2[%c0_11, %c0_12, %c0_13] : memref<2x1x32xf32, #tpu.memory_space<vmem>>, vector<1x1x32xf32>
    %11 = vector.shape_cast %10 : vector<1x1x32xf32> to vector<1x32xf32>
    %c0_14 = arith.constant 0 : index
    %c0_15 = arith.constant 0 : index
    %12 = vector.load %arg16[%c0_14, %c0_15] : memref<1x32xf32, #tpu.memory_space<vmem>>, vector<1x32xf32>
    tpu.vector_store %arg16[%c0_14, %c0_15], %11 {strides = array<i32>} : memref<1x32xf32, #tpu.memory_space<vmem>>, vector<1x32xf32>,
    %c0_16 = arith.constant 0 : index
    %c0_17 = arith.constant 0 : index
    %c0_18 = arith.constant 0 : index
    %13 = vector.load %arg3[%c0_16, %c0_17, %c0_18] : memref<2x1x32xf32, #tpu.memory_space<vmem>>, vector<1x1x32xf32>
    %14 = vector.shape_cast %13 : vector<1x1x32xf32> to vector<1x32xf32>
    %c0_19 = arith.constant 0 : index
    %c0_20 = arith.constant 0 : index
    %15 = vector.load %arg17[%c0_19, %c0_20] : memref<1x32xf32, #tpu.memory_space<vmem>>, vector<1x32xf32>
    tpu.vector_store %arg17[%c0_19, %c0_20], %14 {strides = array<i32>} : memref<1x32xf32, #tpu.memory_space<vmem>>, vector<1x32xf32>,
    %c0_i32 = arith.constant 0 : i32
    %c1_i32 = arith.constant 1 : i32
    %16 = arith.muli %c0_i32, %c1_i32 : i32
    %c0_i32_21 = arith.constant 0 : i32
    %17 = arith.addi %c0_i32_21, %16 : i32
    %c0_22 = arith.constant 0 : index
    %c0_23 = arith.constant 0 : index
    %18 = vector.load %arg16[%c0_22, %c0_23] : memref<1x32xf32, #tpu.memory_space<vmem>>, vector<1x32xf32>
    %c0_24 = arith.constant 0 : index
    %c0_25 = arith.constant 0 : index
    %19 = vector.load %arg17[%c0_24, %c0_25] : memref<1x32xf32, #tpu.memory_space<vmem>>, vector<1x32xf32>
    %20 = arith.index_cast %17 : i32 to index
    %c0_26 = arith.constant 0 : index
    %c0_27 = arith.constant 0 : index
    %21 = vector.load %arg15[%20, %c0_26, %c0_27] : memref<8x1x128xf32, #tpu.memory_space<vmem>>, vector<1x1x128xf32>
    %22 = vector.shape_cast %21 : vector<1x1x128xf32> to vector<1x128xf32>
    %cst_28 = arith.constant dense<0.000000e+00> : vector<1x128xf32>
    %23 = tpu.matmul %18, %9, %cst_28 {dimension_numbers = #tpu.dot_dimension_numbers<[1], [0], [0], [1], [0, 0, 1, 1], [], []>} : vector<1x32xf32>, vector<32x128xf32>, vector<1x128xf32> -> vector<1x128xf32>
    %24 = arith.addf %22, %23 : vector<1x128xf32>
    %25 = vector.extract_strided_slice %24 {offsets = [0, 0], sizes = [1, 96], strides = [1, 1]} : vector<1x128xf32> to vector<1x96xf32>
    %26 = arith.negf %25 : vector<1x96xf32>
    %27 = math.exp %26 : vector<1x96xf32>
    %cst_29 = arith.constant 1.000000e+00 : f32
    %28 = vector.broadcast %cst_29 : f32 to vector<1x96xf32>
    %29 = arith.addf %28, %27 : vector<1x96xf32>
    %30 = arith.divf %28, %29 : vector<1x96xf32>
    %31 = vector.extract_strided_slice %24 {offsets = [0, 96], sizes = [1, 32], strides = [1, 1]} : vector<1x128xf32> to vector<1x32xf32>
    %32 = math.tanh %31 : vector<1x32xf32>
    %33 = vector.extract_strided_slice %30 {offsets = [0, 0], sizes = [1, 32], strides = [1, 1]} : vector<1x96xf32> to vector<1x32xf32>
    %34 = vector.extract_strided_slice %30 {offsets = [0, 32], sizes = [1, 32], strides = [1, 1]} : vector<1x96xf32> to vector<1x32xf32>
    %35 = vector.extract_strided_slice %30 {offsets = [0, 64], sizes = [1, 32], strides = [1, 1]} : vector<1x96xf32> to vector<1x32xf32>
    %36 = arith.mulf %34, %19 : vector<1x32xf32>
    %37 = arith.mulf %33, %32 : vector<1x32xf32>
    %38 = arith.addf %36, %37 : vector<1x32xf32>
    %39 = math.tanh %38 : vector<1x32xf32>
    %40 = arith.mulf %35, %39 : vector<1x32xf32>
    %c0_30 = arith.constant 0 : index
    %c0_31 = arith.constant 0 : index
    %41 = vector.load %arg17[%c0_30, %c0_31] : memref<1x32xf32, #tpu.memory_space<vmem>>, vector<1x32xf32>
    tpu.vector_store %arg17[%c0_30, %c0_31], %38 {strides = array<i32>} : memref<1x32xf32, #tpu.memory_space<vmem>>, vector<1x32xf32>,
    %c0_32 = arith.constant 0 : index
    %c0_33 = arith.constant 0 : index
    %42 = vector.load %arg16[%c0_32, %c0_33] : memref<1x32xf32, #tpu.memory_space<vmem>>, vector<1x32xf32>
    tpu.vector_store %arg16[%c0_32, %c0_33], %40 {strides = array<i32>} : memref<1x32xf32, #tpu.memory_space<vmem>>, vector<1x32xf32>,
    %43 = arith.index_cast %17 : i32 to index
    %c0_34 = arith.constant 0 : index
    %c0_35 = arith.constant 0 : index
    %44 = vector.load %arg14[%43, %c0_34, %c0_35] : memref<8x1x32xf32, #tpu.memory_space<vmem>>, vector<1x1x32xf32>
    %45 = vector.shape_cast %44 : vector<1x1x32xf32> to vector<1x32xf32>
    %46 = vector.shape_cast %40 : vector<1x32xf32> to vector<1x1x32xf32>
    tpu.vector_store %arg14[%43, %c0_34, %c0_35], %46 {strides = array<i32>} : memref<8x1x32xf32, #tpu.memory_space<vmem>>, vector<1x1x32xf32>,
    %c1_i32_36 = arith.constant 1 : i32
    %c1_i32_37 = arith.constant 1 : i32
    %47 = arith.muli %c1_i32_36, %c1_i32_37 : i32
    %c0_i32_38 = arith.constant 0 : i32
    %48 = arith.addi %c0_i32_38, %47 : i32
    %c0_39 = arith.constant 0 : index
    %c0_40 = arith.constant 0 : index
    %49 = vector.load %arg16[%c0_39, %c0_40] : memref<1x32xf32, #tpu.memory_space<vmem>>, vector<1x32xf32>
    %c0_41 = arith.constant 0 : index
    %c0_42 = arith.constant 0 : index
    %50 = vector.load %arg17[%c0_41, %c0_42] : memref<1x32xf32, #tpu.memory_space<vmem>>, vector<1x32xf32>
    %51 = arith.index_cast %48 : i32 to index
    %c0_43 = arith.constant 0 : index
    %c0_44 = arith.constant 0 : index
    %52 = vector.load %arg15[%51, %c0_43, %c0_44] : memref<8x1x128xf32, #tpu.memory_space<vmem>>, vector<1x1x128xf32>
    %53 = vector.shape_cast %52 : vector<1x1x128xf32> to vector<1x128xf32>
    %cst_45 = arith.constant dense<0.000000e+00> : vector<1x128xf32>
    %54 = tpu.matmul %49, %9, %cst_45 {dimension_numbers = #tpu.dot_dimension_numbers<[1], [0], [0], [1], [0, 0, 1, 1], [], []>} : vector<1x32xf32>, vector<32x128xf32>, vector<1x128xf32> -> vector<1x128xf32>
    %55 = arith.addf %53, %54 : vector<1x128xf32>
    %56 = vector.extract_strided_slice %55 {offsets = [0, 0], sizes = [1, 96], strides = [1, 1]} : vector<1x128xf32> to vector<1x96xf32>
    %57 = arith.negf %56 : vector<1x96xf32>
    %58 = math.exp %57 : vector<1x96xf32>
    %cst_46 = arith.constant 1.000000e+00 : f32
    %59 = vector.broadcast %cst_46 : f32 to vector<1x96xf32>
    %60 = arith.addf %59, %58 : vector<1x96xf32>
    %61 = arith.divf %59, %60 : vector<1x96xf32>
    %62 = vector.extract_strided_slice %55 {offsets = [0, 96], sizes = [1, 32], strides = [1, 1]} : vector<1x128xf32> to vector<1x32xf32>
    %63 = math.tanh %62 : vector<1x32xf32>
    %64 = vector.extract_strided_slice %61 {offsets = [0, 0], sizes = [1, 32], strides = [1, 1]} : vector<1x96xf32> to vector<1x32xf32>
    %65 = vector.extract_strided_slice %61 {offsets = [0, 32], sizes = [1, 32], strides = [1, 1]} : vector<1x96xf32> to vector<1x32xf32>
    %66 = vector.extract_strided_slice %61 {offsets = [0, 64], sizes = [1, 32], strides = [1, 1]} : vector<1x96xf32> to vector<1x32xf32>
    %67 = arith.mulf %65, %50 : vector<1x32xf32>
    %68 = arith.mulf %64, %63 : vector<1x32xf32>
    %69 = arith.addf %67, %68 : vector<1x32xf32>
    %70 = math.tanh %69 : vector<1x32xf32>
    %71 = arith.mulf %66, %70 : vector<1x32xf32>
    %c0_47 = arith.constant 0 : index
    %c0_48 = arith.constant 0 : index
    %72 = vector.load %arg17[%c0_47, %c0_48] : memref<1x32xf32, #tpu.memory_space<vmem>>, vector<1x32xf32>
    tpu.vector_store %arg17[%c0_47, %c0_48], %69 {strides = array<i32>} : memref<1x32xf32, #tpu.memory_space<vmem>>, vector<1x32xf32>,
    %c0_49 = arith.constant 0 : index
    %c0_50 = arith.constant 0 : index
    %73 = vector.load %arg16[%c0_49, %c0_50] : memref<1x32xf32, #tpu.memory_space<vmem>>, vector<1x32xf32>
    tpu.vector_store %arg16[%c0_49, %c0_50], %71 {strides = array<i32>} : memref<1x32xf32, #tpu.memory_space<vmem>>, vector<1x32xf32>,
    %74 = arith.index_cast %48 : i32 to index
    %c0_51 = arith.constant 0 : index
    %c0_52 = arith.constant 0 : index
    %75 = vector.load %arg14[%74, %c0_51, %c0_52] : memref<8x1x32xf32, #tpu.memory_space<vmem>>, vector<1x1x32xf32>
    %76 = vector.shape_cast %75 : vector<1x1x32xf32> to vector<1x32xf32>
    %77 = vector.shape_cast %71 : vector<1x32xf32> to vector<1x1x32xf32>
    tpu.vector_store %arg14[%74, %c0_51, %c0_52], %77 {strides = array<i32>} : memref<8x1x32xf32, #tpu.memory_space<vmem>>, vector<1x1x32xf32>,
    %c2_i32 = arith.constant 2 : i32
    %c1_i32_53 = arith.constant 1 : i32
    %78 = arith.muli %c2_i32, %c1_i32_53 : i32
    %c0_i32_54 = arith.constant 0 : i32
    %79 = arith.addi %c0_i32_54, %78 : i32
    %c0_55 = arith.constant 0 : index
    %c0_56 = arith.constant 0 : index
    %80 = vector.load %arg16[%c0_55, %c0_56] : memref<1x32xf32, #tpu.memory_space<vmem>>, vector<1x32xf32>
    %c0_57 = arith.constant 0 : index
    %c0_58 = arith.constant 0 : index
    %81 = vector.load %arg17[%c0_57, %c0_58] : memref<1x32xf32, #tpu.memory_space<vmem>>, vector<1x32xf32>
    %82 = arith.index_cast %79 : i32 to index
    %c0_59 = arith.constant 0 : index
    %c0_60 = arith.constant 0 : index
    %83 = vector.load %arg15[%82, %c0_59, %c0_60] : memref<8x1x128xf32, #tpu.memory_space<vmem>>, vector<1x1x128xf32>
    %84 = vector.shape_cast %83 : vector<1x1x128xf32> to vector<1x128xf32>
    %cst_61 = arith.constant dense<0.000000e+00> : vector<1x128xf32>
    %85 = tpu.matmul %80, %9, %cst_61 {dimension_numbers = #tpu.dot_dimension_numbers<[1], [0], [0], [1], [0, 0, 1, 1], [], []>} : vector<1x32xf32>, vector<32x128xf32>, vector<1x128xf32> -> vector<1x128xf32>
    %86 = arith.addf %84, %85 : vector<1x128xf32>
    %87 = vector.extract_strided_slice %86 {offsets = [0, 0], sizes = [1, 96], strides = [1, 1]} : vector<1x128xf32> to vector<1x96xf32>
    %88 = arith.negf %87 : vector<1x96xf32>
    %89 = math.exp %88 : vector<1x96xf32>
    %cst_62 = arith.constant 1.000000e+00 : f32
    %90 = vector.broadcast %cst_62 : f32 to vector<1x96xf32>
    %91 = arith.addf %90, %89 : vector<1x96xf32>
    %92 = arith.divf %90, %91 : vector<1x96xf32>
    %93 = vector.extract_strided_slice %86 {offsets = [0, 96], sizes = [1, 32], strides = [1, 1]} : vector<1x128xf32> to vector<1x32xf32>
    %94 = math.tanh %93 : vector<1x32xf32>
    %95 = vector.extract_strided_slice %92 {offsets = [0, 0], sizes = [1, 32], strides = [1, 1]} : vector<1x96xf32> to vector<1x32xf32>
    %96 = vector.extract_strided_slice %92 {offsets = [0, 32], sizes = [1, 32], strides = [1, 1]} : vector<1x96xf32> to vector<1x32xf32>
    %97 = vector.extract_strided_slice %92 {offsets = [0, 64], sizes = [1, 32], strides = [1, 1]} : vector<1x96xf32> to vector<1x32xf32>
    %98 = arith.mulf %96, %81 : vector<1x32xf32>
    %99 = arith.mulf %95, %94 : vector<1x32xf32>
    %100 = arith.addf %98, %99 : vector<1x32xf32>
    %101 = math.tanh %100 : vector<1x32xf32>
    %102 = arith.mulf %97, %101 : vector<1x32xf32>
    %c0_63 = arith.constant 0 : index
    %c0_64 = arith.constant 0 : index
    %103 = vector.load %arg17[%c0_63, %c0_64] : memref<1x32xf32, #tpu.memory_space<vmem>>, vector<1x32xf32>
    tpu.vector_store %arg17[%c0_63, %c0_64], %100 {strides = array<i32>} : memref<1x32xf32, #tpu.memory_space<vmem>>, vector<1x32xf32>,
    %c0_65 = arith.constant 0 : index
    %c0_66 = arith.constant 0 : index
    %104 = vector.load %arg16[%c0_65, %c0_66] : memref<1x32xf32, #tpu.memory_space<vmem>>, vector<1x32xf32>
    tpu.vector_store %arg16[%c0_65, %c0_66], %102 {strides = array<i32>} : memref<1x32xf32, #tpu.memory_space<vmem>>, vector<1x32xf32>,
    %105 = arith.index_cast %79 : i32 to index
    %c0_67 = arith.constant 0 : index
    %c0_68 = arith.constant 0 : index
    %106 = vector.load %arg14[%105, %c0_67, %c0_68] : memref<8x1x32xf32, #tpu.memory_space<vmem>>, vector<1x1x32xf32>
    %107 = vector.shape_cast %106 : vector<1x1x32xf32> to vector<1x32xf32>
    %108 = vector.shape_cast %102 : vector<1x32xf32> to vector<1x1x32xf32>
    tpu.vector_store %arg14[%105, %c0_67, %c0_68], %108 {strides = array<i32>} : memref<8x1x32xf32, #tpu.memory_space<vmem>>, vector<1x1x32xf32>,
    %c3_i32 = arith.constant 3 : i32
    %c1_i32_69 = arith.constant 1 : i32
    %109 = arith.muli %c3_i32, %c1_i32_69 : i32
    %c0_i32_70 = arith.constant 0 : i32
    %110 = arith.addi %c0_i32_70, %109 : i32
    %c0_71 = arith.constant 0 : index
    %c0_72 = arith.constant 0 : index
    %111 = vector.load %arg16[%c0_71, %c0_72] : memref<1x32xf32, #tpu.memory_space<vmem>>, vector<1x32xf32>
    %c0_73 = arith.constant 0 : index
    %c0_74 = arith.constant 0 : index
    %112 = vector.load %arg17[%c0_73, %c0_74] : memref<1x32xf32, #tpu.memory_space<vmem>>, vector<1x32xf32>
    %113 = arith.index_cast %110 : i32 to index
    %c0_75 = arith.constant 0 : index
    %c0_76 = arith.constant 0 : index
    %114 = vector.load %arg15[%113, %c0_75, %c0_76] : memref<8x1x128xf32, #tpu.memory_space<vmem>>, vector<1x1x128xf32>
    %115 = vector.shape_cast %114 : vector<1x1x128xf32> to vector<1x128xf32>
    %cst_77 = arith.constant dense<0.000000e+00> : vector<1x128xf32>
    %116 = tpu.matmul %111, %9, %cst_77 {dimension_numbers = #tpu.dot_dimension_numbers<[1], [0], [0], [1], [0, 0, 1, 1], [], []>} : vector<1x32xf32>, vector<32x128xf32>, vector<1x128xf32> -> vector<1x128xf32>
    %117 = arith.addf %115, %116 : vector<1x128xf32>
    %118 = vector.extract_strided_slice %117 {offsets = [0, 0], sizes = [1, 96], strides = [1, 1]} : vector<1x128xf32> to vector<1x96xf32>
    %119 = arith.negf %118 : vector<1x96xf32>
    %120 = math.exp %119 : vector<1x96xf32>
    %cst_78 = arith.constant 1.000000e+00 : f32
    %121 = vector.broadcast %cst_78 : f32 to vector<1x96xf32>
    %122 = arith.addf %121, %120 : vector<1x96xf32>
    %123 = arith.divf %121, %122 : vector<1x96xf32>
    %124 = vector.extract_strided_slice %117 {offsets = [0, 96], sizes = [1, 32], strides = [1, 1]} : vector<1x128xf32> to vector<1x32xf32>
    %125 = math.tanh %124 : vector<1x32xf32>
    %126 = vector.extract_strided_slice %123 {offsets = [0, 0], sizes = [1, 32], strides = [1, 1]} : vector<1x96xf32> to vector<1x32xf32>
    %127 = vector.extract_strided_slice %123 {offsets = [0, 32], sizes = [1, 32], strides = [1, 1]} : vector<1x96xf32> to vector<1x32xf32>
    %128 = vector.extract_strided_slice %123 {offsets = [0, 64], sizes = [1, 32], strides = [1, 1]} : vector<1x96xf32> to vector<1x32xf32>
    %129 = arith.mulf %127, %112 : vector<1x32xf32>
    %130 = arith.mulf %126, %125 : vector<1x32xf32>
    %131 = arith.addf %129, %130 : vector<1x32xf32>
    %132 = math.tanh %131 : vector<1x32xf32>
    %133 = arith.mulf %128, %132 : vector<1x32xf32>
    %c0_79 = arith.constant 0 : index
    %c0_80 = arith.constant 0 : index
    %134 = vector.load %arg17[%c0_79, %c0_80] : memref<1x32xf32, #tpu.memory_space<vmem>>, vector<1x32xf32>
    tpu.vector_store %arg17[%c0_79, %c0_80], %131 {strides = array<i32>} : memref<1x32xf32, #tpu.memory_space<vmem>>, vector<1x32xf32>,
    %c0_81 = arith.constant 0 : index
    %c0_82 = arith.constant 0 : index
    %135 = vector.load %arg16[%c0_81, %c0_82] : memref<1x32xf32, #tpu.memory_space<vmem>>, vector<1x32xf32>
    tpu.vector_store %arg16[%c0_81, %c0_82], %133 {strides = array<i32>} : memref<1x32xf32, #tpu.memory_space<vmem>>, vector<1x32xf32>,
    %136 = arith.index_cast %110 : i32 to index
    %c0_83 = arith.constant 0 : index
    %c0_84 = arith.constant 0 : index
    %137 = vector.load %arg14[%136, %c0_83, %c0_84] : memref<8x1x32xf32, #tpu.memory_space<vmem>>, vector<1x1x32xf32>
    %138 = vector.shape_cast %137 : vector<1x1x32xf32> to vector<1x32xf32>
    %139 = vector.shape_cast %133 : vector<1x32xf32> to vector<1x1x32xf32>
    tpu.vector_store %arg14[%136, %c0_83, %c0_84], %139 {strides = array<i32>} : memref<8x1x32xf32, #tpu.memory_space<vmem>>, vector<1x1x32xf32>,
    %c4_i32 = arith.constant 4 : i32
    %c1_i32_85 = arith.constant 1 : i32
    %140 = arith.muli %c4_i32, %c1_i32_85 : i32
    %c0_i32_86 = arith.constant 0 : i32
    %141 = arith.addi %c0_i32_86, %140 : i32
    %c0_87 = arith.constant 0 : index
    %c0_88 = arith.constant 0 : index
    %142 = vector.load %arg16[%c0_87, %c0_88] : memref<1x32xf32, #tpu.memory_space<vmem>>, vector<1x32xf32>
    %c0_89 = arith.constant 0 : index
    %c0_90 = arith.constant 0 : index
    %143 = vector.load %arg17[%c0_89, %c0_90] : memref<1x32xf32, #tpu.memory_space<vmem>>, vector<1x32xf32>
    %144 = arith.index_cast %141 : i32 to index
    %c0_91 = arith.constant 0 : index
    %c0_92 = arith.constant 0 : index
    %145 = vector.load %arg15[%144, %c0_91, %c0_92] : memref<8x1x128xf32, #tpu.memory_space<vmem>>, vector<1x1x128xf32>
    %146 = vector.shape_cast %145 : vector<1x1x128xf32> to vector<1x128xf32>
    %cst_93 = arith.constant dense<0.000000e+00> : vector<1x128xf32>
    %147 = tpu.matmul %142, %9, %cst_93 {dimension_numbers = #tpu.dot_dimension_numbers<[1], [0], [0], [1], [0, 0, 1, 1], [], []>} : vector<1x32xf32>, vector<32x128xf32>, vector<1x128xf32> -> vector<1x128xf32>
    %148 = arith.addf %146, %147 : vector<1x128xf32>
    %149 = vector.extract_strided_slice %148 {offsets = [0, 0], sizes = [1, 96], strides = [1, 1]} : vector<1x128xf32> to vector<1x96xf32>
    %150 = arith.negf %149 : vector<1x96xf32>
    %151 = math.exp %150 : vector<1x96xf32>
    %cst_94 = arith.constant 1.000000e+00 : f32
    %152 = vector.broadcast %cst_94 : f32 to vector<1x96xf32>
    %153 = arith.addf %152, %151 : vector<1x96xf32>
    %154 = arith.divf %152, %153 : vector<1x96xf32>
    %155 = vector.extract_strided_slice %148 {offsets = [0, 96], sizes = [1, 32], strides = [1, 1]} : vector<1x128xf32> to vector<1x32xf32>
    %156 = math.tanh %155 : vector<1x32xf32>
    %157 = vector.extract_strided_slice %154 {offsets = [0, 0], sizes = [1, 32], strides = [1, 1]} : vector<1x96xf32> to vector<1x32xf32>
    %158 = vector.extract_strided_slice %154 {offsets = [0, 32], sizes = [1, 32], strides = [1, 1]} : vector<1x96xf32> to vector<1x32xf32>
    %159 = vector.extract_strided_slice %154 {offsets = [0, 64], sizes = [1, 32], strides = [1, 1]} : vector<1x96xf32> to vector<1x32xf32>
    %160 = arith.mulf %158, %143 : vector<1x32xf32>
    %161 = arith.mulf %157, %156 : vector<1x32xf32>
    %162 = arith.addf %160, %161 : vector<1x32xf32>
    %163 = math.tanh %162 : vector<1x32xf32>
    %164 = arith.mulf %159, %163 : vector<1x32xf32>
    %c0_95 = arith.constant 0 : index
    %c0_96 = arith.constant 0 : index
    %165 = vector.load %arg17[%c0_95, %c0_96] : memref<1x32xf32, #tpu.memory_space<vmem>>, vector<1x32xf32>
    tpu.vector_store %arg17[%c0_95, %c0_96], %162 {strides = array<i32>} : memref<1x32xf32, #tpu.memory_space<vmem>>, vector<1x32xf32>,
    %c0_97 = arith.constant 0 : index
    %c0_98 = arith.constant 0 : index
    %166 = vector.load %arg16[%c0_97, %c0_98] : memref<1x32xf32, #tpu.memory_space<vmem>>, vector<1x32xf32>
    tpu.vector_store %arg16[%c0_97, %c0_98], %164 {strides = array<i32>} : memref<1x32xf32, #tpu.memory_space<vmem>>, vector<1x32xf32>,
    %167 = arith.index_cast %141 : i32 to index
    %c0_99 = arith.constant 0 : index
    %c0_100 = arith.constant 0 : index
    %168 = vector.load %arg14[%167, %c0_99, %c0_100] : memref<8x1x32xf32, #tpu.memory_space<vmem>>, vector<1x1x32xf32>
    %169 = vector.shape_cast %168 : vector<1x1x32xf32> to vector<1x32xf32>
    %170 = vector.shape_cast %164 : vector<1x32xf32> to vector<1x1x32xf32>
    tpu.vector_store %arg14[%167, %c0_99, %c0_100], %170 {strides = array<i32>} : memref<8x1x32xf32, #tpu.memory_space<vmem>>, vector<1x1x32xf32>,
    %c5_i32 = arith.constant 5 : i32
    %c1_i32_101 = arith.constant 1 : i32
    %171 = arith.muli %c5_i32, %c1_i32_101 : i32
    %c0_i32_102 = arith.constant 0 : i32
    %172 = arith.addi %c0_i32_102, %171 : i32
    %c0_103 = arith.constant 0 : index
    %c0_104 = arith.constant 0 : index
    %173 = vector.load %arg16[%c0_103, %c0_104] : memref<1x32xf32, #tpu.memory_space<vmem>>, vector<1x32xf32>
    %c0_105 = arith.constant 0 : index
    %c0_106 = arith.constant 0 : index
    %174 = vector.load %arg17[%c0_105, %c0_106] : memref<1x32xf32, #tpu.memory_space<vmem>>, vector<1x32xf32>
    %175 = arith.index_cast %172 : i32 to index
    %c0_107 = arith.constant 0 : index
    %c0_108 = arith.constant 0 : index
    %176 = vector.load %arg15[%175, %c0_107, %c0_108] : memref<8x1x128xf32, #tpu.memory_space<vmem>>, vector<1x1x128xf32>
    %177 = vector.shape_cast %176 : vector<1x1x128xf32> to vector<1x128xf32>
    %cst_109 = arith.constant dense<0.000000e+00> : vector<1x128xf32>
    %178 = tpu.matmul %173, %9, %cst_109 {dimension_numbers = #tpu.dot_dimension_numbers<[1], [0], [0], [1], [0, 0, 1, 1], [], []>} : vector<1x32xf32>, vector<32x128xf32>, vector<1x128xf32> -> vector<1x128xf32>
    %179 = arith.addf %177, %178 : vector<1x128xf32>
    %180 = vector.extract_strided_slice %179 {offsets = [0, 0], sizes = [1, 96], strides = [1, 1]} : vector<1x128xf32> to vector<1x96xf32>
    %181 = arith.negf %180 : vector<1x96xf32>
    %182 = math.exp %181 : vector<1x96xf32>
    %cst_110 = arith.constant 1.000000e+00 : f32
    %183 = vector.broadcast %cst_110 : f32 to vector<1x96xf32>
    %184 = arith.addf %183, %182 : vector<1x96xf32>
    %185 = arith.divf %183, %184 : vector<1x96xf32>
    %186 = vector.extract_strided_slice %179 {offsets = [0, 96], sizes = [1, 32], strides = [1, 1]} : vector<1x128xf32> to vector<1x32xf32>
    %187 = math.tanh %186 : vector<1x32xf32>
    %188 = vector.extract_strided_slice %185 {offsets = [0, 0], sizes = [1, 32], strides = [1, 1]} : vector<1x96xf32> to vector<1x32xf32>
    %189 = vector.extract_strided_slice %185 {offsets = [0, 32], sizes = [1, 32], strides = [1, 1]} : vector<1x96xf32> to vector<1x32xf32>
    %190 = vector.extract_strided_slice %185 {offsets = [0, 64], sizes = [1, 32], strides = [1, 1]} : vector<1x96xf32> to vector<1x32xf32>
    %191 = arith.mulf %189, %174 : vector<1x32xf32>
    %192 = arith.mulf %188, %187 : vector<1x32xf32>
    %193 = arith.addf %191, %192 : vector<1x32xf32>
    %194 = math.tanh %193 : vector<1x32xf32>
    %195 = arith.mulf %190, %194 : vector<1x32xf32>
    %c0_111 = arith.constant 0 : index
    %c0_112 = arith.constant 0 : index
    %196 = vector.load %arg17[%c0_111, %c0_112] : memref<1x32xf32, #tpu.memory_space<vmem>>, vector<1x32xf32>
    tpu.vector_store %arg17[%c0_111, %c0_112], %193 {strides = array<i32>} : memref<1x32xf32, #tpu.memory_space<vmem>>, vector<1x32xf32>,
    %c0_113 = arith.constant 0 : index
    %c0_114 = arith.constant 0 : index
    %197 = vector.load %arg16[%c0_113, %c0_114] : memref<1x32xf32, #tpu.memory_space<vmem>>, vector<1x32xf32>
    tpu.vector_store %arg16[%c0_113, %c0_114], %195 {strides = array<i32>} : memref<1x32xf32, #tpu.memory_space<vmem>>, vector<1x32xf32>,
    %198 = arith.index_cast %172 : i32 to index
    %c0_115 = arith.constant 0 : index
    %c0_116 = arith.constant 0 : index
    %199 = vector.load %arg14[%198, %c0_115, %c0_116] : memref<8x1x32xf32, #tpu.memory_space<vmem>>, vector<1x1x32xf32>
    %200 = vector.shape_cast %199 : vector<1x1x32xf32> to vector<1x32xf32>
    %201 = vector.shape_cast %195 : vector<1x32xf32> to vector<1x1x32xf32>
    tpu.vector_store %arg14[%198, %c0_115, %c0_116], %201 {strides = array<i32>} : memref<8x1x32xf32, #tpu.memory_space<vmem>>, vector<1x1x32xf32>,
    %c6_i32 = arith.constant 6 : i32
    %c1_i32_117 = arith.constant 1 : i32
    %202 = arith.muli %c6_i32, %c1_i32_117 : i32
    %c0_i32_118 = arith.constant 0 : i32
    %203 = arith.addi %c0_i32_118, %202 : i32
    %c0_119 = arith.constant 0 : index
    %c0_120 = arith.constant 0 : index
    %204 = vector.load %arg16[%c0_119, %c0_120] : memref<1x32xf32, #tpu.memory_space<vmem>>, vector<1x32xf32>
    %c0_121 = arith.constant 0 : index
    %c0_122 = arith.constant 0 : index
    %205 = vector.load %arg17[%c0_121, %c0_122] : memref<1x32xf32, #tpu.memory_space<vmem>>, vector<1x32xf32>
    %206 = arith.index_cast %203 : i32 to index
    %c0_123 = arith.constant 0 : index
    %c0_124 = arith.constant 0 : index
    %207 = vector.load %arg15[%206, %c0_123, %c0_124] : memref<8x1x128xf32, #tpu.memory_space<vmem>>, vector<1x1x128xf32>
    %208 = vector.shape_cast %207 : vector<1x1x128xf32> to vector<1x128xf32>
    %cst_125 = arith.constant dense<0.000000e+00> : vector<1x128xf32>
    %209 = tpu.matmul %204, %9, %cst_125 {dimension_numbers = #tpu.dot_dimension_numbers<[1], [0], [0], [1], [0, 0, 1, 1], [], []>} : vector<1x32xf32>, vector<32x128xf32>, vector<1x128xf32> -> vector<1x128xf32>
    %210 = arith.addf %208, %209 : vector<1x128xf32>
    %211 = vector.extract_strided_slice %210 {offsets = [0, 0], sizes = [1, 96], strides = [1, 1]} : vector<1x128xf32> to vector<1x96xf32>
    %212 = arith.negf %211 : vector<1x96xf32>
    %213 = math.exp %212 : vector<1x96xf32>
    %cst_126 = arith.constant 1.000000e+00 : f32
    %214 = vector.broadcast %cst_126 : f32 to vector<1x96xf32>
    %215 = arith.addf %214, %213 : vector<1x96xf32>
    %216 = arith.divf %214, %215 : vector<1x96xf32>
    %217 = vector.extract_strided_slice %210 {offsets = [0, 96], sizes = [1, 32], strides = [1, 1]} : vector<1x128xf32> to vector<1x32xf32>
    %218 = math.tanh %217 : vector<1x32xf32>
    %219 = vector.extract_strided_slice %216 {offsets = [0, 0], sizes = [1, 32], strides = [1, 1]} : vector<1x96xf32> to vector<1x32xf32>
    %220 = vector.extract_strided_slice %216 {offsets = [0, 32], sizes = [1, 32], strides = [1, 1]} : vector<1x96xf32> to vector<1x32xf32>
    %221 = vector.extract_strided_slice %216 {offsets = [0, 64], sizes = [1, 32], strides = [1, 1]} : vector<1x96xf32> to vector<1x32xf32>
    %222 = arith.mulf %220, %205 : vector<1x32xf32>
    %223 = arith.mulf %219, %218 : vector<1x32xf32>
    %224 = arith.addf %222, %223 : vector<1x32xf32>
    %225 = math.tanh %224 : vector<1x32xf32>
    %226 = arith.mulf %221, %225 : vector<1x32xf32>
    %c0_127 = arith.constant 0 : index
    %c0_128 = arith.constant 0 : index
    %227 = vector.load %arg17[%c0_127, %c0_128] : memref<1x32xf32, #tpu.memory_space<vmem>>, vector<1x32xf32>
    tpu.vector_store %arg17[%c0_127, %c0_128], %224 {strides = array<i32>} : memref<1x32xf32, #tpu.memory_space<vmem>>, vector<1x32xf32>,
    %c0_129 = arith.constant 0 : index
    %c0_130 = arith.constant 0 : index
    %228 = vector.load %arg16[%c0_129, %c0_130] : memref<1x32xf32, #tpu.memory_space<vmem>>, vector<1x32xf32>
    tpu.vector_store %arg16[%c0_129, %c0_130], %226 {strides = array<i32>} : memref<1x32xf32, #tpu.memory_space<vmem>>, vector<1x32xf32>,
    %229 = arith.index_cast %203 : i32 to index
    %c0_131 = arith.constant 0 : index
    %c0_132 = arith.constant 0 : index
    %230 = vector.load %arg14[%229, %c0_131, %c0_132] : memref<8x1x32xf32, #tpu.memory_space<vmem>>, vector<1x1x32xf32>
    %231 = vector.shape_cast %230 : vector<1x1x32xf32> to vector<1x32xf32>
    %232 = vector.shape_cast %226 : vector<1x32xf32> to vector<1x1x32xf32>
    tpu.vector_store %arg14[%229, %c0_131, %c0_132], %232 {strides = array<i32>} : memref<8x1x32xf32, #tpu.memory_space<vmem>>, vector<1x1x32xf32>,
    %c7_i32 = arith.constant 7 : i32
    %c1_i32_133 = arith.constant 1 : i32
    %233 = arith.muli %c7_i32, %c1_i32_133 : i32
    %c0_i32_134 = arith.constant 0 : i32
    %234 = arith.addi %c0_i32_134, %233 : i32
    %c0_135 = arith.constant 0 : index
    %c0_136 = arith.constant 0 : index
    %235 = vector.load %arg16[%c0_135, %c0_136] : memref<1x32xf32, #tpu.memory_space<vmem>>, vector<1x32xf32>
    %c0_137 = arith.constant 0 : index
    %c0_138 = arith.constant 0 : index
    %236 = vector.load %arg17[%c0_137, %c0_138] : memref<1x32xf32, #tpu.memory_space<vmem>>, vector<1x32xf32>
    %237 = arith.index_cast %234 : i32 to index
    %c0_139 = arith.constant 0 : index
    %c0_140 = arith.constant 0 : index
    %238 = vector.load %arg15[%237, %c0_139, %c0_140] : memref<8x1x128xf32, #tpu.memory_space<vmem>>, vector<1x1x128xf32>
    %239 = vector.shape_cast %238 : vector<1x1x128xf32> to vector<1x128xf32>
    %cst_141 = arith.constant dense<0.000000e+00> : vector<1x128xf32>
    %240 = tpu.matmul %235, %9, %cst_141 {dimension_numbers = #tpu.dot_dimension_numbers<[1], [0], [0], [1], [0, 0, 1, 1], [], []>} : vector<1x32xf32>, vector<32x128xf32>, vector<1x128xf32> -> vector<1x128xf32>
    %241 = arith.addf %239, %240 : vector<1x128xf32>
    %242 = vector.extract_strided_slice %241 {offsets = [0, 0], sizes = [1, 96], strides = [1, 1]} : vector<1x128xf32> to vector<1x96xf32>
    %243 = arith.negf %242 : vector<1x96xf32>
    %244 = math.exp %243 : vector<1x96xf32>
    %cst_142 = arith.constant 1.000000e+00 : f32
    %245 = vector.broadcast %cst_142 : f32 to vector<1x96xf32>
    %246 = arith.addf %245, %244 : vector<1x96xf32>
    %247 = arith.divf %245, %246 : vector<1x96xf32>
    %248 = vector.extract_strided_slice %241 {offsets = [0, 96], sizes = [1, 32], strides = [1, 1]} : vector<1x128xf32> to vector<1x32xf32>
    %249 = math.tanh %248 : vector<1x32xf32>
    %250 = vector.extract_strided_slice %247 {offsets = [0, 0], sizes = [1, 32], strides = [1, 1]} : vector<1x96xf32> to vector<1x32xf32>
    %251 = vector.extract_strided_slice %247 {offsets = [0, 32], sizes = [1, 32], strides = [1, 1]} : vector<1x96xf32> to vector<1x32xf32>
    %252 = vector.extract_strided_slice %247 {offsets = [0, 64], sizes = [1, 32], strides = [1, 1]} : vector<1x96xf32> to vector<1x32xf32>
    %253 = arith.mulf %251, %236 : vector<1x32xf32>
    %254 = arith.mulf %250, %249 : vector<1x32xf32>
    %255 = arith.addf %253, %254 : vector<1x32xf32>
    %256 = math.tanh %255 : vector<1x32xf32>
    %257 = arith.mulf %252, %256 : vector<1x32xf32>
    %c0_143 = arith.constant 0 : index
    %c0_144 = arith.constant 0 : index
    %258 = vector.load %arg17[%c0_143, %c0_144] : memref<1x32xf32, #tpu.memory_space<vmem>>, vector<1x32xf32>
    tpu.vector_store %arg17[%c0_143, %c0_144], %255 {strides = array<i32>} : memref<1x32xf32, #tpu.memory_space<vmem>>, vector<1x32xf32>,
    %c0_145 = arith.constant 0 : index
    %c0_146 = arith.constant 0 : index
    %259 = vector.load %arg16[%c0_145, %c0_146] : memref<1x32xf32, #tpu.memory_space<vmem>>, vector<1x32xf32>
    tpu.vector_store %arg16[%c0_145, %c0_146], %257 {strides = array<i32>} : memref<1x32xf32, #tpu.memory_space<vmem>>, vector<1x32xf32>,
    %260 = arith.index_cast %234 : i32 to index
    %c0_147 = arith.constant 0 : index
    %c0_148 = arith.constant 0 : index
    %261 = vector.load %arg14[%260, %c0_147, %c0_148] : memref<8x1x32xf32, #tpu.memory_space<vmem>>, vector<1x1x32xf32>
    %262 = vector.shape_cast %261 : vector<1x1x32xf32> to vector<1x32xf32>
    %263 = vector.shape_cast %257 : vector<1x32xf32> to vector<1x1x32xf32>
    tpu.vector_store %arg14[%260, %c0_147, %c0_148], %263 {strides = array<i32>} : memref<8x1x32xf32, #tpu.memory_space<vmem>>, vector<1x1x32xf32>,
    %c8_i32 = arith.constant 8 : i32
    %c0_149 = arith.constant 0 : index
    %c0_150 = arith.constant 0 : index
    %c0_151 = arith.constant 0 : index
    %264 = vector.load %arg14[%c0_149, %c0_150, %c0_151] : memref<8x1x32xf32, #tpu.memory_space<vmem>>, vector<8x1x32xf32>
    %265 = vector.shape_cast %264 : vector<8x1x32xf32> to vector<8x32xf32>
    %c0_152 = arith.constant 0 : index
    %c0_153 = arith.constant 0 : index
    %266 = vector.load %arg7[%c0_152, %c0_153] : memref<32x128xf32, #tpu.memory_space<vmem>>, vector<32x128xf32>
    %cst_154 = arith.constant dense<0.000000e+00> : vector<8x128xf32>
    %267 = tpu.matmul %265, %266, %cst_154 {dimension_numbers = #tpu.dot_dimension_numbers<[1], [0], [0], [1], [0, 0, 1, 1], [], []>} : vector<8x32xf32>, vector<32x128xf32>, vector<8x128xf32> -> vector<8x128xf32>
    %c0_155 = arith.constant 0 : index
    %c0_156 = arith.constant 0 : index
    %268 = vector.load %arg9[%c0_155, %c0_156] : memref<1x128xf32, #tpu.memory_space<vmem>>, vector<1x128xf32>
    %269 = vector.broadcast %268 : vector<1x128xf32> to vector<8x128xf32>
    %270 = arith.addf %267, %269 : vector<8x128xf32>
    %271 = vector.shape_cast %270 : vector<8x128xf32> to vector<8x1x128xf32>
    %c0_157 = arith.constant 0 : index
    %c0_158 = arith.constant 0 : index
    %c0_159 = arith.constant 0 : index
    %272 = vector.load %arg15[%c0_157, %c0_158, %c0_159] : memref<8x1x128xf32, #tpu.memory_space<vmem>>, vector<8x1x128xf32>
    tpu.vector_store %arg15[%c0_157, %c0_158, %c0_159], %271 {strides = array<i32>} : memref<8x1x128xf32, #tpu.memory_space<vmem>>, vector<8x1x128xf32>,
    %c0_160 = arith.constant 0 : index
    %c0_161 = arith.constant 0 : index
    %273 = vector.load %arg8[%c0_160, %c0_161] : memref<32x128xf32, #tpu.memory_space<vmem>>, vector<32x128xf32>
    %c1 = arith.constant 1 : index
    %c0_162 = arith.constant 0 : index
    %c0_163 = arith.constant 0 : index
    %274 = vector.load %arg2[%c1, %c0_162, %c0_163] : memref<2x1x32xf32, #tpu.memory_space<vmem>>, vector<1x1x32xf32>
    %275 = vector.shape_cast %274 : vector<1x1x32xf32> to vector<1x32xf32>
    %c0_164 = arith.constant 0 : index
    %c0_165 = arith.constant 0 : index
    %276 = vector.load %arg16[%c0_164, %c0_165] : memref<1x32xf32, #tpu.memory_space<vmem>>, vector<1x32xf32>
    tpu.vector_store %arg16[%c0_164, %c0_165], %275 {strides = array<i32>} : memref<1x32xf32, #tpu.memory_space<vmem>>, vector<1x32xf32>,
    %c1_166 = arith.constant 1 : index
    %c0_167 = arith.constant 0 : index
    %c0_168 = arith.constant 0 : index
    %277 = vector.load %arg3[%c1_166, %c0_167, %c0_168] : memref<2x1x32xf32, #tpu.memory_space<vmem>>, vector<1x1x32xf32>
    %278 = vector.shape_cast %277 : vector<1x1x32xf32> to vector<1x32xf32>
    %c0_169 = arith.constant 0 : index
    %c0_170 = arith.constant 0 : index
    %279 = vector.load %arg17[%c0_169, %c0_170] : memref<1x32xf32, #tpu.memory_space<vmem>>, vector<1x32xf32>
    tpu.vector_store %arg17[%c0_169, %c0_170], %278 {strides = array<i32>} : memref<1x32xf32, #tpu.memory_space<vmem>>, vector<1x32xf32>,
    %c0_i32_171 = arith.constant 0 : i32
    %c1_i32_172 = arith.constant 1 : i32
    %280 = arith.muli %c0_i32_171, %c1_i32_172 : i32
    %c0_i32_173 = arith.constant 0 : i32
    %281 = arith.addi %c0_i32_173, %280 : i32
    %c0_174 = arith.constant 0 : index
    %c0_175 = arith.constant 0 : index
    %282 = vector.load %arg16[%c0_174, %c0_175] : memref<1x32xf32, #tpu.memory_space<vmem>>, vector<1x32xf32>
    %c0_176 = arith.constant 0 : index
    %c0_177 = arith.constant 0 : index
    %283 = vector.load %arg17[%c0_176, %c0_177] : memref<1x32xf32, #tpu.memory_space<vmem>>, vector<1x32xf32>
    %284 = arith.index_cast %281 : i32 to index
    %c0_178 = arith.constant 0 : index
    %c0_179 = arith.constant 0 : index
    %285 = vector.load %arg15[%284, %c0_178, %c0_179] : memref<8x1x128xf32, #tpu.memory_space<vmem>>, vector<1x1x128xf32>
    %286 = vector.shape_cast %285 : vector<1x1x128xf32> to vector<1x128xf32>
    %cst_180 = arith.constant dense<0.000000e+00> : vector<1x128xf32>
    %287 = tpu.matmul %282, %273, %cst_180 {dimension_numbers = #tpu.dot_dimension_numbers<[1], [0], [0], [1], [0, 0, 1, 1], [], []>} : vector<1x32xf32>, vector<32x128xf32>, vector<1x128xf32> -> vector<1x128xf32>
    %288 = arith.addf %286, %287 : vector<1x128xf32>
    %289 = vector.extract_strided_slice %288 {offsets = [0, 0], sizes = [1, 96], strides = [1, 1]} : vector<1x128xf32> to vector<1x96xf32>
    %290 = arith.negf %289 : vector<1x96xf32>
    %291 = math.exp %290 : vector<1x96xf32>
    %cst_181 = arith.constant 1.000000e+00 : f32
    %292 = vector.broadcast %cst_181 : f32 to vector<1x96xf32>
    %293 = arith.addf %292, %291 : vector<1x96xf32>
    %294 = arith.divf %292, %293 : vector<1x96xf32>
    %295 = vector.extract_strided_slice %288 {offsets = [0, 96], sizes = [1, 32], strides = [1, 1]} : vector<1x128xf32> to vector<1x32xf32>
    %296 = math.tanh %295 : vector<1x32xf32>
    %297 = vector.extract_strided_slice %294 {offsets = [0, 0], sizes = [1, 32], strides = [1, 1]} : vector<1x96xf32> to vector<1x32xf32>
    %298 = vector.extract_strided_slice %294 {offsets = [0, 32], sizes = [1, 32], strides = [1, 1]} : vector<1x96xf32> to vector<1x32xf32>
    %299 = vector.extract_strided_slice %294 {offsets = [0, 64], sizes = [1, 32], strides = [1, 1]} : vector<1x96xf32> to vector<1x32xf32>
    %300 = arith.mulf %298, %283 : vector<1x32xf32>
    %301 = arith.mulf %297, %296 : vector<1x32xf32>
    %302 = arith.addf %300, %301 : vector<1x32xf32>
    %303 = math.tanh %302 : vector<1x32xf32>
    %304 = arith.mulf %299, %303 : vector<1x32xf32>
    %c0_182 = arith.constant 0 : index
    %c0_183 = arith.constant 0 : index
    %305 = vector.load %arg17[%c0_182, %c0_183] : memref<1x32xf32, #tpu.memory_space<vmem>>, vector<1x32xf32>
    tpu.vector_store %arg17[%c0_182, %c0_183], %302 {strides = array<i32>} : memref<1x32xf32, #tpu.memory_space<vmem>>, vector<1x32xf32>,
    %c0_184 = arith.constant 0 : index
    %c0_185 = arith.constant 0 : index
    %306 = vector.load %arg16[%c0_184, %c0_185] : memref<1x32xf32, #tpu.memory_space<vmem>>, vector<1x32xf32>
    tpu.vector_store %arg16[%c0_184, %c0_185], %304 {strides = array<i32>} : memref<1x32xf32, #tpu.memory_space<vmem>>, vector<1x32xf32>,
    %307 = arith.index_cast %281 : i32 to index
    %c0_186 = arith.constant 0 : index
    %c0_187 = arith.constant 0 : index
    %308 = vector.load %arg14[%307, %c0_186, %c0_187] : memref<8x1x32xf32, #tpu.memory_space<vmem>>, vector<1x1x32xf32>
    %309 = vector.shape_cast %308 : vector<1x1x32xf32> to vector<1x32xf32>
    %310 = vector.shape_cast %304 : vector<1x32xf32> to vector<1x1x32xf32>
    tpu.vector_store %arg14[%307, %c0_186, %c0_187], %310 {strides = array<i32>} : memref<8x1x32xf32, #tpu.memory_space<vmem>>, vector<1x1x32xf32>,
    %c1_i32_188 = arith.constant 1 : i32
    %c1_i32_189 = arith.constant 1 : i32
    %311 = arith.muli %c1_i32_188, %c1_i32_189 : i32
    %c0_i32_190 = arith.constant 0 : i32
    %312 = arith.addi %c0_i32_190, %311 : i32
    %c0_191 = arith.constant 0 : index
    %c0_192 = arith.constant 0 : index
    %313 = vector.load %arg16[%c0_191, %c0_192] : memref<1x32xf32, #tpu.memory_space<vmem>>, vector<1x32xf32>
    %c0_193 = arith.constant 0 : index
    %c0_194 = arith.constant 0 : index
    %314 = vector.load %arg17[%c0_193, %c0_194] : memref<1x32xf32, #tpu.memory_space<vmem>>, vector<1x32xf32>
    %315 = arith.index_cast %312 : i32 to index
    %c0_195 = arith.constant 0 : index
    %c0_196 = arith.constant 0 : index
    %316 = vector.load %arg15[%315, %c0_195, %c0_196] : memref<8x1x128xf32, #tpu.memory_space<vmem>>, vector<1x1x128xf32>
    %317 = vector.shape_cast %316 : vector<1x1x128xf32> to vector<1x128xf32>
    %cst_197 = arith.constant dense<0.000000e+00> : vector<1x128xf32>
    %318 = tpu.matmul %313, %273, %cst_197 {dimension_numbers = #tpu.dot_dimension_numbers<[1], [0], [0], [1], [0, 0, 1, 1], [], []>} : vector<1x32xf32>, vector<32x128xf32>, vector<1x128xf32> -> vector<1x128xf32>
    %319 = arith.addf %317, %318 : vector<1x128xf32>
    %320 = vector.extract_strided_slice %319 {offsets = [0, 0], sizes = [1, 96], strides = [1, 1]} : vector<1x128xf32> to vector<1x96xf32>
    %321 = arith.negf %320 : vector<1x96xf32>
    %322 = math.exp %321 : vector<1x96xf32>
    %cst_198 = arith.constant 1.000000e+00 : f32
    %323 = vector.broadcast %cst_198 : f32 to vector<1x96xf32>
    %324 = arith.addf %323, %322 : vector<1x96xf32>
    %325 = arith.divf %323, %324 : vector<1x96xf32>
    %326 = vector.extract_strided_slice %319 {offsets = [0, 96], sizes = [1, 32], strides = [1, 1]} : vector<1x128xf32> to vector<1x32xf32>
    %327 = math.tanh %326 : vector<1x32xf32>
    %328 = vector.extract_strided_slice %325 {offsets = [0, 0], sizes = [1, 32], strides = [1, 1]} : vector<1x96xf32> to vector<1x32xf32>
    %329 = vector.extract_strided_slice %325 {offsets = [0, 32], sizes = [1, 32], strides = [1, 1]} : vector<1x96xf32> to vector<1x32xf32>
    %330 = vector.extract_strided_slice %325 {offsets = [0, 64], sizes = [1, 32], strides = [1, 1]} : vector<1x96xf32> to vector<1x32xf32>
    %331 = arith.mulf %329, %314 : vector<1x32xf32>
    %332 = arith.mulf %328, %327 : vector<1x32xf32>
    %333 = arith.addf %331, %332 : vector<1x32xf32>
    %334 = math.tanh %333 : vector<1x32xf32>
    %335 = arith.mulf %330, %334 : vector<1x32xf32>
    %c0_199 = arith.constant 0 : index
    %c0_200 = arith.constant 0 : index
    %336 = vector.load %arg17[%c0_199, %c0_200] : memref<1x32xf32, #tpu.memory_space<vmem>>, vector<1x32xf32>
    tpu.vector_store %arg17[%c0_199, %c0_200], %333 {strides = array<i32>} : memref<1x32xf32, #tpu.memory_space<vmem>>, vector<1x32xf32>,
    %c0_201 = arith.constant 0 : index
    %c0_202 = arith.constant 0 : index
    %337 = vector.load %arg16[%c0_201, %c0_202] : memref<1x32xf32, #tpu.memory_space<vmem>>, vector<1x32xf32>
    tpu.vector_store %arg16[%c0_201, %c0_202], %335 {strides = array<i32>} : memref<1x32xf32, #tpu.memory_space<vmem>>, vector<1x32xf32>,
    %338 = arith.index_cast %312 : i32 to index
    %c0_203 = arith.constant 0 : index
    %c0_204 = arith.constant 0 : index
    %339 = vector.load %arg14[%338, %c0_203, %c0_204] : memref<8x1x32xf32, #tpu.memory_space<vmem>>, vector<1x1x32xf32>
    %340 = vector.shape_cast %339 : vector<1x1x32xf32> to vector<1x32xf32>
    %341 = vector.shape_cast %335 : vector<1x32xf32> to vector<1x1x32xf32>
    tpu.vector_store %arg14[%338, %c0_203, %c0_204], %341 {strides = array<i32>} : memref<8x1x32xf32, #tpu.memory_space<vmem>>, vector<1x1x32xf32>,
    %c2_i32_205 = arith.constant 2 : i32
    %c1_i32_206 = arith.constant 1 : i32
    %342 = arith.muli %c2_i32_205, %c1_i32_206 : i32
    %c0_i32_207 = arith.constant 0 : i32
    %343 = arith.addi %c0_i32_207, %342 : i32
    %c0_208 = arith.constant 0 : index
    %c0_209 = arith.constant 0 : index
    %344 = vector.load %arg16[%c0_208, %c0_209] : memref<1x32xf32, #tpu.memory_space<vmem>>, vector<1x32xf32>
    %c0_210 = arith.constant 0 : index
    %c0_211 = arith.constant 0 : index
    %345 = vector.load %arg17[%c0_210, %c0_211] : memref<1x32xf32, #tpu.memory_space<vmem>>, vector<1x32xf32>
    %346 = arith.index_cast %343 : i32 to index
    %c0_212 = arith.constant 0 : index
    %c0_213 = arith.constant 0 : index
    %347 = vector.load %arg15[%346, %c0_212, %c0_213] : memref<8x1x128xf32, #tpu.memory_space<vmem>>, vector<1x1x128xf32>
    %348 = vector.shape_cast %347 : vector<1x1x128xf32> to vector<1x128xf32>
    %cst_214 = arith.constant dense<0.000000e+00> : vector<1x128xf32>
    %349 = tpu.matmul %344, %273, %cst_214 {dimension_numbers = #tpu.dot_dimension_numbers<[1], [0], [0], [1], [0, 0, 1, 1], [], []>} : vector<1x32xf32>, vector<32x128xf32>, vector<1x128xf32> -> vector<1x128xf32>
    %350 = arith.addf %348, %349 : vector<1x128xf32>
    %351 = vector.extract_strided_slice %350 {offsets = [0, 0], sizes = [1, 96], strides = [1, 1]} : vector<1x128xf32> to vector<1x96xf32>
    %352 = arith.negf %351 : vector<1x96xf32>
    %353 = math.exp %352 : vector<1x96xf32>
    %cst_215 = arith.constant 1.000000e+00 : f32
    %354 = vector.broadcast %cst_215 : f32 to vector<1x96xf32>
    %355 = arith.addf %354, %353 : vector<1x96xf32>
    %356 = arith.divf %354, %355 : vector<1x96xf32>
    %357 = vector.extract_strided_slice %350 {offsets = [0, 96], sizes = [1, 32], strides = [1, 1]} : vector<1x128xf32> to vector<1x32xf32>
    %358 = math.tanh %357 : vector<1x32xf32>
    %359 = vector.extract_strided_slice %356 {offsets = [0, 0], sizes = [1, 32], strides = [1, 1]} : vector<1x96xf32> to vector<1x32xf32>
    %360 = vector.extract_strided_slice %356 {offsets = [0, 32], sizes = [1, 32], strides = [1, 1]} : vector<1x96xf32> to vector<1x32xf32>
    %361 = vector.extract_strided_slice %356 {offsets = [0, 64], sizes = [1, 32], strides = [1, 1]} : vector<1x96xf32> to vector<1x32xf32>
    %362 = arith.mulf %360, %345 : vector<1x32xf32>
    %363 = arith.mulf %359, %358 : vector<1x32xf32>
    %364 = arith.addf %362, %363 : vector<1x32xf32>
    %365 = math.tanh %364 : vector<1x32xf32>
    %366 = arith.mulf %361, %365 : vector<1x32xf32>
    %c0_216 = arith.constant 0 : index
    %c0_217 = arith.constant 0 : index
    %367 = vector.load %arg17[%c0_216, %c0_217] : memref<1x32xf32, #tpu.memory_space<vmem>>, vector<1x32xf32>
    tpu.vector_store %arg17[%c0_216, %c0_217], %364 {strides = array<i32>} : memref<1x32xf32, #tpu.memory_space<vmem>>, vector<1x32xf32>,
    %c0_218 = arith.constant 0 : index
    %c0_219 = arith.constant 0 : index
    %368 = vector.load %arg16[%c0_218, %c0_219] : memref<1x32xf32, #tpu.memory_space<vmem>>, vector<1x32xf32>
    tpu.vector_store %arg16[%c0_218, %c0_219], %366 {strides = array<i32>} : memref<1x32xf32, #tpu.memory_space<vmem>>, vector<1x32xf32>,
    %369 = arith.index_cast %343 : i32 to index
    %c0_220 = arith.constant 0 : index
    %c0_221 = arith.constant 0 : index
    %370 = vector.load %arg14[%369, %c0_220, %c0_221] : memref<8x1x32xf32, #tpu.memory_space<vmem>>, vector<1x1x32xf32>
    %371 = vector.shape_cast %370 : vector<1x1x32xf32> to vector<1x32xf32>
    %372 = vector.shape_cast %366 : vector<1x32xf32> to vector<1x1x32xf32>
    tpu.vector_store %arg14[%369, %c0_220, %c0_221], %372 {strides = array<i32>} : memref<8x1x32xf32, #tpu.memory_space<vmem>>, vector<1x1x32xf32>,
    %c3_i32_222 = arith.constant 3 : i32
    %c1_i32_223 = arith.constant 1 : i32
    %373 = arith.muli %c3_i32_222, %c1_i32_223 : i32
    %c0_i32_224 = arith.constant 0 : i32
    %374 = arith.addi %c0_i32_224, %373 : i32
    %c0_225 = arith.constant 0 : index
    %c0_226 = arith.constant 0 : index
    %375 = vector.load %arg16[%c0_225, %c0_226] : memref<1x32xf32, #tpu.memory_space<vmem>>, vector<1x32xf32>
    %c0_227 = arith.constant 0 : index
    %c0_228 = arith.constant 0 : index
    %376 = vector.load %arg17[%c0_227, %c0_228] : memref<1x32xf32, #tpu.memory_space<vmem>>, vector<1x32xf32>
    %377 = arith.index_cast %374 : i32 to index
    %c0_229 = arith.constant 0 : index
    %c0_230 = arith.constant 0 : index
    %378 = vector.load %arg15[%377, %c0_229, %c0_230] : memref<8x1x128xf32, #tpu.memory_space<vmem>>, vector<1x1x128xf32>
    %379 = vector.shape_cast %378 : vector<1x1x128xf32> to vector<1x128xf32>
    %cst_231 = arith.constant dense<0.000000e+00> : vector<1x128xf32>
    %380 = tpu.matmul %375, %273, %cst_231 {dimension_numbers = #tpu.dot_dimension_numbers<[1], [0], [0], [1], [0, 0, 1, 1], [], []>} : vector<1x32xf32>, vector<32x128xf32>, vector<1x128xf32> -> vector<1x128xf32>
    %381 = arith.addf %379, %380 : vector<1x128xf32>
    %382 = vector.extract_strided_slice %381 {offsets = [0, 0], sizes = [1, 96], strides = [1, 1]} : vector<1x128xf32> to vector<1x96xf32>
    %383 = arith.negf %382 : vector<1x96xf32>
    %384 = math.exp %383 : vector<1x96xf32>
    %cst_232 = arith.constant 1.000000e+00 : f32
    %385 = vector.broadcast %cst_232 : f32 to vector<1x96xf32>
    %386 = arith.addf %385, %384 : vector<1x96xf32>
    %387 = arith.divf %385, %386 : vector<1x96xf32>
    %388 = vector.extract_strided_slice %381 {offsets = [0, 96], sizes = [1, 32], strides = [1, 1]} : vector<1x128xf32> to vector<1x32xf32>
    %389 = math.tanh %388 : vector<1x32xf32>
    %390 = vector.extract_strided_slice %387 {offsets = [0, 0], sizes = [1, 32], strides = [1, 1]} : vector<1x96xf32> to vector<1x32xf32>
    %391 = vector.extract_strided_slice %387 {offsets = [0, 32], sizes = [1, 32], strides = [1, 1]} : vector<1x96xf32> to vector<1x32xf32>
    %392 = vector.extract_strided_slice %387 {offsets = [0, 64], sizes = [1, 32], strides = [1, 1]} : vector<1x96xf32> to vector<1x32xf32>
    %393 = arith.mulf %391, %376 : vector<1x32xf32>
    %394 = arith.mulf %390, %389 : vector<1x32xf32>
    %395 = arith.addf %393, %394 : vector<1x32xf32>
    %396 = math.tanh %395 : vector<1x32xf32>
    %397 = arith.mulf %392, %396 : vector<1x32xf32>
    %c0_233 = arith.constant 0 : index
    %c0_234 = arith.constant 0 : index
    %398 = vector.load %arg17[%c0_233, %c0_234] : memref<1x32xf32, #tpu.memory_space<vmem>>, vector<1x32xf32>
    tpu.vector_store %arg17[%c0_233, %c0_234], %395 {strides = array<i32>} : memref<1x32xf32, #tpu.memory_space<vmem>>, vector<1x32xf32>,
    %c0_235 = arith.constant 0 : index
    %c0_236 = arith.constant 0 : index
    %399 = vector.load %arg16[%c0_235, %c0_236] : memref<1x32xf32, #tpu.memory_space<vmem>>, vector<1x32xf32>
    tpu.vector_store %arg16[%c0_235, %c0_236], %397 {strides = array<i32>} : memref<1x32xf32, #tpu.memory_space<vmem>>, vector<1x32xf32>,
    %400 = arith.index_cast %374 : i32 to index
    %c0_237 = arith.constant 0 : index
    %c0_238 = arith.constant 0 : index
    %401 = vector.load %arg14[%400, %c0_237, %c0_238] : memref<8x1x32xf32, #tpu.memory_space<vmem>>, vector<1x1x32xf32>
    %402 = vector.shape_cast %401 : vector<1x1x32xf32> to vector<1x32xf32>
    %403 = vector.shape_cast %397 : vector<1x32xf32> to vector<1x1x32xf32>
    tpu.vector_store %arg14[%400, %c0_237, %c0_238], %403 {strides = array<i32>} : memref<8x1x32xf32, #tpu.memory_space<vmem>>, vector<1x1x32xf32>,
    %c4_i32_239 = arith.constant 4 : i32
    %c1_i32_240 = arith.constant 1 : i32
    %404 = arith.muli %c4_i32_239, %c1_i32_240 : i32
    %c0_i32_241 = arith.constant 0 : i32
    %405 = arith.addi %c0_i32_241, %404 : i32
    %c0_242 = arith.constant 0 : index
    %c0_243 = arith.constant 0 : index
    %406 = vector.load %arg16[%c0_242, %c0_243] : memref<1x32xf32, #tpu.memory_space<vmem>>, vector<1x32xf32>
    %c0_244 = arith.constant 0 : index
    %c0_245 = arith.constant 0 : index
    %407 = vector.load %arg17[%c0_244, %c0_245] : memref<1x32xf32, #tpu.memory_space<vmem>>, vector<1x32xf32>
    %408 = arith.index_cast %405 : i32 to index
    %c0_246 = arith.constant 0 : index
    %c0_247 = arith.constant 0 : index
    %409 = vector.load %arg15[%408, %c0_246, %c0_247] : memref<8x1x128xf32, #tpu.memory_space<vmem>>, vector<1x1x128xf32>
    %410 = vector.shape_cast %409 : vector<1x1x128xf32> to vector<1x128xf32>
    %cst_248 = arith.constant dense<0.000000e+00> : vector<1x128xf32>
    %411 = tpu.matmul %406, %273, %cst_248 {dimension_numbers = #tpu.dot_dimension_numbers<[1], [0], [0], [1], [0, 0, 1, 1], [], []>} : vector<1x32xf32>, vector<32x128xf32>, vector<1x128xf32> -> vector<1x128xf32>
    %412 = arith.addf %410, %411 : vector<1x128xf32>
    %413 = vector.extract_strided_slice %412 {offsets = [0, 0], sizes = [1, 96], strides = [1, 1]} : vector<1x128xf32> to vector<1x96xf32>
    %414 = arith.negf %413 : vector<1x96xf32>
    %415 = math.exp %414 : vector<1x96xf32>
    %cst_249 = arith.constant 1.000000e+00 : f32
    %416 = vector.broadcast %cst_249 : f32 to vector<1x96xf32>
    %417 = arith.addf %416, %415 : vector<1x96xf32>
    %418 = arith.divf %416, %417 : vector<1x96xf32>
    %419 = vector.extract_strided_slice %412 {offsets = [0, 96], sizes = [1, 32], strides = [1, 1]} : vector<1x128xf32> to vector<1x32xf32>
    %420 = math.tanh %419 : vector<1x32xf32>
    %421 = vector.extract_strided_slice %418 {offsets = [0, 0], sizes = [1, 32], strides = [1, 1]} : vector<1x96xf32> to vector<1x32xf32>
    %422 = vector.extract_strided_slice %418 {offsets = [0, 32], sizes = [1, 32], strides = [1, 1]} : vector<1x96xf32> to vector<1x32xf32>
    %423 = vector.extract_strided_slice %418 {offsets = [0, 64], sizes = [1, 32], strides = [1, 1]} : vector<1x96xf32> to vector<1x32xf32>
    %424 = arith.mulf %422, %407 : vector<1x32xf32>
    %425 = arith.mulf %421, %420 : vector<1x32xf32>
    %426 = arith.addf %424, %425 : vector<1x32xf32>
    %427 = math.tanh %426 : vector<1x32xf32>
    %428 = arith.mulf %423, %427 : vector<1x32xf32>
    %c0_250 = arith.constant 0 : index
    %c0_251 = arith.constant 0 : index
    %429 = vector.load %arg17[%c0_250, %c0_251] : memref<1x32xf32, #tpu.memory_space<vmem>>, vector<1x32xf32>
    tpu.vector_store %arg17[%c0_250, %c0_251], %426 {strides = array<i32>} : memref<1x32xf32, #tpu.memory_space<vmem>>, vector<1x32xf32>,
    %c0_252 = arith.constant 0 : index
    %c0_253 = arith.constant 0 : index
    %430 = vector.load %arg16[%c0_252, %c0_253] : memref<1x32xf32, #tpu.memory_space<vmem>>, vector<1x32xf32>
    tpu.vector_store %arg16[%c0_252, %c0_253], %428 {strides = array<i32>} : memref<1x32xf32, #tpu.memory_space<vmem>>, vector<1x32xf32>,
    %431 = arith.index_cast %405 : i32 to index
    %c0_254 = arith.constant 0 : index
    %c0_255 = arith.constant 0 : index
    %432 = vector.load %arg14[%431, %c0_254, %c0_255] : memref<8x1x32xf32, #tpu.memory_space<vmem>>, vector<1x1x32xf32>
    %433 = vector.shape_cast %432 : vector<1x1x32xf32> to vector<1x32xf32>
    %434 = vector.shape_cast %428 : vector<1x32xf32> to vector<1x1x32xf32>
    tpu.vector_store %arg14[%431, %c0_254, %c0_255], %434 {strides = array<i32>} : memref<8x1x32xf32, #tpu.memory_space<vmem>>, vector<1x1x32xf32>,
    %c5_i32_256 = arith.constant 5 : i32
    %c1_i32_257 = arith.constant 1 : i32
    %435 = arith.muli %c5_i32_256, %c1_i32_257 : i32
    %c0_i32_258 = arith.constant 0 : i32
    %436 = arith.addi %c0_i32_258, %435 : i32
    %c0_259 = arith.constant 0 : index
    %c0_260 = arith.constant 0 : index
    %437 = vector.load %arg16[%c0_259, %c0_260] : memref<1x32xf32, #tpu.memory_space<vmem>>, vector<1x32xf32>
    %c0_261 = arith.constant 0 : index
    %c0_262 = arith.constant 0 : index
    %438 = vector.load %arg17[%c0_261, %c0_262] : memref<1x32xf32, #tpu.memory_space<vmem>>, vector<1x32xf32>
    %439 = arith.index_cast %436 : i32 to index
    %c0_263 = arith.constant 0 : index
    %c0_264 = arith.constant 0 : index
    %440 = vector.load %arg15[%439, %c0_263, %c0_264] : memref<8x1x128xf32, #tpu.memory_space<vmem>>, vector<1x1x128xf32>
    %441 = vector.shape_cast %440 : vector<1x1x128xf32> to vector<1x128xf32>
    %cst_265 = arith.constant dense<0.000000e+00> : vector<1x128xf32>
    %442 = tpu.matmul %437, %273, %cst_265 {dimension_numbers = #tpu.dot_dimension_numbers<[1], [0], [0], [1], [0, 0, 1, 1], [], []>} : vector<1x32xf32>, vector<32x128xf32>, vector<1x128xf32> -> vector<1x128xf32>
    %443 = arith.addf %441, %442 : vector<1x128xf32>
    %444 = vector.extract_strided_slice %443 {offsets = [0, 0], sizes = [1, 96], strides = [1, 1]} : vector<1x128xf32> to vector<1x96xf32>
    %445 = arith.negf %444 : vector<1x96xf32>
    %446 = math.exp %445 : vector<1x96xf32>
    %cst_266 = arith.constant 1.000000e+00 : f32
    %447 = vector.broadcast %cst_266 : f32 to vector<1x96xf32>
    %448 = arith.addf %447, %446 : vector<1x96xf32>
    %449 = arith.divf %447, %448 : vector<1x96xf32>
    %450 = vector.extract_strided_slice %443 {offsets = [0, 96], sizes = [1, 32], strides = [1, 1]} : vector<1x128xf32> to vector<1x32xf32>
    %451 = math.tanh %450 : vector<1x32xf32>
    %452 = vector.extract_strided_slice %449 {offsets = [0, 0], sizes = [1, 32], strides = [1, 1]} : vector<1x96xf32> to vector<1x32xf32>
    %453 = vector.extract_strided_slice %449 {offsets = [0, 32], sizes = [1, 32], strides = [1, 1]} : vector<1x96xf32> to vector<1x32xf32>
    %454 = vector.extract_strided_slice %449 {offsets = [0, 64], sizes = [1, 32], strides = [1, 1]} : vector<1x96xf32> to vector<1x32xf32>
    %455 = arith.mulf %453, %438 : vector<1x32xf32>
    %456 = arith.mulf %452, %451 : vector<1x32xf32>
    %457 = arith.addf %455, %456 : vector<1x32xf32>
    %458 = math.tanh %457 : vector<1x32xf32>
    %459 = arith.mulf %454, %458 : vector<1x32xf32>
    %c0_267 = arith.constant 0 : index
    %c0_268 = arith.constant 0 : index
    %460 = vector.load %arg17[%c0_267, %c0_268] : memref<1x32xf32, #tpu.memory_space<vmem>>, vector<1x32xf32>
    tpu.vector_store %arg17[%c0_267, %c0_268], %457 {strides = array<i32>} : memref<1x32xf32, #tpu.memory_space<vmem>>, vector<1x32xf32>,
    %c0_269 = arith.constant 0 : index
    %c0_270 = arith.constant 0 : index
    %461 = vector.load %arg16[%c0_269, %c0_270] : memref<1x32xf32, #tpu.memory_space<vmem>>, vector<1x32xf32>
    tpu.vector_store %arg16[%c0_269, %c0_270], %459 {strides = array<i32>} : memref<1x32xf32, #tpu.memory_space<vmem>>, vector<1x32xf32>,
    %462 = arith.index_cast %436 : i32 to index
    %c0_271 = arith.constant 0 : index
    %c0_272 = arith.constant 0 : index
    %463 = vector.load %arg14[%462, %c0_271, %c0_272] : memref<8x1x32xf32, #tpu.memory_space<vmem>>, vector<1x1x32xf32>
    %464 = vector.shape_cast %463 : vector<1x1x32xf32> to vector<1x32xf32>
    %465 = vector.shape_cast %459 : vector<1x32xf32> to vector<1x1x32xf32>
    tpu.vector_store %arg14[%462, %c0_271, %c0_272], %465 {strides = array<i32>} : memref<8x1x32xf32, #tpu.memory_space<vmem>>, vector<1x1x32xf32>,
    %c6_i32_273 = arith.constant 6 : i32
    %c1_i32_274 = arith.constant 1 : i32
    %466 = arith.muli %c6_i32_273, %c1_i32_274 : i32
    %c0_i32_275 = arith.constant 0 : i32
    %467 = arith.addi %c0_i32_275, %466 : i32
    %c0_276 = arith.constant 0 : index
    %c0_277 = arith.constant 0 : index
    %468 = vector.load %arg16[%c0_276, %c0_277] : memref<1x32xf32, #tpu.memory_space<vmem>>, vector<1x32xf32>
    %c0_278 = arith.constant 0 : index
    %c0_279 = arith.constant 0 : index
    %469 = vector.load %arg17[%c0_278, %c0_279] : memref<1x32xf32, #tpu.memory_space<vmem>>, vector<1x32xf32>
    %470 = arith.index_cast %467 : i32 to index
    %c0_280 = arith.constant 0 : index
    %c0_281 = arith.constant 0 : index
    %471 = vector.load %arg15[%470, %c0_280, %c0_281] : memref<8x1x128xf32, #tpu.memory_space<vmem>>, vector<1x1x128xf32>
    %472 = vector.shape_cast %471 : vector<1x1x128xf32> to vector<1x128xf32>
    %cst_282 = arith.constant dense<0.000000e+00> : vector<1x128xf32>
    %473 = tpu.matmul %468, %273, %cst_282 {dimension_numbers = #tpu.dot_dimension_numbers<[1], [0], [0], [1], [0, 0, 1, 1], [], []>} : vector<1x32xf32>, vector<32x128xf32>, vector<1x128xf32> -> vector<1x128xf32>
    %474 = arith.addf %472, %473 : vector<1x128xf32>
    %475 = vector.extract_strided_slice %474 {offsets = [0, 0], sizes = [1, 96], strides = [1, 1]} : vector<1x128xf32> to vector<1x96xf32>
    %476 = arith.negf %475 : vector<1x96xf32>
    %477 = math.exp %476 : vector<1x96xf32>
    %cst_283 = arith.constant 1.000000e+00 : f32
    %478 = vector.broadcast %cst_283 : f32 to vector<1x96xf32>
    %479 = arith.addf %478, %477 : vector<1x96xf32>
    %480 = arith.divf %478, %479 : vector<1x96xf32>
    %481 = vector.extract_strided_slice %474 {offsets = [0, 96], sizes = [1, 32], strides = [1, 1]} : vector<1x128xf32> to vector<1x32xf32>
    %482 = math.tanh %481 : vector<1x32xf32>
    %483 = vector.extract_strided_slice %480 {offsets = [0, 0], sizes = [1, 32], strides = [1, 1]} : vector<1x96xf32> to vector<1x32xf32>
    %484 = vector.extract_strided_slice %480 {offsets = [0, 32], sizes = [1, 32], strides = [1, 1]} : vector<1x96xf32> to vector<1x32xf32>
    %485 = vector.extract_strided_slice %480 {offsets = [0, 64], sizes = [1, 32], strides = [1, 1]} : vector<1x96xf32> to vector<1x32xf32>
    %486 = arith.mulf %484, %469 : vector<1x32xf32>
    %487 = arith.mulf %483, %482 : vector<1x32xf32>
    %488 = arith.addf %486, %487 : vector<1x32xf32>
    %489 = math.tanh %488 : vector<1x32xf32>
    %490 = arith.mulf %485, %489 : vector<1x32xf32>
    %c0_284 = arith.constant 0 : index
    %c0_285 = arith.constant 0 : index
    %491 = vector.load %arg17[%c0_284, %c0_285] : memref<1x32xf32, #tpu.memory_space<vmem>>, vector<1x32xf32>
    tpu.vector_store %arg17[%c0_284, %c0_285], %488 {strides = array<i32>} : memref<1x32xf32, #tpu.memory_space<vmem>>, vector<1x32xf32>,
    %c0_286 = arith.constant 0 : index
    %c0_287 = arith.constant 0 : index
    %492 = vector.load %arg16[%c0_286, %c0_287] : memref<1x32xf32, #tpu.memory_space<vmem>>, vector<1x32xf32>
    tpu.vector_store %arg16[%c0_286, %c0_287], %490 {strides = array<i32>} : memref<1x32xf32, #tpu.memory_space<vmem>>, vector<1x32xf32>,
    %493 = arith.index_cast %467 : i32 to index
    %c0_288 = arith.constant 0 : index
    %c0_289 = arith.constant 0 : index
    %494 = vector.load %arg14[%493, %c0_288, %c0_289] : memref<8x1x32xf32, #tpu.memory_space<vmem>>, vector<1x1x32xf32>
    %495 = vector.shape_cast %494 : vector<1x1x32xf32> to vector<1x32xf32>
    %496 = vector.shape_cast %490 : vector<1x32xf32> to vector<1x1x32xf32>
    tpu.vector_store %arg14[%493, %c0_288, %c0_289], %496 {strides = array<i32>} : memref<8x1x32xf32, #tpu.memory_space<vmem>>, vector<1x1x32xf32>,
    %c7_i32_290 = arith.constant 7 : i32
    %c1_i32_291 = arith.constant 1 : i32
    %497 = arith.muli %c7_i32_290, %c1_i32_291 : i32
    %c0_i32_292 = arith.constant 0 : i32
    %498 = arith.addi %c0_i32_292, %497 : i32
    %c0_293 = arith.constant 0 : index
    %c0_294 = arith.constant 0 : index
    %499 = vector.load %arg16[%c0_293, %c0_294] : memref<1x32xf32, #tpu.memory_space<vmem>>, vector<1x32xf32>
    %c0_295 = arith.constant 0 : index
    %c0_296 = arith.constant 0 : index
    %500 = vector.load %arg17[%c0_295, %c0_296] : memref<1x32xf32, #tpu.memory_space<vmem>>, vector<1x32xf32>
    %501 = arith.index_cast %498 : i32 to index
    %c0_297 = arith.constant 0 : index
    %c0_298 = arith.constant 0 : index
    %502 = vector.load %arg15[%501, %c0_297, %c0_298] : memref<8x1x128xf32, #tpu.memory_space<vmem>>, vector<1x1x128xf32>
    %503 = vector.shape_cast %502 : vector<1x1x128xf32> to vector<1x128xf32>
    %cst_299 = arith.constant dense<0.000000e+00> : vector<1x128xf32>
    %504 = tpu.matmul %499, %273, %cst_299 {dimension_numbers = #tpu.dot_dimension_numbers<[1], [0], [0], [1], [0, 0, 1, 1], [], []>} : vector<1x32xf32>, vector<32x128xf32>, vector<1x128xf32> -> vector<1x128xf32>
    %505 = arith.addf %503, %504 : vector<1x128xf32>
    %506 = vector.extract_strided_slice %505 {offsets = [0, 0], sizes = [1, 96], strides = [1, 1]} : vector<1x128xf32> to vector<1x96xf32>
    %507 = arith.negf %506 : vector<1x96xf32>
    %508 = math.exp %507 : vector<1x96xf32>
    %cst_300 = arith.constant 1.000000e+00 : f32
    %509 = vector.broadcast %cst_300 : f32 to vector<1x96xf32>
    %510 = arith.addf %509, %508 : vector<1x96xf32>
    %511 = arith.divf %509, %510 : vector<1x96xf32>
    %512 = vector.extract_strided_slice %505 {offsets = [0, 96], sizes = [1, 32], strides = [1, 1]} : vector<1x128xf32> to vector<1x32xf32>
    %513 = math.tanh %512 : vector<1x32xf32>
    %514 = vector.extract_strided_slice %511 {offsets = [0, 0], sizes = [1, 32], strides = [1, 1]} : vector<1x96xf32> to vector<1x32xf32>
    %515 = vector.extract_strided_slice %511 {offsets = [0, 32], sizes = [1, 32], strides = [1, 1]} : vector<1x96xf32> to vector<1x32xf32>
    %516 = vector.extract_strided_slice %511 {offsets = [0, 64], sizes = [1, 32], strides = [1, 1]} : vector<1x96xf32> to vector<1x32xf32>
    %517 = arith.mulf %515, %500 : vector<1x32xf32>
    %518 = arith.mulf %514, %513 : vector<1x32xf32>
    %519 = arith.addf %517, %518 : vector<1x32xf32>
    %520 = math.tanh %519 : vector<1x32xf32>
    %521 = arith.mulf %516, %520 : vector<1x32xf32>
    %c0_301 = arith.constant 0 : index
    %c0_302 = arith.constant 0 : index
    %522 = vector.load %arg17[%c0_301, %c0_302] : memref<1x32xf32, #tpu.memory_space<vmem>>, vector<1x32xf32>
    tpu.vector_store %arg17[%c0_301, %c0_302], %519 {strides = array<i32>} : memref<1x32xf32, #tpu.memory_space<vmem>>, vector<1x32xf32>,
    %c0_303 = arith.constant 0 : index
    %c0_304 = arith.constant 0 : index
    %523 = vector.load %arg16[%c0_303, %c0_304] : memref<1x32xf32, #tpu.memory_space<vmem>>, vector<1x32xf32>
    tpu.vector_store %arg16[%c0_303, %c0_304], %521 {strides = array<i32>} : memref<1x32xf32, #tpu.memory_space<vmem>>, vector<1x32xf32>,
    %524 = arith.index_cast %498 : i32 to index
    %c0_305 = arith.constant 0 : index
    %c0_306 = arith.constant 0 : index
    %525 = vector.load %arg14[%524, %c0_305, %c0_306] : memref<8x1x32xf32, #tpu.memory_space<vmem>>, vector<1x1x32xf32>
    %526 = vector.shape_cast %525 : vector<1x1x32xf32> to vector<1x32xf32>
    %527 = vector.shape_cast %521 : vector<1x32xf32> to vector<1x1x32xf32>
    tpu.vector_store %arg14[%524, %c0_305, %c0_306], %527 {strides = array<i32>} : memref<8x1x32xf32, #tpu.memory_space<vmem>>, vector<1x1x32xf32>,
    %c8_i32_307 = arith.constant 8 : i32
    %c0_308 = arith.constant 0 : index
    %c0_309 = arith.constant 0 : index
    %c0_310 = arith.constant 0 : index
    %528 = vector.load %arg14[%c0_308, %c0_309, %c0_310] : memref<8x1x32xf32, #tpu.memory_space<vmem>>, vector<8x1x32xf32>
    %529 = vector.shape_cast %528 : vector<8x1x32xf32> to vector<8x32xf32>
    %c0_311 = arith.constant 0 : index
    %c0_312 = arith.constant 0 : index
    %530 = vector.load %arg10[%c0_311, %c0_312] : memref<32x10xf32, #tpu.memory_space<vmem>>, vector<32x10xf32>
    %cst_313 = arith.constant dense<0.000000e+00> : vector<8x10xf32>
    %531 = tpu.matmul %529, %530, %cst_313 {dimension_numbers = #tpu.dot_dimension_numbers<[1], [0], [0], [1], [0, 0, 1, 1], [], []>} : vector<8x32xf32>, vector<32x10xf32>, vector<8x10xf32> -> vector<8x10xf32>
    %c0_314 = arith.constant 0 : index
    %c0_315 = arith.constant 0 : index
    %532 = vector.load %arg11[%c0_314, %c0_315] : memref<1x10xf32, #tpu.memory_space<vmem>>, vector<1x10xf32>
    %533 = vector.broadcast %532 : vector<1x10xf32> to vector<8x10xf32>
    %534 = arith.addf %531, %533 : vector<8x10xf32>
    %535 = vector.shape_cast %534 : vector<8x10xf32> to vector<8x1x10xf32>
    %c0_316 = arith.constant 0 : index
    %c0_317 = arith.constant 0 : index
    %c0_318 = arith.constant 0 : index
    %536 = vector.load %arg13[%c0_316, %c0_317, %c0_318] : memref<8x1x10xf32, #tpu.memory_space<vmem>>, vector<8x1x10xf32>
    tpu.vector_store %arg13[%c0_316, %c0_317, %c0_318], %535 {strides = array<i32>} : memref<8x1x10xf32, #tpu.memory_space<vmem>>, vector<8x1x10xf32>,
    %cst_319 = arith.constant dense<0xFF800000> : vector<8x10xf32>
    %537 = vector.multi_reduction <maximumf>, %535, %cst_319 [1] : vector<8x1x10xf32> to vector<8x10xf32>
    %538 = vector.shape_cast %537 : vector<8x10xf32> to vector<8x1x10xf32>
    %539 = arith.subf %535, %538 : vector<8x1x10xf32>
    %540 = math.exp %539 : vector<8x1x10xf32>
    %cst_320 = arith.constant dense<0.000000e+00> : vector<8x10xf32>
    %541 = vector.multi_reduction <add>, %540, %cst_320 [1] : vector<8x1x10xf32> to vector<8x10xf32>
    %542 = vector.shape_cast %541 : vector<8x10xf32> to vector<8x1x10xf32>
    %543 = math.log %542 : vector<8x1x10xf32>
    %544 = arith.subf %539, %543 : vector<8x1x10xf32>
    %c0_321 = arith.constant 0 : index
    %c0_322 = arith.constant 0 : index
    %c0_323 = arith.constant 0 : index
    %545 = vector.load %arg12[%c0_321, %c0_322, %c0_323] : memref<8x1x10xf32, #tpu.memory_space<vmem>>, vector<8x1x10xf32>
    tpu.vector_store %arg12[%c0_321, %c0_322, %c0_323], %544 {strides = array<i32>} : memref<8x1x10xf32, #tpu.memory_space<vmem>>, vector<8x1x10xf32>,
    return
  }
  func.func @transform_0(%arg0: i32) -> (i32, i32, i32) {
    %c0_i32 = arith.constant 0 : i32
    %c0_i32_0 = arith.constant 0 : i32
    %c0_i32_1 = arith.constant 0 : i32
    %c0_i32_2 = arith.constant 0 : i32
    return %c0_i32, %c0_i32_0, %c0_i32_1 : i32, i32, i32
  }
  func.func @transform_1(%arg0: i32) -> (i32, i32, i32) {
    %c0_i32 = arith.constant 0 : i32
    %c0_i32_0 = arith.constant 0 : i32
    %c0_i32_1 = arith.constant 0 : i32
    %c0_i32_2 = arith.constant 0 : i32
    return %c0_i32, %c0_i32_0, %c0_i32_1 : i32, i32, i32
  }
  func.func @transform_2(%arg0: i32) -> (i32, i32, i32) {
    %c0_i32 = arith.constant 0 : i32
    %c0_i32_0 = arith.constant 0 : i32
    %c0_i32_1 = arith.constant 0 : i32
    %c0_i32_2 = arith.constant 0 : i32
    return %c0_i32, %c0_i32_0, %c0_i32_1 : i32, i32, i32
  }
  func.func @transform_3(%arg0: i32) -> (i32, i32) {
    %c0_i32 = arith.constant 0 : i32
    %c0_i32_0 = arith.constant 0 : i32
    %c0_i32_1 = arith.constant 0 : i32
    return %c0_i32, %c0_i32_0 : i32, i32
  }
  func.func @transform_4(%arg0: i32) -> (i32, i32) {
    %c0_i32 = arith.constant 0 : i32
    %c0_i32_0 = arith.constant 0 : i32
    %c0_i32_1 = arith.constant 0 : i32
    return %c0_i32, %c0_i32_0 : i32, i32
  }
  func.func @transform_5(%arg0: i32) -> (i32, i32) {
    %c0_i32 = arith.constant 0 : i32
    %c0_i32_0 = arith.constant 0 : i32
    %c0_i32_1 = arith.constant 0 : i32
    return %c0_i32, %c0_i32_0 : i32, i32
  }
  func.func @transform_6(%arg0: i32) -> (i32, i32) {
    %c0_i32 = arith.constant 0 : i32
    %c0_i32_0 = arith.constant 0 : i32
    %c0_i32_1 = arith.constant 0 : i32
    return %c0_i32, %c0_i32_0 : i32, i32
  }
  func.func @transform_7(%arg0: i32) -> (i32, i32) {
    %c0_i32 = arith.constant 0 : i32
    %c0_i32_0 = arith.constant 0 : i32
    %c0_i32_1 = arith.constant 0 : i32
    return %c0_i32, %c0_i32_0 : i32, i32
  }
  func.func @transform_8(%arg0: i32) -> (i32, i32) {
    %c0_i32 = arith.constant 0 : i32
    %c0_i32_0 = arith.constant 0 : i32
    %c0_i32_1 = arith.constant 0 : i32
    return %c0_i32, %c0_i32_0 : i32, i32
  }
  func.func @transform_9(%arg0: i32) -> (i32, i32) {
    %c0_i32 = arith.constant 0 : i32
    %c0_i32_0 = arith.constant 0 : i32
    %c0_i32_1 = arith.constant 0 : i32
    return %c0_i32, %c0_i32_0 : i32, i32
  }
  func.func @transform_10(%arg0: i32) -> (i32, i32) {
    %c0_i32 = arith.constant 0 : i32
    %c0_i32_0 = arith.constant 0 : i32
    %c0_i32_1 = arith.constant 0 : i32
    return %c0_i32, %c0_i32_0 : i32, i32
  }
  func.func @transform_11(%arg0: i32) -> (i32, i32, i32) {
    %c0_i32 = arith.constant 0 : i32
    %c0_i32_0 = arith.constant 0 : i32
    %c0_i32_1 = arith.constant 0 : i32
    %c0_i32_2 = arith.constant 0 : i32
    return %c0_i32, %c0_i32_0, %c0_i32_1 : i32, i32, i32
  }
  func.func @transform_12(%arg0: i32) -> (i32, i32, i32) {
    %c0_i32 = arith.constant 0 : i32
    %c0_i32_0 = arith.constant 0 : i32
    %c0_i32_1 = arith.constant 0 : i32
    %c0_i32_2 = arith.constant 0 : i32
    return %c0_i32, %c0_i32_0, %c0_i32_1 : i32, i32, i32
  }
}

</mosaic_0001>

<bundles_post_ra>
// kernel: tpu_custom_call.1
= control target key start
LH: loop header
LB: loop body
LE: loop exit
PB: predicated region body
PF: predicated region fallthrough
CT: control target
= control target key end

     0   :  { %18 = vsyncpa [#allocation7], 0  ;;  %s4255_s0 = inlined_call_operand.hbm [shape: f32[8,1,16], index: 0, kind: input, shape index: {}]   ;;  %s4256_s1 = inlined_call_operand.hbm [shape: f32[2,1,32], index: 1, kind: input, shape index: {}]   ;;  %s4257_s2 = inlined_call_operand.hbm [shape: f32[2,1,32], index: 2, kind: input, shape index: {}]   ;;  %s4258_s3 = inlined_call_operand.vmem [shape: f32[16,128], index: 3, kind: input, shape index: {}]   ;;  %s4259_s4 = inlined_call_operand.vmem [shape: f32[32,128], index: 4, kind: input, shape index: {}]   ;;  %s4260_s5 = inlined_call_operand.hbm [shape: f32[1,128], index: 5, kind: input, shape index: {}]   ;;  %s4261_s6 = inlined_call_operand.hbm [shape: f32[32,128], index: 6, kind: input, shape index: {}]   ;;  %s4262_s7 = inlined_call_operand.hbm [shape: f32[32,128], index: 7, kind: input, shape index: {}]   ;;  %s4263_s8 = inlined_call_operand.hbm [shape: f32[1,128], index: 8, kind: input, shape index: {}]   ;;  %s4264_s9 = inlined_call_operand.vmem [shape: f32[32,10], index: 9, kind: input, shape index: {}]   ;;  %s4265_s10 = inlined_call_operand.vmem [shape: f32[1,10], index: 10, kind: input, shape index: {}]   ;;  %s4266_s11 = inlined_call_operand.hbm [shape: f32[8,1,10], index: 11, kind: output, shape index: {0}]   ;;  %s4267_s12 = inlined_call_operand.hbm [shape: f32[8,1,10], index: 12, kind: output, shape index: {1}]  }
   0x1   :  { %19 = vsyncpa [#allocation10], 0 }
   0x2   :  { %20 = vsyncpa [#allocation13], 0 }
   0x3   :  { %21 = vsyncpa [#allocation16], 0 }
   0x4   :  { %22 = vsyncpa [#allocation8], 0 }
   0x5   :  { %23 = vsyncpa [#allocation20], 0  ;;  %s3608_s21 = smov [#allocation9]   ;;  %s3609_s23 = smov [#allocation12]  }
   0x6   :  { %s41_s22 = sshll.u32 %s3608_s21, 4  ;;  %s70_s24 = sshll.u32 %s3609_s23, 4  ;;  %s42_s22 = int_to_ptr.vmem [resolvable:$true] %s41_s22  ;;  %s71_s24 = int_to_ptr.vmem [resolvable:$true] %s70_s24 }
   0x7   :  { %s3424_s25 = scalar_lea.vmem %s42_s22, 32  ;;  %p3429_p1 = scmp.lt.s32.totalorder %s42_s22, %s42_s22 }
   0x8   :  { %p3425_p0 = scmp.ne.s32.totalorder %s42_s22, %s3424_s25  ;;  %p3430_p2 = scmp.lt.s32.totalorder %s3424_s25, %s3424_s25 }
   0xa   :  { %p3431_p3 = por %p3430_p2, %p3429_p1 }
   0xc   :  { %p3432_p4 = pnand %p3431_p3, %p3425_p0 }
   0xe   :  { %3435 = shalt.err (!%p3432_p4)
}
   0xf   :  { %s3610_s26 = smov 16   ;;  %s3611_s27 = smov 1  }
  0x10   :  { %47 = dma.hbm_to_vmem [thread:$0]  %s4256_s1, 32, %s42_s22, [#allocation10], %s3610_s26, %s3610_s26, %s3611_s27  }
  0x11   :  { %s3444_s30 = scalar_lea.vmem %s71_s24, 16  ;;  %s3448_s13 = scalar_lea.vmem %s71_s24, 32 }
  0x12   :  { %p3445_p5 = scmp.ne.s32.totalorder %s71_s24, %s3444_s30  ;;  %p3449_p6 = scmp.lt.s32.totalorder %s71_s24, %s71_s24 }
  0x13   :  { %p3450_p7 = scmp.lt.s32.totalorder %s3448_s13, %s3444_s30 }
  0x15   :  { %p3451_p8 = por %p3450_p7, %p3449_p6 }
  0x17   :  { %p3452_p9 = pnand %p3451_p8, %p3445_p5 }
  0x19   :  { %3455 = shalt.err (!%p3452_p9)
}
  0x1a   :  { %73 = dma.hbm_to_vmem [thread:$0]  %s4260_s5, 16, %s71_s24, [#allocation13]  }
  0x1b   :  { %s3612_s16 = smov [#allocation15]   ;;  %s3613_s18 = smov [#allocation6]  }
  0x1c   :  { %s91_s17 = sshll.u32 %s3612_s16, 4  ;;  %s29_s19 = sshll.u32 %s3613_s18, 4  ;;  %s92_s17 = int_to_ptr.vmem [resolvable:$true] %s91_s17  ;;  %s30_s19 = int_to_ptr.vmem [resolvable:$true] %s29_s19 }
  0x1d   :  { %s3464_s20 = scalar_lea.vmem %s92_s17, 512  ;;  %p3469_p11 = scmp.lt.s32.totalorder %s92_s17, %s92_s17 }
  0x1e   :  { %p3465_p10 = scmp.ne.s32.totalorder %s92_s17, %s3464_s20  ;;  %p3470_p12 = scmp.lt.s32.totalorder %s3464_s20, %s3464_s20 }
  0x20   :  { %p3471_p13 = por %p3470_p12, %p3469_p11 }
  0x22   :  { %p3472_p0 = pnand %p3471_p13, %p3465_p10 }
  0x24   :  { %3475 = shalt.err (!%p3472_p0)
}
  0x25   :  { %s3614_s1 = smov 128   ;;  %s3615_s21 = smov 8  }
  0x26   :  { %97 = dma.hbm_to_vmem [thread:$0]  %s4262_s7, 512, %s92_s17, [#allocation16], %s3614_s1, %s3614_s1, %s3615_s21  }
  0x27   :  { %s3484_s23 = scalar_lea.vmem %s30_s19, 128  ;;  %p3489_p2 = scmp.lt.s32.totalorder %s30_s19, %s30_s19 }
  0x28   :  { %p3485_p1 = scmp.ne.s32.totalorder %s30_s19, %s3484_s23  ;;  %p3490_p3 = scmp.lt.s32.totalorder %s3484_s23, %s3484_s23 }
  0x2a   :  { %p3491_p4 = por %p3490_p3, %p3489_p2 }
  0x2c   :  { %p3492_p5 = pnand %p3491_p4, %p3485_p1 }
  0x2e   :  { %3495 = shalt.err (!%p3492_p5)
}
  0x2f   :  { %35 = dma.hbm_to_vmem [thread:$0]  %s4255_s0, 128, %s30_s19, [#allocation7], %s3610_s26, %s3610_s26, %s3611_s27  }
  0x30   :  { %s3616_s28 = smov [#allocation11]   ;;  %s3617_s30 = smov [#allocation14]  }
  0x31   :  { %s53_s29 = sshll.u32 %s3616_s28, 4  ;;  %s79_s13 = sshll.u32 %s3617_s30, 4  ;;  %s54_s29 = int_to_ptr.vmem [resolvable:$true] %s53_s29  ;;  %s80_s13 = int_to_ptr.vmem [resolvable:$true] %s79_s13 }
  0x32   :  { %s3504_s7 = scalar_lea.vmem %s54_s29, 32  ;;  %p3509_p7 = scmp.lt.s32.totalorder %s54_s29, %s54_s29 }
  0x33   :  { %p3505_p6 = scmp.ne.s32.totalorder %s54_s29, %s3504_s7  ;;  %p3510_p8 = scmp.lt.s32.totalorder %s3504_s7, %s3504_s7 }
  0x35   :  { %p3511_p9 = por %p3510_p8, %p3509_p7 }
  0x37   :  { %p3512_p10 = pnand %p3511_p9, %p3505_p6 }
  0x39   :  { %3515 = shalt.err (!%p3512_p10)
}
  0x3a   :  { %59 = dma.hbm_to_vmem [thread:$0]  %s4257_s2, 32, %s54_s29, [#allocation10], %s3610_s26, %s3610_s26, %s3611_s27  }
  0x3b   :  { %s3524_s0 = scalar_lea.vmem %s80_s13, 512  ;;  %p3529_p12 = scmp.lt.s32.totalorder %s80_s13, %s80_s13 }
  0x3c   :  { %p3525_p11 = scmp.ne.s32.totalorder %s80_s13, %s3524_s0  ;;  %p3530_p13 = scmp.lt.s32.totalorder %s3524_s0, %s3524_s0 }
  0x3e   :  { %p3531_p0 = por %p3530_p13, %p3529_p12 }
  0x40   :  { %p3532_p1 = pnand %p3531_p0, %p3525_p11 }
  0x42   :  { %3535 = shalt.err (!%p3532_p1)
}
  0x43   :  { %85 = dma.hbm_to_vmem [thread:$0]  %s4261_s6, 512, %s80_s13, [#allocation13], %s3614_s1, %s3614_s1, %s3615_s21  }
  0x44   :  { %s3618_s18 = smov [#allocation17]  }
  0x45   :  { %s104_s19 = sshll.u32 %s3618_s18, 4  ;;  %s105_s19 = int_to_ptr.vmem [resolvable:$true] %s104_s19 }
  0x46   :  { %s3544_s20 = scalar_lea.vmem %s105_s19, 16  ;;  %s3548_s2 = scalar_lea.vmem %s105_s19, 32 }
  0x47   :  { %p3545_p2 = scmp.ne.s32.totalorder %s105_s19, %s3544_s20  ;;  %p3549_p3 = scmp.lt.s32.totalorder %s105_s19, %s105_s19 }
  0x48   :  { %p3550_p4 = scmp.lt.s32.totalorder %s3548_s2, %s3544_s20 }
  0x4a   :  { %p3551_p5 = por %p3550_p4, %p3549_p3 }
  0x4c   :  { %p3552_p6 = pnand %p3551_p5, %p3545_p2 }
  0x4e   :  { %3555 = shalt.err (!%p3552_p6)
}
  0x4f   :  { %107 = dma.hbm_to_vmem [thread:$0]  %s4263_s8, 16, %s105_s19, [#allocation16]  }
  0x50   :  { %3596 = dma.done.wait [#allocation7], 128  }
  0x51   :  { %3597 = vsyncadd [#allocation7], 4294967168 }
  0x52   :  { %3598 = dma.done.wait [#allocation10], 64  }
  0x53   :  { %3599 = vsyncadd [#allocation10], 4294967232 }
  0x54   :  { %3600 = dma.done.wait [#allocation13], 528  }
  0x55   :  { %3601 = vsyncadd [#allocation13], 4294966768 }
  0x56   :  { %3602 = dma.done.wait [#allocation16], 528  }
  0x57   :  { %3603 = vsyncadd [#allocation16], 4294966768  ;;  %v165_v0 = vlaneseq  ;;  %v3619_v1 = vmov 0.0   ;;  %vm3620_vm0 = vmmov 0   ;;  %v3621_v2 = vmov 1966171168  }
  0x58   :  { %3032 = vmatprep.subr.mxu0 %v3619_v1  ;;  %3036 = vmatprep.mubr.msk.f32.mxu0 %vm3620_vm0, %v3619_v1  ;;  %v163_v3 = vunpack.c.l.s4 %v3621_v2  ;;  %v142_v6 = vld [vmem:[%s4258_s3 + $0x8] sm:$0xff]  ;;  %v141_v7 = vld [vmem:[%s4258_s3] sm:$0xff]  ;;  %v133_v8 = vld [vmem:[#allocation6] sm:$0x1]  ;;  %vm351_vm1 = vcmask 253952   ;;  %vm358_vm2 = vcmask 261120  }
  0x59   :  { %3039 = vmatprep.subr.mxu1 %v3619_v1  ;;  %3047 = vmatprep.mubr.msk.f32.mxu1 %vm3620_vm0, %v3619_v1  ;;  %v3734_v5 = vshrl.u32 %v165_v0, 7  ;;  %v134_v10 = vld [vmem:[#allocation6 + $0x1] sm:$0x1]  ;;  %v135_v11 = vld [vmem:[#allocation6 + $0x2] sm:$0x1]  ;;  %v3749_v20 = vld [vmem:[%s4259_s4 + $0x18] sm:$0xff] }
  0x5a   :  { %v164_v4 = vunpack.c.0.s8 %v163_v3  ;;  %3033 = vmatpush3.msra.mxu0 %v142_v6  ;;  %v136_v12 = vld [vmem:[#allocation6 + $0x3] sm:$0x1]  ;;  %v137_v13 = vld [vmem:[#allocation6 + $0x4] sm:$0x1]  ;;  %v138_v14 = vld [vmem:[#allocation6 + $0x5] sm:$0x1]  ;;  %v158_v16 = vcombine.low %v133_v8, %v134_v10  ;;  %3040 = vmatpush3.msra.mxu1 %v3749_v20 }
  0x5b   :  { %3034 = vmatprep.subr.mxu0 %v3619_v1  ;;  %v139_v15 = vld [vmem:[#allocation6 + $0x6] sm:$0x1]  ;;  %v159_v17 = vcombine.low %v135_v11, %v136_v12  ;;  %v140_v18 = vld [vmem:[#allocation6 + $0x7] sm:$0x1]  ;;  %v160_v19 = vcombine.low %v137_v13, %v138_v14  ;;  %v3754_v21 = vld [vmem:[%s4259_s4 + $0x10] sm:$0xff]  ;;  %3041 = vmatprep.subr.mxu1 %v3619_v1  ;;  %vm207_vm3 = vcmask 130048  }
  0x5c   :  { %v3743_v9 = vsub.s32 %v164_v4, %v3734_v5  ;;  %3035 = vmatpush3.msra.mxu0 %v141_v7  ;;  %v161_v22 = vcombine.low %v139_v15, %v140_v18  ;;  %v350_v25 = vld [vmem:[#allocation9] sm:$0x1]  ;;  %v3765_v27 = vld [vmem:[%s4259_s4 + $0x8] sm:$0xff]  ;;  %3042 = vmatpush3.msra.mxu1 %v3754_v21  ;;  %v3774_v30 = vld [vmem:[%s4259_s4] sm:$0xff]  ;;  %s3622_s4 = smov 32   ;;  %v3814_v8 = vsub.s32 0, %v3734_v5 }
  0x5d   :  { %3050 = vmatprep.subr.mxu0 %v3619_v1  ;;  %352 = vst.msk [vmem:[#allocation4] sm:$0x1] %vm351_vm1, %v350_v25  ;;  %3043 = vmatprep.subr.mxu1 %v3619_v1  ;;  %v353_v36 = vld [vmem:[#allocation11] sm:$0x1]  ;;  %v2893_v37 = vld [vmem:[#allocation12] ss:$0 sm:$0xff] }
  0x5e   :  { %v168_v23 = vrot.slane %v158_v16, %v3743_v9  ;;  %v175_v24 = vrot.slane %v159_v17, %v3743_v9  ;;  %v182_v26 = vrot.slane %v160_v19, %v3743_v9  ;;  %v189_v28 = vrot.slane %v161_v22, %v3743_v9  ;;  %3044 = vmatpush3.msra.mxu1 %v3765_v27  ;;  %s3623_s7 = smov 96   ;;  %s3624_s14 = smov 64  }
  0x5f   :  { %3045 = vmatprep.subr.mxu1 %v3619_v1  ;;  %354 = vst.msk [vmem:[#allocation5] sm:$0x1] %vm351_vm1, %v353_v36  ;;  %vm2784_vm4 = vcmask 73728  }
  0x60   :  { %v190_v29 = vcombine.low %v168_v23, %v175_v24  ;;  %v191_v31 = vcombine.low %v182_v26, %v189_v28  ;;  %3046 = vmatpush3.msra.mxu1 %v3774_v30 }
  0x61   :  { %3061 = vmatprep.subr.mxu1 %v3619_v1 }
  0x62   :  { %v198_v32 = vrot.slane %v190_v29, %v3743_v9  ;;  %v205_v33 = vrot.slane %v191_v31, %v3743_v9 }
  0x64   :  { %v206_v34 = vcombine.low %v198_v32, %v205_v33  ;;  %v355_v35 = vld [vmem:[#allocation4] sm:$0x1] }
  0x65   :  { %3048 = vmatmul.mubr.msk.f32.vlgmr.msra.gmra.mxu1 %vm358_vm2, %v355_v35 }
  0x66   :  { %3037 = vmatmul.mubr.msk.f32.vlgmr.msra.gmra.mxu0 %vm207_vm3, %v206_v34  ;;  %3062 = vmatpush3.msra.mxu1 %v3749_v20  ;;  %v356_v59 = vld [vmem:[#allocation5] sm:$0x1] }
  0x67   :  { %3051 = vmatpush3.msra.mxu0 %v3749_v20  ;;  %3058 = vmatprep.mubr.msk.f32.mxu0 %vm3620_vm0, %v3619_v1 }
  0x68   :  { %3052 = vmatprep.subr.mxu0 %v3619_v1  ;;  %3063 = vmatprep.subr.mxu1 %v3619_v1 }
  0x69   :  { %3053 = vmatpush3.msra.mxu0 %v3754_v21  ;;  %3064 = vmatpush3.msra.mxu1 %v3754_v21 }
  0x6a   :  { %3054 = vmatprep.subr.mxu0 %v3619_v1  ;;  %3065 = vmatprep.subr.mxu1 %v3619_v1 }
  0x6b   :  { %3055 = vmatpush3.msra.mxu0 %v3765_v27  ;;  %3066 = vmatpush3.msra.mxu1 %v3765_v27 }
  0x6c   :  { %3056 = vmatprep.subr.mxu0 %v3619_v1  ;;  %3067 = vmatprep.subr.mxu1 %v3619_v1 }
  0x6d   :  { %3057 = vmatpush3.msra.mxu0 %v3774_v30  ;;  %3068 = vmatpush3.msra.mxu1 %v3774_v30 }
  0x6e   :  { %3069 = vmatprep.mubr.msk.f32.mxu1 %vm3620_vm0, %v3619_v1  ;;  %3072 = vmatprep.subr.mxu0 %v3619_v1 }
  0x6f   :  { %3083 = vmatprep.subr.mxu1 %v3619_v1 }
 0x125   :  { %v428_v38 = vpop.f32.mrf.mxu1 }
 0x126   :  { %v276_v39 = vpop.f32.mrf.mxu0 }
 0x127   :  { %v277_v40 = vadd.f32 %v2893_v37, %v276_v39  ;;  %v3049_v41 = vpop.f32.mrf.mxu1 }
 0x128   :  { %v3038_v42 = vpop.f32.mrf.mxu0 }
 0x129   :  { %v281_v43 = vcombine.high %v277_v40, %v277_v40  ;;  %v288_v44 = vrot.slane %v277_v40, %v3743_v9 }
 0x12b   :  { %v295_v45 = vrot.slane %v281_v43, %v3743_v9  ;;  %v296_v46 = vcombine.high %v288_v44, %v288_v44  ;;  %v304_v47 = vrot.slane %v288_v44, %v3743_v9  ;;  %2895 = vst.sshfl [vmem:[#allocation3] sm:$0x1 pattern:$0x73625140] %v288_v44 }
 0x12d   :  { %v297_v48 = vcombine.high %v295_v45, %v295_v45  ;;  %v311_v49 = vrot.slane %v295_v45, %v3743_v9  ;;  %v318_v50 = vrot.slane %v296_v46, %v3743_v9  ;;  %v326_v51 = vcombine.high %v304_v47, %v304_v47  ;;  %2896 = vst.sshfl [vmem:[#allocation3 + $0x1] sm:$0x1 pattern:$0x73625140] %v296_v46 }
 0x12e   :  { %2897 = vst.sshfl [vmem:[#allocation3 + $0x4] sm:$0x1 pattern:$0x73625140] %v295_v45 }
 0x12f   :  { %v325_v52 = vrot.slane %v297_v48, %v3743_v9  ;;  %v327_v53 = vcombine.high %v311_v49, %v311_v49  ;;  %v328_v54 = vcombine.high %v318_v50, %v318_v50  ;;  %340 = vst [vmem:[#allocation3 + $0x2] sm:$0x1] %v326_v51  ;;  %2898 = vst.sshfl [vmem:[#allocation3 + $0x5] sm:$0x1 pattern:$0x73625140] %v297_v48 }
 0x131   :  { %v329_v55 = vcombine.high %v325_v52, %v325_v52  ;;  %341 = vst [vmem:[#allocation3 + $0x3] sm:$0x1] %v328_v54  ;;  %344 = vst [vmem:[#allocation3 + $0x6] sm:$0x1] %v327_v53 }
 0x132   :  { %v357_v56 = vld [vmem:[#allocation3] sm:$0x1] }
 0x133   :  { %345 = vst [vmem:[#allocation3 + $0x7] sm:$0x1] %v329_v55  ;;  %v432_v57 = vadd.f32 %v428_v38, %v357_v56 }
 0x134   :  { %v483_v18 = vld [vmem:[#allocation3 + $0x1] sm:$0x1] }
 0x135   :  { %3256 = vtanh.f32 %v432_v57  ;;  %v2900_v60 = vmul.f32 -1.442695, %v432_v57 }
 0x136   :  { %v609_v46 = vld [vmem:[#allocation3 + $0x2] sm:$0x1] }
 0x137   :  { %3258 = vpow2.f32 %v2900_v60 }
 0x142   :  { %v3257_v58 = vpop.eup %3256 }
 0x143   :  { %446 = vrot.lane.b32.xlu0 %v3257_v58, %s3622_s4 }
 0x144   :  { %v3259_v61 = vpop.eup %3258 }
 0x145   :  { %v436_v62 = vadd.f32 1.0, %v3259_v61 }
 0x147   :  { %441 = vrot.lane.b32.xlu0 %v356_v59, %s3622_s4  ;;  %3260 = vrcp.f32 %v436_v62 }
 0x154   :  { %v3261_v63 = vpop.eup %3260 }
 0x1b5   :  { %v447_v0 = vpop.permute.xlu0 %446 }
 0x1b6   :  { %v449_v2 = vmul.f32 %v3261_v63, %v447_v0 }
 0x1b8   :  { %451 = vrot.lane.b32.xlu1 %v449_v2, %s3622_s4 }
 0x1b9   :  { %v442_v3 = vpop.permute.xlu0 %441 }
 0x1ba   :  { %v444_v4 = vmul.f32 %v3261_v63, %v442_v3 }
 0x22a   :  { %v452_v6 = vpop.permute.xlu1 %451 }
 0x22b   :  { %v454_v7 = vadd.f32 %v452_v6, %v444_v4 }
 0x22d   :  { %3262 = vtanh.f32 %v454_v7  ;;  %v465_v11 = vrot.slane %v454_v7, %v3814_v8 }
 0x23a   :  { %v3263_v10 = vpop.eup %3262 }
 0x23b   :  { %457 = vrot.lane.b32.xlu1 %v3263_v10, %s3622_s4  ;;  %v735_v10 = vld [vmem:[#allocation3 + $0x3] sm:$0x1] }
 0x23f   :  { %466 = vrot.lane.b32.xlu1 %v465_v11, %s3623_s7 }
 0x2ad   :  { %v458_v12 = vpop.permute.xlu1 %457 }
 0x2ae   :  { %v460_v13 = vmul.f32 %v3261_v63, %v458_v12 }
 0x2b0   :  { %v474_v14 = vrot.slane %v460_v13, %v3814_v8 }
 0x2b1   :  { %v467_v15 = vpop.permute.xlu1 %466 }
 0x2b2   :  { %469 = vst.msk [vmem:[#allocation5] sm:$0x1] %vm351_vm1, %v467_v15  ;;  %475 = vrot.lane.b32.xlu0 %v474_v14, %s3624_s14 }
 0x2b9   :  { %v481_v5 = vld [vmem:[#allocation5] sm:$0x1] }
 0x2ba   :  { %566 = vrot.lane.b32.xlu1 %v481_v5, %s3622_s4 }
 0x324   :  { %v476_v16 = vpop.permute.xlu0 %475 }
 0x325   :  { %478 = vst.msk [vmem:[#allocation4] sm:$0x1] %vm351_vm1, %v476_v16  ;;  %479 = vst.msk [vmem:[#allocation2] sm:$0x1] %vm351_vm1, %v476_v16 }
 0x32c   :  { %v480_v17 = vld [vmem:[#allocation4] sm:$0x1]  ;;  %v567_v33 = vpop.permute.xlu1 %566 }
 0x32d   :  { %3059 = vmatmul.mubr.msk.f32.vlgmr.msra.gmra.mxu0 %vm358_vm2, %v480_v17 }
 0x32e   :  { %3073 = vmatpush3.msra.mxu0 %v3749_v20  ;;  %3080 = vmatprep.mubr.msk.f32.mxu0 %vm3620_vm0, %v3619_v1 }
 0x32f   :  { %3074 = vmatprep.subr.mxu0 %v3619_v1 }
 0x330   :  { %3075 = vmatpush3.msra.mxu0 %v3754_v21 }
 0x331   :  { %3076 = vmatprep.subr.mxu0 %v3619_v1 }
 0x332   :  { %3077 = vmatpush3.msra.mxu0 %v3765_v27 }
 0x333   :  { %3078 = vmatprep.subr.mxu0 %v3619_v1 }
 0x334   :  { %3079 = vmatpush3.msra.mxu0 %v3774_v30 }
 0x335   :  { %3094 = vmatprep.subr.mxu0 %v3619_v1 }
 0x3ed   :  { %v553_v19 = vpop.f32.mrf.mxu0 }
 0x3ee   :  { %v557_v22 = vadd.f32 %v553_v19, %v483_v18 }
 0x3ef   :  { %v3060_v23 = vpop.f32.mrf.mxu0 }
 0x3f0   :  { %3264 = vtanh.f32 %v557_v22  ;;  %v2902_v25 = vmul.f32 -1.442695, %v557_v22 }
 0x3f2   :  { %3266 = vpow2.f32 %v2902_v25 }
 0x3fd   :  { %v3265_v24 = vpop.eup %3264 }
 0x3fe   :  { %571 = vrot.lane.b32.xlu0 %v3265_v24, %s3622_s4 }
 0x3ff   :  { %v3267_v26 = vpop.eup %3266 }
 0x400   :  { %v561_v28 = vadd.f32 1.0, %v3267_v26 }
 0x402   :  { %3268 = vrcp.f32 %v561_v28 }
 0x40f   :  { %v3269_v29 = vpop.eup %3268 }
 0x410   :  { %v569_v34 = vmul.f32 %v3269_v29, %v567_v33 }
 0x470   :  { %v572_v31 = vpop.permute.xlu0 %571 }
 0x471   :  { %v574_v32 = vmul.f32 %v3269_v29, %v572_v31 }
 0x473   :  { %576 = vrot.lane.b32.xlu0 %v574_v32, %s3622_s4 }
 0x4e5   :  { %v577_v35 = vpop.permute.xlu0 %576 }
 0x4e6   :  { %v579_v36 = vadd.f32 %v577_v35, %v569_v34 }
 0x4e8   :  { %3270 = vtanh.f32 %v579_v36  ;;  %v590_v38 = vrot.slane %v579_v36, %v3814_v8 }
 0x4f5   :  { %v3271_v37 = vpop.eup %3270 }
 0x4f6   :  { %582 = vrot.lane.b32.xlu1 %v3271_v37, %s3622_s4  ;;  %v861_v37 = vld [vmem:[#allocation3 + $0x4] sm:$0x1] }
 0x4fa   :  { %591 = vrot.lane.b32.xlu1 %v590_v38, %s3623_s7 }
 0x568   :  { %v583_v39 = vpop.permute.xlu1 %582 }
 0x569   :  { %v585_v40 = vmul.f32 %v3269_v29, %v583_v39 }
 0x56b   :  { %v599_v41 = vrot.slane %v585_v40, %v3814_v8 }
 0x56c   :  { %v592_v42 = vpop.permute.xlu1 %591 }
 0x56d   :  { %594 = vst.msk [vmem:[#allocation5] sm:$0x1] %vm351_vm1, %v592_v42  ;;  %600 = vrot.lane.b32.xlu0 %v599_v41, %s3624_s14 }
 0x574   :  { %v607_v43 = vld [vmem:[#allocation5] sm:$0x1] }
 0x575   :  { %692 = vrot.lane.b32.xlu1 %v607_v43, %s3622_s4 }
 0x5df   :  { %v601_v44 = vpop.permute.xlu0 %600 }
 0x5e0   :  { %603 = vst.msk [vmem:[#allocation4] sm:$0x1] %vm351_vm1, %v601_v44  ;;  %605 = vst.msk [vmem:[#allocation2 + $0x1] sm:$0x1] %vm351_vm1, %v601_v44 }
 0x5e7   :  { %v606_v45 = vld [vmem:[#allocation4] sm:$0x1]  ;;  %v693_v57 = vpop.permute.xlu1 %692 }
 0x5e8   :  { %3070 = vmatmul.mubr.msk.f32.vlgmr.msra.gmra.mxu1 %vm358_vm2, %v606_v45 }
 0x5e9   :  { %3084 = vmatpush3.msra.mxu1 %v3749_v20  ;;  %3091 = vmatprep.mubr.msk.f32.mxu1 %vm3620_vm0, %v3619_v1 }
 0x5ea   :  { %3085 = vmatprep.subr.mxu1 %v3619_v1 }
 0x5eb   :  { %3086 = vmatpush3.msra.mxu1 %v3754_v21 }
 0x5ec   :  { %3087 = vmatprep.subr.mxu1 %v3619_v1 }
 0x5ed   :  { %3088 = vmatpush3.msra.mxu1 %v3765_v27 }
 0x5ee   :  { %3089 = vmatprep.subr.mxu1 %v3619_v1 }
 0x5ef   :  { %3090 = vmatpush3.msra.mxu1 %v3774_v30 }
 0x5f0   :  { %3105 = vmatprep.subr.mxu1 %v3619_v1 }
 0x6a8   :  { %v679_v47 = vpop.f32.mrf.mxu1 }
 0x6a9   :  { %v683_v48 = vadd.f32 %v679_v47, %v609_v46 }
 0x6aa   :  { %v3071_v49 = vpop.f32.mrf.mxu1 }
 0x6ab   :  { %3272 = vtanh.f32 %v683_v48  ;;  %v2904_v51 = vmul.f32 -1.442695, %v683_v48 }
 0x6ad   :  { %3274 = vpow2.f32 %v2904_v51 }
 0x6b8   :  { %v3273_v50 = vpop.eup %3272 }
 0x6b9   :  { %697 = vrot.lane.b32.xlu0 %v3273_v50, %s3622_s4 }
 0x6ba   :  { %v3275_v52 = vpop.eup %3274 }
 0x6bb   :  { %v687_v53 = vadd.f32 1.0, %v3275_v52 }
 0x6bd   :  { %3276 = vrcp.f32 %v687_v53 }
 0x6ca   :  { %v3277_v54 = vpop.eup %3276 }
 0x6cb   :  { %v695_v58 = vmul.f32 %v3277_v54, %v693_v57 }
 0x72b   :  { %v698_v55 = vpop.permute.xlu0 %697 }
 0x72c   :  { %v700_v56 = vmul.f32 %v3277_v54, %v698_v55 }
 0x72e   :  { %702 = vrot.lane.b32.xlu0 %v700_v56, %s3622_s4 }
 0x7a0   :  { %v703_v59 = vpop.permute.xlu0 %702 }
 0x7a1   :  { %v705_v60 = vadd.f32 %v703_v59, %v695_v58 }
 0x7a3   :  { %3278 = vtanh.f32 %v705_v60  ;;  %v716_v62 = vrot.slane %v705_v60, %v3814_v8 }
 0x7b0   :  { %v3279_v61 = vpop.eup %3278 }
 0x7b1   :  { %708 = vrot.lane.b32.xlu1 %v3279_v61, %s3622_s4  ;;  %v987_v61 = vld [vmem:[#allocation3 + $0x5] sm:$0x1] }
 0x7b5   :  { %717 = vrot.lane.b32.xlu1 %v716_v62, %s3623_s7 }
 0x823   :  { %v709_v63 = vpop.permute.xlu1 %708 }
 0x824   :  { %v711_v0 = vmul.f32 %v3277_v54, %v709_v63 }
 0x826   :  { %v725_v2 = vrot.slane %v711_v0, %v3814_v8 }
 0x827   :  { %v718_v3 = vpop.permute.xlu1 %717 }
 0x828   :  { %720 = vst.msk [vmem:[#allocation5] sm:$0x1] %vm351_vm1, %v718_v3  ;;  %726 = vrot.lane.b32.xlu0 %v725_v2, %s3624_s14 }
 0x82f   :  { %v733_v4 = vld [vmem:[#allocation5] sm:$0x1] }
 0x830   :  { %818 = vrot.lane.b32.xlu1 %v733_v4, %s3622_s4 }
 0x89a   :  { %v727_v6 = vpop.permute.xlu0 %726 }
 0x89b   :  { %729 = vst.msk [vmem:[#allocation4] sm:$0x1] %vm351_vm1, %v727_v6  ;;  %731 = vst.msk [vmem:[#allocation2 + $0x2] sm:$0x1] %vm351_vm1, %v727_v6 }
 0x8a2   :  { %v732_v7 = vld [vmem:[#allocation4] sm:$0x1]  ;;  %v819_v22 = vpop.permute.xlu1 %818 }
 0x8a3   :  { %3081 = vmatmul.mubr.msk.f32.vlgmr.msra.gmra.mxu0 %vm358_vm2, %v732_v7 }
 0x8a4   :  { %3095 = vmatpush3.msra.mxu0 %v3749_v20  ;;  %3102 = vmatprep.mubr.msk.f32.mxu0 %vm3620_vm0, %v3619_v1 }
 0x8a5   :  { %3096 = vmatprep.subr.mxu0 %v3619_v1 }
 0x8a6   :  { %3097 = vmatpush3.msra.mxu0 %v3754_v21 }
 0x8a7   :  { %3098 = vmatprep.subr.mxu0 %v3619_v1 }
 0x8a8   :  { %3099 = vmatpush3.msra.mxu0 %v3765_v27 }
 0x8a9   :  { %3100 = vmatprep.subr.mxu0 %v3619_v1 }
 0x8aa   :  { %3101 = vmatpush3.msra.mxu0 %v3774_v30 }
 0x8ab   :  { %3116 = vmatprep.subr.mxu0 %v3619_v1 }
 0x963   :  { %v805_v11 = vpop.f32.mrf.mxu0 }
 0x964   :  { %v809_v12 = vadd.f32 %v805_v11, %v735_v10 }
 0x965   :  { %v3082_v13 = vpop.f32.mrf.mxu0 }
 0x966   :  { %3280 = vtanh.f32 %v809_v12  ;;  %v2906_v15 = vmul.f32 -1.442695, %v809_v12 }
 0x968   :  { %3282 = vpow2.f32 %v2906_v15 }
 0x973   :  { %v3281_v14 = vpop.eup %3280 }
 0x974   :  { %823 = vrot.lane.b32.xlu0 %v3281_v14, %s3622_s4 }
 0x975   :  { %v3283_v5 = vpop.eup %3282 }
 0x976   :  { %v813_v16 = vadd.f32 1.0, %v3283_v5 }
 0x978   :  { %3284 = vrcp.f32 %v813_v16 }
 0x985   :  { %v3285_v17 = vpop.eup %3284 }
 0x986   :  { %v821_v23 = vmul.f32 %v3285_v17, %v819_v22  ;;  %v1113_v22 = vld [vmem:[#allocation3 + $0x6] sm:$0x1] }
 0x9e6   :  { %v824_v18 = vpop.permute.xlu0 %823 }
 0x9e7   :  { %v826_v19 = vmul.f32 %v3285_v17, %v824_v18 }
 0x9e9   :  { %828 = vrot.lane.b32.xlu0 %v826_v19, %s3622_s4 }
 0xa5b   :  { %v829_v24 = vpop.permute.xlu0 %828 }
 0xa5c   :  { %v831_v25 = vadd.f32 %v829_v24, %v821_v23 }
 0xa5e   :  { %3286 = vtanh.f32 %v831_v25  ;;  %v842_v28 = vrot.slane %v831_v25, %v3814_v8 }
 0xa6b   :  { %v3287_v26 = vpop.eup %3286 }
 0xa6c   :  { %834 = vrot.lane.b32.xlu1 %v3287_v26, %s3622_s4 }
 0xa70   :  { %843 = vrot.lane.b32.xlu1 %v842_v28, %s3623_s7 }
 0xade   :  { %v835_v29 = vpop.permute.xlu1 %834 }
 0xadf   :  { %v837_v31 = vmul.f32 %v3285_v17, %v835_v29 }
 0xae1   :  { %v851_v32 = vrot.slane %v837_v31, %v3814_v8 }
 0xae2   :  { %v844_v33 = vpop.permute.xlu1 %843 }
 0xae3   :  { %846 = vst.msk [vmem:[#allocation5] sm:$0x1] %vm351_vm1, %v844_v33  ;;  %852 = vrot.lane.b32.xlu0 %v851_v32, %s3624_s14 }
 0xaea   :  { %v859_v34 = vld [vmem:[#allocation5] sm:$0x1] }
 0xaeb   :  { %944 = vrot.lane.b32.xlu1 %v859_v34, %s3622_s4 }
 0xb55   :  { %v853_v35 = vpop.permute.xlu0 %852 }
 0xb56   :  { %855 = vst.msk [vmem:[#allocation4] sm:$0x1] %vm351_vm1, %v853_v35  ;;  %857 = vst.msk [vmem:[#allocation2 + $0x3] sm:$0x1] %vm351_vm1, %v853_v35 }
 0xb5d   :  { %v858_v36 = vld [vmem:[#allocation4] sm:$0x1]  ;;  %v945_v48 = vpop.permute.xlu1 %944 }
 0xb5e   :  { %3092 = vmatmul.mubr.msk.f32.vlgmr.msra.gmra.mxu1 %vm358_vm2, %v858_v36 }
 0xb5f   :  { %3106 = vmatpush3.msra.mxu1 %v3749_v20  ;;  %3113 = vmatprep.mubr.msk.f32.mxu1 %vm3620_vm0, %v3619_v1 }
 0xb60   :  { %3107 = vmatprep.subr.mxu1 %v3619_v1 }
 0xb61   :  { %3108 = vmatpush3.msra.mxu1 %v3754_v21 }
 0xb62   :  { %3109 = vmatprep.subr.mxu1 %v3619_v1 }
 0xb63   :  { %3110 = vmatpush3.msra.mxu1 %v3765_v27 }
 0xb64   :  { %3111 = vmatprep.subr.mxu1 %v3619_v1 }
 0xb65   :  { %3112 = vmatpush3.msra.mxu1 %v3774_v30 }
 0xb66   :  { %3127 = vmatprep.subr.mxu1 %v3619_v1 }
 0xc1e   :  { %v931_v38 = vpop.f32.mrf.mxu1 }
 0xc1f   :  { %v935_v39 = vadd.f32 %v931_v38, %v861_v37 }
 0xc20   :  { %v3093_v40 = vpop.f32.mrf.mxu1 }
 0xc21   :  { %3288 = vtanh.f32 %v935_v39  ;;  %v2908_v42 = vmul.f32 -1.442695, %v935_v39 }
 0xc23   :  { %3290 = vpow2.f32 %v2908_v42 }
 0xc2e   :  { %v3289_v41 = vpop.eup %3288 }
 0xc2f   :  { %949 = vrot.lane.b32.xlu0 %v3289_v41, %s3622_s4 }
 0xc30   :  { %v3291_v43 = vpop.eup %3290 }
 0xc31   :  { %v939_v44 = vadd.f32 1.0, %v3291_v43 }
 0xc33   :  { %3292 = vrcp.f32 %v939_v44 }
 0xc40   :  { %v3293_v45 = vpop.eup %3292 }
 0xc41   :  { %v947_v49 = vmul.f32 %v3293_v45, %v945_v48  ;;  %v1239_v48 = vld [vmem:[#allocation3 + $0x7] sm:$0x1] }
 0xca1   :  { %v950_v46 = vpop.permute.xlu0 %949 }
 0xca2   :  { %v952_v47 = vmul.f32 %v3293_v45, %v950_v46 }
 0xca4   :  { %954 = vrot.lane.b32.xlu0 %v952_v47, %s3622_s4 }
 0xd16   :  { %v955_v50 = vpop.permute.xlu0 %954 }
 0xd17   :  { %v957_v51 = vadd.f32 %v955_v50, %v947_v49 }
 0xd19   :  { %3294 = vtanh.f32 %v957_v51  ;;  %v968_v53 = vrot.slane %v957_v51, %v3814_v8 }
 0xd26   :  { %v3295_v52 = vpop.eup %3294 }
 0xd27   :  { %960 = vrot.lane.b32.xlu1 %v3295_v52, %s3622_s4 }
 0xd2b   :  { %969 = vrot.lane.b32.xlu1 %v968_v53, %s3623_s7 }
 0xd99   :  { %v961_v54 = vpop.permute.xlu1 %960 }
 0xd9a   :  { %v963_v55 = vmul.f32 %v3293_v45, %v961_v54 }
 0xd9c   :  { %v977_v56 = vrot.slane %v963_v55, %v3814_v8 }
 0xd9d   :  { %v970_v57 = vpop.permute.xlu1 %969 }
 0xd9e   :  { %972 = vst.msk [vmem:[#allocation5] sm:$0x1] %vm351_vm1, %v970_v57  ;;  %978 = vrot.lane.b32.xlu0 %v977_v56, %s3624_s14 }
 0xda5   :  { %v985_v58 = vld [vmem:[#allocation5] sm:$0x1] }
 0xda6   :  { %1070 = vrot.lane.b32.xlu1 %v985_v58, %s3622_s4 }
 0xe10   :  { %v979_v59 = vpop.permute.xlu0 %978 }
 0xe11   :  { %981 = vst.msk [vmem:[#allocation4] sm:$0x1] %vm351_vm1, %v979_v59  ;;  %983 = vst.msk [vmem:[#allocation2 + $0x4] sm:$0x1] %vm351_vm1, %v979_v59 }
 0xe18   :  { %v984_v60 = vld [vmem:[#allocation4] sm:$0x1] }
 0xe19   :  { %3103 = vmatmul.mubr.msk.f32.vlgmr.msra.gmra.mxu0 %vm358_vm2, %v984_v60 }
 0xe1a   :  { %3117 = vmatpush3.msra.mxu0 %v3749_v20  ;;  %3124 = vmatprep.mubr.msk.f32.mxu0 %vm3620_vm0, %v3619_v1 }
 0xe1b   :  { %3118 = vmatprep.subr.mxu0 %v3619_v1 }
 0xe1c   :  { %3119 = vmatpush3.msra.mxu0 %v3754_v21 }
 0xe1d   :  { %3120 = vmatprep.subr.mxu0 %v3619_v1 }
 0xe1e   :  { %3121 = vmatpush3.msra.mxu0 %v3765_v27 }
 0xe1f   :  { %3122 = vmatprep.subr.mxu0 %v3619_v1 }
 0xe20   :  { %3123 = vmatpush3.msra.mxu0 %v3774_v30  ;;  %v1071_v30 = vpop.permute.xlu1 %1070 }
 0xe21   :  { %3138 = vmatprep.subr.mxu0 %v3619_v1 }
 0xed9   :  { %v1057_v62 = vpop.f32.mrf.mxu0 }
 0xeda   :  { %v1061_v20 = vadd.f32 %v1057_v62, %v987_v61 }
 0xedb   :  { %v3104_v63 = vpop.f32.mrf.mxu0 }
 0xedc   :  { %3296 = vtanh.f32 %v1061_v20  ;;  %v2910_v2 = vmul.f32 -1.442695, %v1061_v20 }
 0xede   :  { %3298 = vpow2.f32 %v2910_v2  ;;  %v1372_v2 = vld [vmem:[#allocation14 + $0x10] sm:$0xff] }
 0xee9   :  { %v3297_v0 = vpop.eup %3296 }
 0xeea   :  { %1075 = vrot.lane.b32.xlu0 %v3297_v0, %s3622_s4  ;;  %v1373_v0 = vld [vmem:[#allocation14 + $0x18] sm:$0xff] }
 0xeeb   :  { %v3299_v21 = vpop.eup %3298 }
 0xeec   :  { %v1065_v3 = vadd.f32 1.0, %v3299_v21  ;;  %v1371_v21 = vld [vmem:[#allocation14 + $0x8] sm:$0xff] }
 0xeee   :  { %3300 = vrcp.f32 %v1065_v3  ;;  %v1370_v3 = vld [vmem:[#allocation14] sm:$0xff] }
 0xefb   :  { %v3301_v27 = vpop.eup %3300 }
 0xefc   :  { %v1073_v7 = vmul.f32 %v3301_v27, %v1071_v30 }
 0xf5c   :  { %v1076_v4 = vpop.permute.xlu0 %1075 }
 0xf5d   :  { %v1078_v6 = vmul.f32 %v3301_v27, %v1076_v4 }
 0xf5f   :  { %1080 = vrot.lane.b32.xlu0 %v1078_v6, %s3622_s4 }
 0xfd1   :  { %v1081_v10 = vpop.permute.xlu0 %1080 }
 0xfd2   :  { %v1083_v11 = vadd.f32 %v1081_v10, %v1073_v7  ;;  %v3964_v7 = vld [vmem:[#allocation15 + $0x18] sm:$0xff]  ;;  %v3966_v10 = vld [vmem:[#allocation15 + $0x10] sm:$0xff] }
 0xfd4   :  { %3302 = vtanh.f32 %v1083_v11  ;;  %v1094_v13 = vrot.slane %v1083_v11, %v3814_v8  ;;  %v1584_v11 = vld [vmem:[#allocation11 + $0x1] sm:$0x1] }
 0xfe1   :  { %v3303_v12 = vpop.eup %3302 }
 0xfe2   :  { %1086 = vrot.lane.b32.xlu1 %v3303_v12, %s3622_s4  ;;  %v3970_v12 = vld [vmem:[#allocation15 + $0x8] sm:$0xff] }
 0xfe6   :  { %1095 = vrot.lane.b32.xlu1 %v1094_v13, %s3623_s7  ;;  %v3975_v13 = vld [vmem:[#allocation15] sm:$0xff] }
0x1054   :  { %v1087_v14 = vpop.permute.xlu1 %1086 }
0x1055   :  { %v1089_v15 = vmul.f32 %v3301_v27, %v1087_v14 }
0x1057   :  { %v1103_v5 = vrot.slane %v1089_v15, %v3814_v8  ;;  %v1581_v15 = vld [vmem:[#allocation9 + $0x1] sm:$0x1] }
0x1058   :  { %v1096_v16 = vpop.permute.xlu1 %1095 }
0x1059   :  { %1098 = vst.msk [vmem:[#allocation5] sm:$0x1] %vm351_vm1, %v1096_v16  ;;  %1104 = vrot.lane.b32.xlu0 %v1103_v5, %s3624_s14  ;;  %v1365_v16 = vld [vmem:[#allocation2 + $0x3] sm:$0x1] }
0x1060   :  { %v1111_v17 = vld [vmem:[#allocation5] sm:$0x1] }
0x1061   :  { %1196 = vrot.lane.b32.xlu1 %v1111_v17, %s3622_s4  ;;  %v1363_v17 = vld [vmem:[#allocation2 + $0x1] sm:$0x1] }
0x10cb   :  { %v1105_v18 = vpop.permute.xlu0 %1104 }
0x10cc   :  { %1107 = vst.msk [vmem:[#allocation4] sm:$0x1] %vm351_vm1, %v1105_v18  ;;  %1109 = vst.msk [vmem:[#allocation2 + $0x5] sm:$0x1] %vm351_vm1, %v1105_v18  ;;  %v1364_v18 = vld [vmem:[#allocation2 + $0x2] sm:$0x1] }
0x10d3   :  { %v1110_v19 = vld [vmem:[#allocation4] sm:$0x1]  ;;  %v1197_v35 = vpop.permute.xlu1 %1196 }
0x10d4   :  { %3114 = vmatmul.mubr.msk.f32.vlgmr.msra.gmra.mxu1 %vm358_vm2, %v1110_v19  ;;  %v1390_v19 = vcombine.low %v1364_v18, %v1365_v16 }
0x10d5   :  { %3135 = vmatprep.mubr.msk.f32.mxu1 %vm3620_vm0, %v3619_v1  ;;  %3128 = vmatpush3.msra.mxu1 %v1373_v0 }
0x10d6   :  { %3129 = vmatprep.subr.mxu1 %v3619_v1 }
0x10d7   :  { %3130 = vmatpush3.msra.mxu1 %v1372_v2 }
0x10d8   :  { %3131 = vmatprep.subr.mxu1 %v3619_v1 }
0x10d9   :  { %3132 = vmatpush3.msra.mxu1 %v1371_v21 }
0x10da   :  { %3133 = vmatprep.subr.mxu1 %v3619_v1 }
0x10db   :  { %3134 = vmatpush3.msra.mxu1 %v1370_v3 }
0x10dc   :  { %3149 = vmatprep.subr.mxu1 %v3619_v1 }
0x1194   :  { %v1183_v23 = vpop.f32.mrf.mxu1 }
0x1195   :  { %v1187_v24 = vadd.f32 %v1183_v23, %v1113_v22  ;;  %v1362_v22 = vld [vmem:[#allocation2] sm:$0x1]  ;;  %v1367_v23 = vld [vmem:[#allocation2 + $0x5] sm:$0x1] }
0x1196   :  { %v3115_v25 = vpop.f32.mrf.mxu1 }
0x1197   :  { %3304 = vtanh.f32 %v1187_v24  ;;  %v2912_v28 = vmul.f32 -1.442695, %v1187_v24  ;;  %v1389_v24 = vcombine.low %v1362_v22, %v1363_v17  ;;  %v1366_v25 = vld [vmem:[#allocation2 + $0x4] sm:$0x1] }
0x1199   :  { %3306 = vpow2.f32 %v2912_v28  ;;  %v1406_v28 = vrot.slane %v1390_v19, %v3743_v9 }
0x11a4   :  { %v3305_v26 = vpop.eup %3304 }
0x11a5   :  { %1201 = vrot.lane.b32.xlu0 %v3305_v26, %s3622_s4  ;;  %v1391_v26 = vcombine.low %v1366_v25, %v1367_v23 }
0x11a6   :  { %v3307_v29 = vpop.eup %3306 }
0x11a7   :  { %v1191_v31 = vadd.f32 1.0, %v3307_v29 }
0x11a9   :  { %3308 = vrcp.f32 %v1191_v31 }
0x11b6   :  { %v3309_v32 = vpop.eup %3308 }
0x11b7   :  { %v1199_v36 = vmul.f32 %v3309_v32, %v1197_v35  ;;  %v1413_v35 = vrot.slane %v1391_v26, %v3743_v9 }
0x1217   :  { %v1202_v33 = vpop.permute.xlu0 %1201 }
0x1218   :  { %v1204_v34 = vmul.f32 %v3309_v32, %v1202_v33  ;;  %v1399_v33 = vrot.slane %v1389_v24, %v3743_v9 }
0x121a   :  { %1206 = vrot.lane.b32.xlu0 %v1204_v34, %s3622_s4 }
0x128c   :  { %v1207_v37 = vpop.permute.xlu0 %1206 }
0x128d   :  { %v1209_v38 = vadd.f32 %v1207_v37, %v1199_v36  ;;  %v1421_v37 = vcombine.low %v1399_v33, %v1406_v28 }
0x128f   :  { %3310 = vtanh.f32 %v1209_v38  ;;  %v1220_v40 = vrot.slane %v1209_v38, %v3814_v8 }
0x129c   :  { %v3311_v39 = vpop.eup %3310 }
0x129d   :  { %1212 = vrot.lane.b32.xlu1 %v3311_v39, %s3622_s4  ;;  %v1429_v39 = vrot.slane %v1421_v37, %v3743_v9 }
0x12a1   :  { %1221 = vrot.lane.b32.xlu1 %v1220_v40, %s3623_s7 }
0x130f   :  { %v1213_v41 = vpop.permute.xlu1 %1212 }
0x1310   :  { %v1215_v42 = vmul.f32 %v3309_v32, %v1213_v41 }
0x1312   :  { %v1229_v43 = vrot.slane %v1215_v42, %v3814_v8 }
0x1313   :  { %v1222_v44 = vpop.permute.xlu1 %1221 }
0x1314   :  { %1224 = vst.msk [vmem:[#allocation5] sm:$0x1] %vm351_vm1, %v1222_v44  ;;  %1230 = vrot.lane.b32.xlu0 %v1229_v43, %s3624_s14  ;;  %v2915_v44 = vld [vmem:[#allocation17] ss:$0 sm:$0xff] }
0x131b   :  { %v1237_v45 = vld [vmem:[#allocation5] sm:$0x1] }
0x131c   :  { %1322 = vrot.lane.b32.xlu1 %v1237_v45, %s3622_s4 }
0x1386   :  { %v1231_v46 = vpop.permute.xlu0 %1230 }
0x1387   :  { %1233 = vst.msk [vmem:[#allocation4] sm:$0x1] %vm351_vm1, %v1231_v46  ;;  %1235 = vst.msk [vmem:[#allocation2 + $0x6] sm:$0x1] %vm351_vm1, %v1231_v46 }
0x138e   :  { %v1236_v47 = vld [vmem:[#allocation4] sm:$0x1]  ;;  %v1323_v59 = vpop.permute.xlu1 %1322  ;;  %v1368_v29 = vld [vmem:[#allocation2 + $0x6] sm:$0x1] }
0x138f   :  { %3125 = vmatmul.mubr.msk.f32.vlgmr.msra.gmra.mxu0 %vm358_vm2, %v1236_v47 }
0x1390   :  { %3146 = vmatprep.mubr.msk.f32.mxu0 %vm3620_vm0, %v3619_v1  ;;  %3139 = vmatpush3.msra.mxu0 %v3964_v7 }
0x1391   :  { %3140 = vmatprep.subr.mxu0 %v3619_v1 }
0x1392   :  { %3141 = vmatpush3.msra.mxu0 %v3966_v10 }
0x1393   :  { %3142 = vmatprep.subr.mxu0 %v3619_v1 }
0x1394   :  { %3143 = vmatpush3.msra.mxu0 %v3970_v12 }
0x1395   :  { %3144 = vmatprep.subr.mxu0 %v3619_v1 }
0x1396   :  { %3145 = vmatpush3.msra.mxu0 %v3975_v13 }
0x1397   :  { %3160 = vmatprep.subr.mxu0 %v3619_v1 }
0x144f   :  { %v1309_v49 = vpop.f32.mrf.mxu0 }
0x1450   :  { %v1313_v50 = vadd.f32 %v1309_v49, %v1239_v48 }
0x1451   :  { %v3126_v51 = vpop.f32.mrf.mxu0 }
0x1452   :  { %3312 = vtanh.f32 %v1313_v50  ;;  %v2914_v53 = vmul.f32 -1.442695, %v1313_v50 }
0x1454   :  { %3314 = vpow2.f32 %v2914_v53 }
0x145f   :  { %v3313_v52 = vpop.eup %3312 }
0x1460   :  { %1327 = vrot.lane.b32.xlu0 %v3313_v52, %s3622_s4 }
0x1461   :  { %v3315_v54 = vpop.eup %3314 }
0x1462   :  { %v1317_v55 = vadd.f32 1.0, %v3315_v54 }
0x1464   :  { %3316 = vrcp.f32 %v1317_v55 }
0x1471   :  { %v3317_v56 = vpop.eup %3316 }
0x1472   :  { %v1325_v60 = vmul.f32 %v3317_v56, %v1323_v59 }
0x14d2   :  { %v1328_v57 = vpop.permute.xlu0 %1327 }
0x14d3   :  { %v1330_v58 = vmul.f32 %v3317_v56, %v1328_v57 }
0x14d5   :  { %1332 = vrot.lane.b32.xlu0 %v1330_v58, %s3622_s4 }
0x1547   :  { %v1333_v61 = vpop.permute.xlu0 %1332 }
0x1548   :  { %v1335_v62 = vadd.f32 %v1333_v61, %v1325_v60 }
0x154a   :  { %3318 = vtanh.f32 %v1335_v62  ;;  %v1346_v63 = vrot.slane %v1335_v62, %v3814_v8 }
0x1557   :  { %v3319_v20 = vpop.eup %3318 }
0x1558   :  { %1338 = vrot.lane.b32.xlu1 %v3319_v20, %s3622_s4 }
0x155c   :  { %1347 = vrot.lane.b32.xlu1 %v1346_v63, %s3623_s7 }
0x15ca   :  { %v1339_v27 = vpop.permute.xlu1 %1338 }
0x15cb   :  { %v1341_v4 = vmul.f32 %v3317_v56, %v1339_v27 }
0x15cd   :  { %v1355_v6 = vrot.slane %v1341_v4, %v3814_v8 }
0x15ce   :  { %v1348_v30 = vpop.permute.xlu1 %1347 }
0x15cf   :  { %1350 = vst.msk [vmem:[#allocation5] sm:$0x1] %vm351_vm1, %v1348_v30  ;;  %1356 = vrot.lane.b32.xlu0 %v1355_v6, %s3624_s14 }
0x15d0   :  { %1585 = vst.msk [vmem:[#allocation5] sm:$0x1] %vm351_vm1, %v1584_v11 }
0x15d7   :  { %v1587_v14 = vld [vmem:[#allocation5] sm:$0x1] }
0x15d8   :  { %1671 = vrot.lane.b32.xlu1 %v1587_v14, %s3622_s4 }
0x1641   :  { %v1357_v5 = vpop.permute.xlu0 %1356 }
0x1642   :  { %1359 = vst.msk [vmem:[#allocation4] sm:$0x1] %vm351_vm1, %v1357_v5  ;;  %1361 = vst.msk [vmem:[#allocation2 + $0x7] sm:$0x1] %vm351_vm1, %v1357_v5 }
0x1643   :  { %1582 = vst.msk [vmem:[#allocation4] sm:$0x1] %vm351_vm1, %v1581_v15 }
0x1649   :  { %v1369_v31 = vld [vmem:[#allocation2 + $0x7] sm:$0x1] }
0x164a   :  { %v1392_v32 = vcombine.low %v1368_v29, %v1369_v31  ;;  %v1586_v34 = vld [vmem:[#allocation4] sm:$0x1]  ;;  %v1672_v4 = vpop.permute.xlu1 %1671 }
0x164b   :  { %3147 = vmatmul.mubr.msk.f32.vlgmr.msra.gmra.mxu0 %vm358_vm2, %v1586_v34 }
0x164c   :  { %v1420_v36 = vrot.slane %v1392_v32, %v3743_v9  ;;  %3161 = vmatpush3.msra.mxu0 %v3964_v7  ;;  %3168 = vmatprep.mubr.msk.f32.mxu0 %vm3620_vm0, %v3619_v1 }
0x164d   :  { %3162 = vmatprep.subr.mxu0 %v3619_v1 }
0x164e   :  { %v1422_v38 = vcombine.low %v1413_v35, %v1420_v36  ;;  %3163 = vmatpush3.msra.mxu0 %v3966_v10 }
0x164f   :  { %3164 = vmatprep.subr.mxu0 %v3619_v1 }
0x1650   :  { %v1436_v40 = vrot.slane %v1422_v38, %v3743_v9  ;;  %3165 = vmatpush3.msra.mxu0 %v3970_v12 }
0x1651   :  { %3166 = vmatprep.subr.mxu0 %v3619_v1 }
0x1652   :  { %v1437_v41 = vcombine.low %v1429_v39, %v1436_v40  ;;  %3167 = vmatpush3.msra.mxu0 %v3975_v13 }
0x1653   :  { %3182 = vmatprep.subr.mxu0 %v3619_v1 }
0x1654   :  { %3136 = vmatmul.mubr.msk.f32.vlgmr.msra.gmra.mxu1 %vm358_vm2, %v1437_v41 }
0x1655   :  { %3150 = vmatpush3.msra.mxu1 %v3964_v7  ;;  %3157 = vmatprep.mubr.msk.f32.mxu1 %vm3620_vm0, %v3619_v1 }
0x1656   :  { %3151 = vmatprep.subr.mxu1 %v3619_v1 }
0x1657   :  { %3152 = vmatpush3.msra.mxu1 %v3966_v10 }
0x1658   :  { %3153 = vmatprep.subr.mxu1 %v3619_v1 }
0x1659   :  { %3154 = vmatpush3.msra.mxu1 %v3970_v12 }
0x165a   :  { %3155 = vmatprep.subr.mxu1 %v3619_v1 }
0x165b   :  { %3156 = vmatpush3.msra.mxu1 %v3975_v13 }
0x165c   :  { %3171 = vmatprep.subr.mxu1 %v3619_v1 }
0x170b   :  { %v1658_v42 = vpop.f32.mrf.mxu0 }
0x170d   :  { %v3148_v43 = vpop.f32.mrf.mxu0 }
0x1714   :  { %v1506_v45 = vpop.f32.mrf.mxu1 }
0x1715   :  { %v1507_v46 = vadd.f32 %v2915_v44, %v1506_v45 }
0x1716   :  { %v3137_v47 = vpop.f32.mrf.mxu1 }
0x1717   :  { %v1511_v48 = vcombine.high %v1507_v46, %v1507_v46  ;;  %v1518_v49 = vrot.slane %v1507_v46, %v3743_v9 }
0x1719   :  { %v1525_v50 = vrot.slane %v1511_v48, %v3743_v9  ;;  %v1526_v51 = vcombine.high %v1518_v49, %v1518_v49  ;;  %v1534_v52 = vrot.slane %v1518_v49, %v3743_v9  ;;  %2917 = vst.sshfl [vmem:[#allocation3] sm:$0x1 pattern:$0x73625140] %v1518_v49 }
0x171b   :  { %v1527_v53 = vcombine.high %v1525_v50, %v1525_v50  ;;  %v1541_v54 = vrot.slane %v1525_v50, %v3743_v9  ;;  %v1548_v55 = vrot.slane %v1526_v51, %v3743_v9  ;;  %v1556_v56 = vcombine.high %v1534_v52, %v1534_v52  ;;  %2918 = vst.sshfl [vmem:[#allocation3 + $0x1] sm:$0x1 pattern:$0x73625140] %v1526_v51 }
0x171c   :  { %2919 = vst.sshfl [vmem:[#allocation3 + $0x4] sm:$0x1 pattern:$0x73625140] %v1525_v50 }
0x171d   :  { %v1555_v57 = vrot.slane %v1527_v53, %v3743_v9  ;;  %v1557_v58 = vcombine.high %v1541_v54, %v1541_v54  ;;  %v1558_v59 = vcombine.high %v1548_v55, %v1548_v55  ;;  %1570 = vst [vmem:[#allocation3 + $0x2] sm:$0x1] %v1556_v56  ;;  %2920 = vst.sshfl [vmem:[#allocation3 + $0x5] sm:$0x1 pattern:$0x73625140] %v1527_v53 }
0x171f   :  { %v1559_v60 = vcombine.high %v1555_v57, %v1555_v57  ;;  %1571 = vst [vmem:[#allocation3 + $0x3] sm:$0x1] %v1558_v59  ;;  %1574 = vst [vmem:[#allocation3 + $0x6] sm:$0x1] %v1557_v58 }
0x1720   :  { %v1588_v61 = vld [vmem:[#allocation3] sm:$0x1] }
0x1721   :  { %1575 = vst [vmem:[#allocation3 + $0x7] sm:$0x1] %v1559_v60  ;;  %v1662_v62 = vadd.f32 %v1658_v42, %v1588_v61 }
0x1722   :  { %v1712_v24 = vld [vmem:[#allocation3 + $0x1] sm:$0x1] }
0x1723   :  { %3320 = vtanh.f32 %v1662_v62  ;;  %v2922_v63 = vmul.f32 -1.442695, %v1662_v62 }
0x1724   :  { %v1836_v50 = vld [vmem:[#allocation3 + $0x2] sm:$0x1] }
0x1725   :  { %3322 = vpow2.f32 %v2922_v63 }
0x1730   :  { %v3321_v20 = vpop.eup %3320 }
0x1731   :  { %1676 = vrot.lane.b32.xlu0 %v3321_v20, %s3622_s4 }
0x1732   :  { %v3323_v0 = vpop.eup %3322 }
0x1733   :  { %v1666_v2 = vadd.f32 1.0, %v3323_v0 }
0x1735   :  { %3324 = vrcp.f32 %v1666_v2 }
0x1742   :  { %v3325_v21 = vpop.eup %3324 }
0x1743   :  { %v1674_v6 = vmul.f32 %v3325_v21, %v1672_v4 }
0x17a3   :  { %v1677_v3 = vpop.permute.xlu0 %1676 }
0x17a4   :  { %v1679_v27 = vmul.f32 %v3325_v21, %v1677_v3 }
0x17a6   :  { %1681 = vrot.lane.b32.xlu0 %v1679_v27, %s3622_s4 }
0x1818   :  { %v1682_v30 = vpop.permute.xlu0 %1681 }
0x1819   :  { %v1684_v11 = vadd.f32 %v1682_v30, %v1674_v6 }
0x181b   :  { %3326 = vtanh.f32 %v1684_v11  ;;  %v1695_v15 = vrot.slane %v1684_v11, %v3814_v8 }
0x1828   :  { %v3327_v14 = vpop.eup %3326 }
0x1829   :  { %1687 = vrot.lane.b32.xlu1 %v3327_v14, %s3622_s4  ;;  %v1960_v14 = vld [vmem:[#allocation3 + $0x3] sm:$0x1] }
0x182d   :  { %1696 = vrot.lane.b32.xlu1 %v1695_v15, %s3623_s7 }
0x189b   :  { %v1688_v5 = vpop.permute.xlu1 %1687 }
0x189c   :  { %v1690_v16 = vmul.f32 %v3325_v21, %v1688_v5 }
0x189e   :  { %v1704_v17 = vrot.slane %v1690_v16, %v3814_v8 }
0x189f   :  { %v1697_v18 = vpop.permute.xlu1 %1696 }
0x18a0   :  { %1699 = vst.msk [vmem:[#allocation5] sm:$0x1] %vm351_vm1, %v1697_v18  ;;  %1705 = vrot.lane.b32.xlu0 %v1704_v17, %s3624_s14 }
0x18a7   :  { %v1711_v19 = vld [vmem:[#allocation5] sm:$0x1] }
0x18a8   :  { %1795 = vrot.lane.b32.xlu1 %v1711_v19, %s3622_s4 }
0x1912   :  { %v1706_v22 = vpop.permute.xlu0 %1705 }
0x1913   :  { %1708 = vst.msk [vmem:[#allocation4] sm:$0x1] %vm351_vm1, %v1706_v22  ;;  %1709 = vst.msk [vmem:[#allocation2] sm:$0x1] %vm351_vm1, %v1706_v22 }
0x191a   :  { %v1710_v23 = vld [vmem:[#allocation4] sm:$0x1]  ;;  %v1796_v37 = vpop.permute.xlu1 %1795 }
0x191b   :  { %3158 = vmatmul.mubr.msk.f32.vlgmr.msra.gmra.mxu1 %vm358_vm2, %v1710_v23 }
0x191c   :  { %3172 = vmatpush3.msra.mxu1 %v3964_v7  ;;  %3179 = vmatprep.mubr.msk.f32.mxu1 %vm3620_vm0, %v3619_v1 }
0x191d   :  { %3173 = vmatprep.subr.mxu1 %v3619_v1 }
0x191e   :  { %3174 = vmatpush3.msra.mxu1 %v3966_v10 }
0x191f   :  { %3175 = vmatprep.subr.mxu1 %v3619_v1 }
0x1920   :  { %3176 = vmatpush3.msra.mxu1 %v3970_v12 }
0x1921   :  { %3177 = vmatprep.subr.mxu1 %v3619_v1 }
0x1922   :  { %3178 = vmatpush3.msra.mxu1 %v3975_v13 }
0x1923   :  { %3193 = vmatprep.subr.mxu1 %v3619_v1 }
0x19db   :  { %v1782_v25 = vpop.f32.mrf.mxu1 }
0x19dc   :  { %v1786_v26 = vadd.f32 %v1782_v25, %v1712_v24 }
0x19dd   :  { %v3159_v28 = vpop.f32.mrf.mxu1 }
0x19de   :  { %3328 = vtanh.f32 %v1786_v26  ;;  %v2924_v31 = vmul.f32 -1.442695, %v1786_v26 }
0x19e0   :  { %3330 = vpow2.f32 %v2924_v31 }
0x19eb   :  { %v3329_v29 = vpop.eup %3328 }
0x19ec   :  { %1800 = vrot.lane.b32.xlu0 %v3329_v29, %s3622_s4 }
0x19ed   :  { %v3331_v32 = vpop.eup %3330 }
0x19ee   :  { %v1790_v33 = vadd.f32 1.0, %v3331_v32 }
0x19f0   :  { %3332 = vrcp.f32 %v1790_v33 }
0x19fd   :  { %v3333_v34 = vpop.eup %3332 }
0x19fe   :  { %v1798_v38 = vmul.f32 %v3333_v34, %v1796_v37 }
0x1a5e   :  { %v1801_v35 = vpop.permute.xlu0 %1800 }
0x1a5f   :  { %v1803_v36 = vmul.f32 %v3333_v34, %v1801_v35 }
0x1a61   :  { %1805 = vrot.lane.b32.xlu0 %v1803_v36, %s3622_s4 }
0x1ad3   :  { %v1806_v39 = vpop.permute.xlu0 %1805 }
0x1ad4   :  { %v1808_v40 = vadd.f32 %v1806_v39, %v1798_v38 }
0x1ad6   :  { %3334 = vtanh.f32 %v1808_v40  ;;  %v1819_v42 = vrot.slane %v1808_v40, %v3814_v8 }
0x1ae3   :  { %v3335_v41 = vpop.eup %3334 }
0x1ae4   :  { %1811 = vrot.lane.b32.xlu1 %v3335_v41, %s3622_s4  ;;  %v2084_v41 = vld [vmem:[#allocation3 + $0x4] sm:$0x1] }
0x1ae8   :  { %1820 = vrot.lane.b32.xlu1 %v1819_v42, %s3623_s7 }
0x1b56   :  { %v1812_v43 = vpop.permute.xlu1 %1811 }
0x1b57   :  { %v1814_v44 = vmul.f32 %v3333_v34, %v1812_v43 }
0x1b59   :  { %v1828_v45 = vrot.slane %v1814_v44, %v3814_v8 }
0x1b5a   :  { %v1821_v46 = vpop.permute.xlu1 %1820 }
0x1b5b   :  { %1823 = vst.msk [vmem:[#allocation5] sm:$0x1] %vm351_vm1, %v1821_v46  ;;  %1829 = vrot.lane.b32.xlu0 %v1828_v45, %s3624_s14 }
0x1b62   :  { %v1835_v47 = vld [vmem:[#allocation5] sm:$0x1] }
0x1b63   :  { %1919 = vrot.lane.b32.xlu1 %v1835_v47, %s3622_s4 }
0x1bcd   :  { %v1830_v48 = vpop.permute.xlu0 %1829 }
0x1bce   :  { %1833 = vst.msk [vmem:[#allocation2 + $0x1] sm:$0x1] %vm351_vm1, %v1830_v48  ;;  %1832 = vst.msk [vmem:[#allocation4] sm:$0x1] %vm351_vm1, %v1830_v48 }
0x1bd5   :  { %v1834_v49 = vld [vmem:[#allocation4] sm:$0x1]  ;;  %v1920_v61 = vpop.permute.xlu1 %1919 }
0x1bd6   :  { %3169 = vmatmul.mubr.msk.f32.vlgmr.msra.gmra.mxu0 %vm358_vm2, %v1834_v49 }
0x1bd7   :  { %3183 = vmatpush3.msra.mxu0 %v3964_v7  ;;  %3190 = vmatprep.mubr.msk.f32.mxu0 %vm3620_vm0, %v3619_v1 }
0x1bd8   :  { %3184 = vmatprep.subr.mxu0 %v3619_v1 }
0x1bd9   :  { %3185 = vmatpush3.msra.mxu0 %v3966_v10 }
0x1bda   :  { %3186 = vmatprep.subr.mxu0 %v3619_v1 }
0x1bdb   :  { %3187 = vmatpush3.msra.mxu0 %v3970_v12 }
0x1bdc   :  { %3188 = vmatprep.subr.mxu0 %v3619_v1 }
0x1bdd   :  { %3189 = vmatpush3.msra.mxu0 %v3975_v13 }
0x1bde   :  { %3204 = vmatprep.subr.mxu0 %v3619_v1 }
0x1c96   :  { %v1906_v51 = vpop.f32.mrf.mxu0 }
0x1c97   :  { %v1910_v52 = vadd.f32 %v1906_v51, %v1836_v50 }
0x1c98   :  { %v3170_v53 = vpop.f32.mrf.mxu0 }
0x1c99   :  { %3336 = vtanh.f32 %v1910_v52  ;;  %v2926_v55 = vmul.f32 -1.442695, %v1910_v52 }
0x1c9b   :  { %3338 = vpow2.f32 %v2926_v55 }
0x1ca6   :  { %v3337_v54 = vpop.eup %3336 }
0x1ca7   :  { %1924 = vrot.lane.b32.xlu0 %v3337_v54, %s3622_s4 }
0x1ca8   :  { %v3339_v56 = vpop.eup %3338 }
0x1ca9   :  { %v1914_v57 = vadd.f32 1.0, %v3339_v56 }
0x1cab   :  { %3340 = vrcp.f32 %v1914_v57 }
0x1cb8   :  { %v3341_v58 = vpop.eup %3340 }
0x1cb9   :  { %v1922_v62 = vmul.f32 %v3341_v58, %v1920_v61 }
0x1d19   :  { %v1925_v59 = vpop.permute.xlu0 %1924 }
0x1d1a   :  { %v1927_v60 = vmul.f32 %v3341_v58, %v1925_v59 }
0x1d1c   :  { %1929 = vrot.lane.b32.xlu0 %v1927_v60, %s3622_s4 }
0x1d8e   :  { %v1930_v20 = vpop.permute.xlu0 %1929 }
0x1d8f   :  { %v1932_v63 = vadd.f32 %v1930_v20, %v1922_v62 }
0x1d91   :  { %3342 = vtanh.f32 %v1932_v63  ;;  %v1943_v2 = vrot.slane %v1932_v63, %v3814_v8 }
0x1d9e   :  { %v3343_v0 = vpop.eup %3342 }
0x1d9f   :  { %1935 = vrot.lane.b32.xlu1 %v3343_v0, %s3622_s4  ;;  %v2208_v0 = vld [vmem:[#allocation3 + $0x5] sm:$0x1] }
0x1da3   :  { %1944 = vrot.lane.b32.xlu1 %v1943_v2, %s3623_s7 }
0x1e11   :  { %v1936_v21 = vpop.permute.xlu1 %1935 }
0x1e12   :  { %v1938_v3 = vmul.f32 %v3341_v58, %v1936_v21 }
0x1e14   :  { %v1952_v27 = vrot.slane %v1938_v3, %v3814_v8 }
0x1e15   :  { %v1945_v4 = vpop.permute.xlu1 %1944 }
0x1e16   :  { %1947 = vst.msk [vmem:[#allocation5] sm:$0x1] %vm351_vm1, %v1945_v4  ;;  %1953 = vrot.lane.b32.xlu0 %v1952_v27, %s3624_s14 }
0x1e1d   :  { %v1959_v6 = vld [vmem:[#allocation5] sm:$0x1] }
0x1e1e   :  { %2043 = vrot.lane.b32.xlu1 %v1959_v6, %s3622_s4 }
0x1e88   :  { %v1954_v30 = vpop.permute.xlu0 %1953 }
0x1e89   :  { %1957 = vst.msk [vmem:[#allocation2 + $0x2] sm:$0x1] %vm351_vm1, %v1954_v30  ;;  %1956 = vst.msk [vmem:[#allocation4] sm:$0x1] %vm351_vm1, %v1954_v30 }
0x1e90   :  { %v1958_v11 = vld [vmem:[#allocation4] sm:$0x1]  ;;  %v2044_v26 = vpop.permute.xlu1 %2043 }
0x1e91   :  { %3180 = vmatmul.mubr.msk.f32.vlgmr.msra.gmra.mxu1 %vm358_vm2, %v1958_v11 }
0x1e92   :  { %3194 = vmatpush3.msra.mxu1 %v3964_v7  ;;  %3201 = vmatprep.mubr.msk.f32.mxu1 %vm3620_vm0, %v3619_v1 }
0x1e93   :  { %3195 = vmatprep.subr.mxu1 %v3619_v1 }
0x1e94   :  { %3196 = vmatpush3.msra.mxu1 %v3966_v10 }
0x1e95   :  { %3197 = vmatprep.subr.mxu1 %v3619_v1 }
0x1e96   :  { %3198 = vmatpush3.msra.mxu1 %v3970_v12 }
0x1e97   :  { %3199 = vmatprep.subr.mxu1 %v3619_v1 }
0x1e98   :  { %3200 = vmatpush3.msra.mxu1 %v3975_v13 }
0x1e99   :  { %3215 = vmatprep.subr.mxu1 %v3619_v1 }
0x1f51   :  { %v2030_v15 = vpop.f32.mrf.mxu1 }
0x1f52   :  { %v2034_v5 = vadd.f32 %v2030_v15, %v1960_v14 }
0x1f53   :  { %v3181_v16 = vpop.f32.mrf.mxu1 }
0x1f54   :  { %3344 = vtanh.f32 %v2034_v5  ;;  %v2928_v18 = vmul.f32 -1.442695, %v2034_v5 }
0x1f56   :  { %3346 = vpow2.f32 %v2928_v18 }
0x1f61   :  { %v3345_v17 = vpop.eup %3344 }
0x1f62   :  { %2048 = vrot.lane.b32.xlu0 %v3345_v17, %s3622_s4 }
0x1f63   :  { %v3347_v19 = vpop.eup %3346 }
0x1f64   :  { %v2038_v22 = vadd.f32 1.0, %v3347_v19 }
0x1f66   :  { %3348 = vrcp.f32 %v2038_v22 }
0x1f73   :  { %v3349_v23 = vpop.eup %3348 }
0x1f74   :  { %v2046_v28 = vmul.f32 %v3349_v23, %v2044_v26  ;;  %v2332_v26 = vld [vmem:[#allocation3 + $0x6] sm:$0x1] }
0x1fd4   :  { %v2049_v24 = vpop.permute.xlu0 %2048 }
0x1fd5   :  { %v2051_v25 = vmul.f32 %v3349_v23, %v2049_v24 }
0x1fd7   :  { %2053 = vrot.lane.b32.xlu0 %v2051_v25, %s3622_s4 }
0x2049   :  { %v2054_v29 = vpop.permute.xlu0 %2053 }
0x204a   :  { %v2056_v31 = vadd.f32 %v2054_v29, %v2046_v28 }
0x204c   :  { %3350 = vtanh.f32 %v2056_v31  ;;  %v2067_v33 = vrot.slane %v2056_v31, %v3814_v8 }
0x2059   :  { %v3351_v32 = vpop.eup %3350 }
0x205a   :  { %2059 = vrot.lane.b32.xlu1 %v3351_v32, %s3622_s4 }
0x205e   :  { %2068 = vrot.lane.b32.xlu1 %v2067_v33, %s3623_s7 }
0x20cc   :  { %v2060_v34 = vpop.permute.xlu1 %2059 }
0x20cd   :  { %v2062_v35 = vmul.f32 %v3349_v23, %v2060_v34 }
0x20cf   :  { %v2076_v36 = vrot.slane %v2062_v35, %v3814_v8 }
0x20d0   :  { %v2069_v37 = vpop.permute.xlu1 %2068 }
0x20d1   :  { %2071 = vst.msk [vmem:[#allocation5] sm:$0x1] %vm351_vm1, %v2069_v37  ;;  %2077 = vrot.lane.b32.xlu0 %v2076_v36, %s3624_s14 }
0x20d8   :  { %v2083_v38 = vld [vmem:[#allocation5] sm:$0x1] }
0x20d9   :  { %2167 = vrot.lane.b32.xlu1 %v2083_v38, %s3622_s4 }
0x2143   :  { %v2078_v39 = vpop.permute.xlu0 %2077 }
0x2144   :  { %2081 = vst.msk [vmem:[#allocation2 + $0x3] sm:$0x1] %vm351_vm1, %v2078_v39  ;;  %2080 = vst.msk [vmem:[#allocation4] sm:$0x1] %vm351_vm1, %v2078_v39 }
0x214b   :  { %v2082_v40 = vld [vmem:[#allocation4] sm:$0x1]  ;;  %v2168_v52 = vpop.permute.xlu1 %2167 }
0x214c   :  { %3191 = vmatmul.mubr.msk.f32.vlgmr.msra.gmra.mxu0 %vm358_vm2, %v2082_v40 }
0x214d   :  { %3205 = vmatpush3.msra.mxu0 %v3964_v7  ;;  %3212 = vmatprep.mubr.msk.f32.mxu0 %vm3620_vm0, %v3619_v1 }
0x214e   :  { %3206 = vmatprep.subr.mxu0 %v3619_v1 }
0x214f   :  { %3207 = vmatpush3.msra.mxu0 %v3966_v10 }
0x2150   :  { %3208 = vmatprep.subr.mxu0 %v3619_v1 }
0x2151   :  { %3209 = vmatpush3.msra.mxu0 %v3970_v12 }
0x2152   :  { %3210 = vmatprep.subr.mxu0 %v3619_v1 }
0x2153   :  { %3211 = vmatpush3.msra.mxu0 %v3975_v13 }
0x2154   :  { %3226 = vmatprep.subr.mxu0 %v3619_v1 }
0x220c   :  { %v2154_v42 = vpop.f32.mrf.mxu0 }
0x220d   :  { %v2158_v43 = vadd.f32 %v2154_v42, %v2084_v41 }
0x220e   :  { %v3192_v44 = vpop.f32.mrf.mxu0 }
0x220f   :  { %3352 = vtanh.f32 %v2158_v43  ;;  %v2930_v46 = vmul.f32 -1.442695, %v2158_v43 }
0x2211   :  { %3354 = vpow2.f32 %v2930_v46 }
0x221c   :  { %v3353_v45 = vpop.eup %3352 }
0x221d   :  { %2172 = vrot.lane.b32.xlu0 %v3353_v45, %s3622_s4 }
0x221e   :  { %v3355_v47 = vpop.eup %3354 }
0x221f   :  { %v2162_v48 = vadd.f32 1.0, %v3355_v47 }
0x2221   :  { %3356 = vrcp.f32 %v2162_v48 }
0x222e   :  { %v3357_v49 = vpop.eup %3356 }
0x222f   :  { %v2170_v53 = vmul.f32 %v3357_v49, %v2168_v52  ;;  %v2456_v52 = vld [vmem:[#allocation3 + $0x7] sm:$0x1] }
0x228f   :  { %v2173_v50 = vpop.permute.xlu0 %2172 }
0x2290   :  { %v2175_v51 = vmul.f32 %v3357_v49, %v2173_v50 }
0x2292   :  { %2177 = vrot.lane.b32.xlu0 %v2175_v51, %s3622_s4 }
0x2304   :  { %v2178_v54 = vpop.permute.xlu0 %2177 }
0x2305   :  { %v2180_v55 = vadd.f32 %v2178_v54, %v2170_v53 }
0x2307   :  { %3358 = vtanh.f32 %v2180_v55  ;;  %v2191_v57 = vrot.slane %v2180_v55, %v3814_v8 }
0x2314   :  { %v3359_v56 = vpop.eup %3358 }
0x2315   :  { %2183 = vrot.lane.b32.xlu1 %v3359_v56, %s3622_s4 }
0x2319   :  { %2192 = vrot.lane.b32.xlu1 %v2191_v57, %s3623_s7 }
0x2387   :  { %v2184_v58 = vpop.permute.xlu1 %2183 }
0x2388   :  { %v2186_v59 = vmul.f32 %v3357_v49, %v2184_v58 }
0x238a   :  { %v2200_v60 = vrot.slane %v2186_v59, %v3814_v8 }
0x238b   :  { %v2193_v61 = vpop.permute.xlu1 %2192 }
0x238c   :  { %2195 = vst.msk [vmem:[#allocation5] sm:$0x1] %vm351_vm1, %v2193_v61  ;;  %2201 = vrot.lane.b32.xlu0 %v2200_v60, %s3624_s14 }
0x2393   :  { %v2207_v62 = vld [vmem:[#allocation5] sm:$0x1] }
0x2394   :  { %2291 = vrot.lane.b32.xlu1 %v2207_v62, %s3622_s4 }
0x23fe   :  { %v2202_v20 = vpop.permute.xlu0 %2201 }
0x23ff   :  { %2205 = vst.msk [vmem:[#allocation2 + $0x4] sm:$0x1] %vm351_vm1, %v2202_v20  ;;  %2204 = vst.msk [vmem:[#allocation4] sm:$0x1] %vm351_vm1, %v2202_v20 }
0x2406   :  { %v2206_v63 = vld [vmem:[#allocation4] sm:$0x1]  ;;  %v2292_v11 = vpop.permute.xlu1 %2291 }
0x2407   :  { %3202 = vmatmul.mubr.msk.f32.vlgmr.msra.gmra.mxu1 %vm358_vm2, %v2206_v63 }
0x2408   :  { %3216 = vmatpush3.msra.mxu1 %v3964_v7  ;;  %3223 = vmatprep.mubr.msk.f32.mxu1 %vm3620_vm0, %v3619_v1 }
0x2409   :  { %3217 = vmatprep.subr.mxu1 %v3619_v1 }
0x240a   :  { %3218 = vmatpush3.msra.mxu1 %v3966_v10 }
0x240b   :  { %3219 = vmatprep.subr.mxu1 %v3619_v1 }
0x240c   :  { %3220 = vmatpush3.msra.mxu1 %v3970_v12 }
0x240d   :  { %3221 = vmatprep.subr.mxu1 %v3619_v1 }
0x240e   :  { %3222 = vmatpush3.msra.mxu1 %v3975_v13 }
0x24c7   :  { %v2278_v2 = vpop.f32.mrf.mxu1 }
0x24c8   :  { %v2282_v21 = vadd.f32 %v2278_v2, %v2208_v0 }
0x24c9   :  { %v3203_v3 = vpop.f32.mrf.mxu1 }
0x24ca   :  { %3360 = vtanh.f32 %v2282_v21  ;;  %v2932_v27 = vmul.f32 -1.442695, %v2282_v21 }
0x24cc   :  { %3362 = vpow2.f32 %v2932_v27  ;;  %v2588_v27 = vld [vmem:[%s4264_s9 + $0x10] sm:$0xff] }
0x24d7   :  { %v3361_v7 = vpop.eup %3360 }
0x24d8   :  { %2296 = vrot.lane.b32.xlu0 %v3361_v7, %s3622_s4  ;;  %v2589_v7 = vld [vmem:[%s4264_s9 + $0x18] sm:$0xff] }
0x24d9   :  { %v3363_v4 = vpop.eup %3362 }
0x24da   :  { %v2286_v10 = vadd.f32 1.0, %v3363_v4  ;;  %v2587_v4 = vld [vmem:[%s4264_s9 + $0x8] sm:$0xff] }
0x24dc   :  { %3364 = vrcp.f32 %v2286_v10  ;;  %v2586_v10 = vld [vmem:[%s4264_s9] sm:$0xff] }
0x24e9   :  { %v3365_v6 = vpop.eup %3364 }
0x24ea   :  { %v2294_v13 = vmul.f32 %v3365_v6, %v2292_v11 }
0x254a   :  { %v2297_v30 = vpop.permute.xlu0 %2296 }
0x254b   :  { %v2299_v12 = vmul.f32 %v3365_v6, %v2297_v30 }
0x254d   :  { %2301 = vrot.lane.b32.xlu0 %v2299_v12, %s3622_s4 }
0x25bf   :  { %v2302_v14 = vpop.permute.xlu0 %2301 }
0x25c0   :  { %v2304_v15 = vadd.f32 %v2302_v14, %v2294_v13  ;;  %v2581_v14 = vld [vmem:[#allocation2 + $0x3] sm:$0x1] }
0x25c2   :  { %3366 = vtanh.f32 %v2304_v15  ;;  %v2315_v16 = vrot.slane %v2304_v15, %v3814_v8  ;;  %v2579_v15 = vld [vmem:[#allocation2 + $0x1] sm:$0x1] }
0x25cf   :  { %v3367_v5 = vpop.eup %3366 }
0x25d0   :  { %2307 = vrot.lane.b32.xlu1 %v3367_v5, %s3622_s4  ;;  %v2580_v5 = vld [vmem:[#allocation2 + $0x2] sm:$0x1] }
0x25d4   :  { %2316 = vrot.lane.b32.xlu1 %v2315_v16, %s3623_s7  ;;  %v2606_v16 = vcombine.low %v2580_v5, %v2581_v14 }
0x2642   :  { %v2308_v17 = vpop.permute.xlu1 %2307 }
0x2643   :  { %v2310_v18 = vmul.f32 %v3365_v6, %v2308_v17 }
0x2645   :  { %v2324_v19 = vrot.slane %v2310_v18, %v3814_v8 }
0x2646   :  { %v2317_v22 = vpop.permute.xlu1 %2316 }
0x2647   :  { %2319 = vst.msk [vmem:[#allocation5] sm:$0x1] %vm351_vm1, %v2317_v22  ;;  %2325 = vrot.lane.b32.xlu0 %v2324_v19, %s3624_s14  ;;  %v2582_v19 = vld [vmem:[#allocation2 + $0x4] sm:$0x1] }
0x264e   :  { %v2331_v23 = vld [vmem:[#allocation5] sm:$0x1] }
0x264f   :  { %2415 = vrot.lane.b32.xlu1 %v2331_v23, %s3622_s4 }
0x26b9   :  { %v2326_v24 = vpop.permute.xlu0 %2325 }
0x26ba   :  { %2329 = vst.msk [vmem:[#allocation2 + $0x5] sm:$0x1] %vm351_vm1, %v2326_v24  ;;  %2328 = vst.msk [vmem:[#allocation4] sm:$0x1] %vm351_vm1, %v2326_v24 }
0x26c1   :  { %v2330_v25 = vld [vmem:[#allocation4] sm:$0x1]  ;;  %v2416_v39 = vpop.permute.xlu1 %2415  ;;  %v2583_v17 = vld [vmem:[#allocation2 + $0x5] sm:$0x1] }
0x26c2   :  { %3213 = vmatmul.mubr.msk.f32.vlgmr.msra.gmra.mxu0 %vm358_vm2, %v2330_v25  ;;  %v2607_v22 = vcombine.low %v2582_v19, %v2583_v17 }
0x26c3   :  { %3234 = vmatprep.mubr.msk.f32.mxu0 %vm3620_vm0, %v3619_v1  ;;  %3227 = vmatpush3.msra.mxu0 %v2589_v7 }
0x26c4   :  { %3228 = vmatprep.subr.mxu0 %v3619_v1 }
0x26c5   :  { %3229 = vmatpush3.msra.mxu0 %v2588_v27 }
0x26c6   :  { %3230 = vmatprep.subr.mxu0 %v3619_v1 }
0x26c7   :  { %3231 = vmatpush3.msra.mxu0 %v2587_v4 }
0x26c8   :  { %3232 = vmatprep.subr.mxu0 %v3619_v1  ;;  %v2578_v1 = vld [vmem:[#allocation2] sm:$0x1] }
0x26c9   :  { %3233 = vmatpush3.msra.mxu0 %v2586_v10  ;;  %v2605_v18 = vcombine.low %v2578_v1, %v2579_v15 }
0x2782   :  { %v2402_v28 = vpop.f32.mrf.mxu0 }
0x2783   :  { %v2406_v29 = vadd.f32 %v2402_v28, %v2332_v26  ;;  %v2615_v26 = vrot.slane %v2605_v18, %v3743_v9  ;;  %v2629_v28 = vrot.slane %v2607_v22, %v3743_v9 }
0x2784   :  { %v3214_v31 = vpop.f32.mrf.mxu0 }
0x2785   :  { %3368 = vtanh.f32 %v2406_v29  ;;  %v2934_v33 = vmul.f32 -1.442695, %v2406_v29 }
0x2787   :  { %3370 = vpow2.f32 %v2934_v33 }
0x2792   :  { %v3369_v32 = vpop.eup %3368 }
0x2793   :  { %2420 = vrot.lane.b32.xlu0 %v3369_v32, %s3622_s4 }
0x2794   :  { %v3371_v34 = vpop.eup %3370 }
0x2795   :  { %v2410_v35 = vadd.f32 1.0, %v3371_v34 }
0x2797   :  { %3372 = vrcp.f32 %v2410_v35 }
0x27a4   :  { %v3373_v36 = vpop.eup %3372 }
0x27a5   :  { %v2418_v40 = vmul.f32 %v3373_v36, %v2416_v39 }
0x2805   :  { %v2421_v37 = vpop.permute.xlu0 %2420 }
0x2806   :  { %v2423_v38 = vmul.f32 %v3373_v36, %v2421_v37 }
0x2808   :  { %2425 = vrot.lane.b32.xlu0 %v2423_v38, %s3622_s4 }
0x287a   :  { %v2426_v41 = vpop.permute.xlu0 %2425 }
0x287b   :  { %v2428_v42 = vadd.f32 %v2426_v41, %v2418_v40 }
0x287d   :  { %3374 = vtanh.f32 %v2428_v42  ;;  %v2439_v44 = vrot.slane %v2428_v42, %v3814_v8 }
0x288a   :  { %v3375_v43 = vpop.eup %3374 }
0x288b   :  { %2431 = vrot.lane.b32.xlu1 %v3375_v43, %s3622_s4 }
0x288f   :  { %2440 = vrot.lane.b32.xlu1 %v2439_v44, %s3623_s7 }
0x28fd   :  { %v2432_v45 = vpop.permute.xlu1 %2431 }
0x28fe   :  { %v2434_v46 = vmul.f32 %v3373_v36, %v2432_v45  ;;  %v2937_v36 = vld [vmem:[%s4265_s10] ss:$0 sm:$0xff]  ;;  %s3625_s10 = smov [#allocation19]  }
0x28ff   :  { %s2874_s5 = sshll.u32 %s3625_s10, 4  ;;  %s2875_s5 = int_to_ptr.vmem [resolvable:$true] %s2874_s5 }
0x2900   :  { %v2448_v47 = vrot.slane %v2434_v46, %v3814_v8  ;;  %s3556_s6 = scalar_lea.vmem %s2875_s5, 128  ;;  %p3561_p8 = scmp.lt.s32.totalorder %s2875_s5, %s2875_s5 }
0x2901   :  { %v2441_v48 = vpop.permute.xlu1 %2440  ;;  %p3557_p7 = scmp.ne.s32.totalorder %s2875_s5, %s3556_s6  ;;  %p3562_p9 = scmp.lt.s32.totalorder %s3556_s6, %s3556_s6 }
0x2902   :  { %2443 = vst.msk [vmem:[#allocation5] sm:$0x1] %vm351_vm1, %v2441_v48  ;;  %2449 = vrot.lane.b32.xlu0 %v2448_v47, %s3624_s14 }
0x2903   :  { %p3563_p10 = por %p3562_p9, %p3561_p8 }
0x2905   :  { %p3564_p11 = pnand %p3563_p10, %p3557_p7 }
0x2909   :  { %v2455_v49 = vld [vmem:[#allocation5] sm:$0x1] }
0x290a   :  { %2539 = vrot.lane.b32.xlu1 %v2455_v49, %s3622_s4 }
0x2974   :  { %v2450_v50 = vpop.permute.xlu0 %2449 }
0x2975   :  { %2453 = vst.msk [vmem:[#allocation2 + $0x6] sm:$0x1] %vm351_vm1, %v2450_v50  ;;  %2452 = vst.msk [vmem:[#allocation4] sm:$0x1] %vm351_vm1, %v2450_v50 }
0x297c   :  { %v2454_v51 = vld [vmem:[#allocation4] sm:$0x1]  ;;  %v2540_v20 = vpop.permute.xlu1 %2539  ;;  %v2584_v23 = vld [vmem:[#allocation2 + $0x6] sm:$0x1] }
0x297d   :  { %3224 = vmatmul.mubr.msk.f32.vlgmr.msra.gmra.mxu1 %vm358_vm2, %v2454_v51 }
0x2a3d   :  { %v2526_v53 = vpop.f32.mrf.mxu1 }
0x2a3e   :  { %v2530_v54 = vadd.f32 %v2526_v53, %v2456_v52 }
0x2a3f   :  { %v3225_v55 = vpop.f32.mrf.mxu1 }
0x2a40   :  { %3376 = vtanh.f32 %v2530_v54  ;;  %v2936_v57 = vmul.f32 -1.442695, %v2530_v54 }
0x2a42   :  { %3378 = vpow2.f32 %v2936_v57 }
0x2a4d   :  { %v3377_v56 = vpop.eup %3376 }
0x2a4e   :  { %2544 = vrot.lane.b32.xlu0 %v3377_v56, %s3622_s4 }
0x2a4f   :  { %v3379_v58 = vpop.eup %3378 }
0x2a50   :  { %v2534_v59 = vadd.f32 1.0, %v3379_v58 }
0x2a52   :  { %3380 = vrcp.f32 %v2534_v59 }
0x2a5f   :  { %v3381_v60 = vpop.eup %3380 }
0x2a60   :  { %v2542_v63 = vmul.f32 %v3381_v60, %v2540_v20 }
0x2ac0   :  { %v2545_v61 = vpop.permute.xlu0 %2544 }
0x2ac1   :  { %v2547_v62 = vmul.f32 %v3381_v60, %v2545_v61 }
0x2ac3   :  { %2549 = vrot.lane.b32.xlu0 %v2547_v62, %s3622_s4 }
0x2b35   :  { %v2550_v0 = vpop.permute.xlu0 %2549 }
0x2b36   :  { %v2552_v2 = vadd.f32 %v2550_v0, %v2542_v63 }
0x2b38   :  { %3382 = vtanh.f32 %v2552_v2  ;;  %v2563_v3 = vrot.slane %v2552_v2, %v3814_v8 }
0x2b45   :  { %v3383_v21 = vpop.eup %3382 }
0x2b46   :  { %2555 = vrot.lane.b32.xlu1 %v3383_v21, %s3622_s4 }
0x2b4a   :  { %2564 = vrot.lane.b32.xlu1 %v2563_v3, %s3623_s7 }
0x2bb8   :  { %v2556_v6 = vpop.permute.xlu1 %2555 }
0x2bb9   :  { %v2558_v30 = vmul.f32 %v3381_v60, %v2556_v6 }
0x2bbb   :  { %v2572_v12 = vrot.slane %v2558_v30, %v3814_v8  ;;  %v2622_v8 = vrot.slane %v2606_v16, %v3743_v9 }
0x2bbc   :  { %v2565_v11 = vpop.permute.xlu1 %2564 }
0x2bbd   :  { %2567 = vst.msk [vmem:[#allocation5] sm:$0x1] %vm351_vm1, %v2565_v11  ;;  %2573 = vrot.lane.b32.xlu0 %v2572_v12, %s3624_s14  ;;  %v2637_v31 = vcombine.low %v2615_v26, %v2622_v8 }
0x2bbf   :  { %v2645_v33 = vrot.slane %v2637_v31, %v3743_v9 }
0x2c2f   :  { %v2574_v13 = vpop.permute.xlu0 %2573 }
0x2c30   :  { %2576 = vst.msk [vmem:[#allocation4] sm:$0x1] %vm351_vm1, %v2574_v13  ;;  %2577 = vst.msk [vmem:[#allocation2 + $0x7] sm:$0x1] %vm351_vm1, %v2574_v13 }
0x2c37   :  { %v2585_v24 = vld [vmem:[#allocation2 + $0x7] sm:$0x1] }
0x2c38   :  { %v2608_v25 = vcombine.low %v2584_v23, %v2585_v24 }
0x2c3a   :  { %v2636_v29 = vrot.slane %v2608_v25, %v3743_v9 }
0x2c3c   :  { %v2638_v32 = vcombine.low %v2629_v28, %v2636_v29 }
0x2c3e   :  { %v2652_v34 = vrot.slane %v2638_v32, %v3743_v9 }
0x2c40   :  { %v2653_v35 = vcombine.low %v2645_v33, %v2652_v34 }
0x2c42   :  { %3235 = vmatmul.mubr.msk.f32.vlgmr.msra.gmra.mxu0 %vm358_vm2, %v2653_v35 }
0x2d02   :  { %v2722_v37 = vpop.f32.mrf.mxu0 }
0x2d03   :  { %v2723_v38 = vadd.f32 %v2937_v36, %v2722_v37 }
0x2d04   :  { %v3236_v39 = vpop.f32.mrf.mxu0 }
0x2d05   :  { %v2727_v40 = vcombine.high %v2723_v38, %v2723_v38  ;;  %v2734_v41 = vrot.slane %v2723_v38, %v3743_v9 }
0x2d07   :  { %v2741_v42 = vrot.slane %v2727_v40, %v3743_v9  ;;  %v2742_v43 = vcombine.high %v2734_v41, %v2734_v41  ;;  %v2750_v44 = vrot.slane %v2734_v41, %v3743_v9 }
0x2d09   :  { %v2743_v45 = vcombine.high %v2741_v42, %v2741_v42  ;;  %v2757_v46 = vrot.slane %v2741_v42, %v3743_v9  ;;  %v2764_v47 = vrot.slane %v2742_v43, %v3743_v9  ;;  %v2772_v48 = vcombine.high %v2750_v44, %v2750_v44  ;;  %2785 = vst.msk [vmem:[#allocation19] sm:$0x1] %vm2784_vm4, %v2750_v44 }
0x2d0a   :  { %v4195_v49 = vsub.f32 %v2750_v44, %v2750_v44 }
0x2d0b   :  { %v2771_v50 = vrot.slane %v2743_v45, %v3743_v9  ;;  %v2773_v51 = vcombine.high %v2757_v46, %v2757_v46  ;;  %v2774_v52 = vcombine.high %v2764_v47, %v2764_v47  ;;  %2786 = vst.msk [vmem:[#allocation19 + $0x1] sm:$0x1] %vm2784_vm4, %v2764_v47  ;;  %2787 = vst.msk [vmem:[#allocation19 + $0x2] sm:$0x1] %vm2784_vm4, %v2772_v48 }
0x2d0c   :  { %2789 = vst.msk [vmem:[#allocation19 + $0x4] sm:$0x1] %vm2784_vm4, %v2757_v46  ;;  %v4201_v53 = vsub.f32 %v2764_v47, %v2764_v47  ;;  %v4203_v54 = vsub.f32 %v2772_v48, %v2772_v48  ;;  %v4205_v55 = vsub.f32 %v2757_v46, %v2757_v46  ;;  %v2801_v56 = vmul.f32 1.442695, %v4195_v49 }
0x2d0d   :  { %v2775_v57 = vcombine.high %v2771_v50, %v2771_v50  ;;  %2788 = vst.msk [vmem:[#allocation19 + $0x3] sm:$0x1] %vm2784_vm4, %v2774_v52  ;;  %2790 = vst.msk [vmem:[#allocation19 + $0x5] sm:$0x1] %vm2784_vm4, %v2771_v50  ;;  %v4211_v9 = vsub.f32 %v2774_v52, %v2774_v52  ;;  %v4213_v58 = vsub.f32 %v2771_v50, %v2771_v50 }
0x2d0e   :  { %2791 = vst.msk [vmem:[#allocation19 + $0x6] sm:$0x1] %vm2784_vm4, %v2773_v51  ;;  %v4215_v59 = vsub.f32 %v2773_v51, %v2773_v51  ;;  %3384 = vpow2.f32 %v2801_v56  ;;  %v2803_v60 = vmul.f32 1.442695, %v4201_v53  ;;  %v2805_v61 = vmul.f32 1.442695, %v4203_v54 }
0x2d0f   :  { %2792 = vst.msk [vmem:[#allocation19 + $0x7] sm:$0x1] %vm2784_vm4, %v2775_v57  ;;  %v4220_v62 = vsub.f32 %v2775_v57, %v2775_v57  ;;  %v2807_v20 = vmul.f32 1.442695, %v4211_v9  ;;  %v2809_v63 = vmul.f32 1.442695, %v4205_v55 }
0x2d10   :  { %3386 = vpow2.f32 %v2803_v60  ;;  %v2811_v0 = vmul.f32 1.442695, %v4213_v58 }
0x2d11   :  { %3567 = shalt.err (!%p3564_p11)
}
0x2d12   :  { %2880 = dma.vmem_to_hbm [thread:$0]  %s2875_s5, 128, %s4267_s12, [#allocation20], %s3610_s26, %s3610_s26, %s3611_s27   ;;  %3388 = vpow2.f32 %v2805_v61  ;;  %v2813_v2 = vmul.f32 1.442695, %v4215_v59  ;;  %v2815_v21 = vmul.f32 1.442695, %v4220_v62 }
0x2d13   :  { %3390 = vpow2.f32 %v2807_v20  ;;  %s3626_s12 = smov [#allocation18]  }
0x2d14   :  { %3392 = vpow2.f32 %v2809_v63  ;;  %s2862_s21 = sshll.u32 %s3626_s12, 4  ;;  %s2863_s21 = int_to_ptr.vmem [resolvable:$true] %s2862_s21 }
0x2d15   :  { %3394 = vpow2.f32 %v2811_v0  ;;  %s3576_s3 = scalar_lea.vmem %s2863_s21, 128  ;;  %p3581_p13 = scmp.lt.s32.totalorder %s2863_s21, %s2863_s21 }
0x2d16   :  { %3396 = vpow2.f32 %v2813_v2  ;;  %p3577_p12 = scmp.ne.s32.totalorder %s2863_s21, %s3576_s3  ;;  %p3582_p0 = scmp.lt.s32.totalorder %s3576_s3, %s3576_s3 }
0x2d17   :  { %3398 = vpow2.f32 %v2815_v21 }
0x2d18   :  { %p3583_p1 = por %p3582_p0, %p3581_p13 }
0x2d1a   :  { %p3584_p2 = pnand %p3583_p1, %p3577_p12 }
0x2d1b   :  { %v3385_v3 = vpop.eup %3384 }
0x2d1c   :  { %3400 = vlog2.f32 %v3385_v3 }
0x2d1d   :  { %v3387_v7 = vpop.eup %3386 }
0x2d1e   :  { %3402 = vlog2.f32 %v3387_v7 }
0x2d1f   :  { %v3389_v27 = vpop.eup %3388 }
0x2d20   :  { %v3391_v4 = vpop.eup %3390  ;;  %3404 = vlog2.f32 %v3389_v27 }
0x2d21   :  { %v3393_v10 = vpop.eup %3392  ;;  %3406 = vlog2.f32 %v3391_v4 }
0x2d22   :  { %v3395_v6 = vpop.eup %3394  ;;  %3408 = vlog2.f32 %v3393_v10 }
0x2d23   :  { %v3397_v30 = vpop.eup %3396  ;;  %3410 = vlog2.f32 %v3395_v6 }
0x2d24   :  { %v3399_v12 = vpop.eup %3398  ;;  %3412 = vlog2.f32 %v3397_v30 }
0x2d25   :  { %3414 = vlog2.f32 %v3399_v12 }
0x2d29   :  { %v3401_v11 = vpop.eup %3400 }
0x2d2a   :  { %v2826_v13 = vmul.f32 0.6931472, %v3401_v11 }
0x2d2b   :  { %v3403_v14 = vpop.eup %3402 }
0x2d2c   :  { %v2828_v5 = vmul.f32 0.6931472, %v3403_v14  ;;  %v2841_v16 = vsub.f32 %v4195_v49, %v2826_v13 }
0x2d2d   :  { %v3405_v15 = vpop.eup %3404 }
0x2d2e   :  { %v3407_v1 = vpop.eup %3406  ;;  %v2830_v17 = vmul.f32 0.6931472, %v3405_v15  ;;  %v2842_v22 = vsub.f32 %v4201_v53, %v2828_v5  ;;  %2849 = vst.msk [vmem:[#allocation18] sm:$0x1] %vm2784_vm4, %v2841_v16 }
0x2d2f   :  { %v3409_v18 = vpop.eup %3408  ;;  %v2832_v19 = vmul.f32 0.6931472, %v3407_v1 }
0x2d30   :  { %v3411_v8 = vpop.eup %3410  ;;  %v2834_v23 = vmul.f32 0.6931472, %v3409_v18  ;;  %v2843_v24 = vsub.f32 %v4203_v54, %v2830_v17  ;;  %2850 = vst.msk [vmem:[#allocation18 + $0x1] sm:$0x1] %vm2784_vm4, %v2842_v22 }
0x2d31   :  { %v3413_v25 = vpop.eup %3412  ;;  %v2836_v26 = vmul.f32 0.6931472, %v3411_v8  ;;  %v2844_v28 = vsub.f32 %v4211_v9, %v2832_v19 }
0x2d32   :  { %v3415_v29 = vpop.eup %3414  ;;  %v2838_v31 = vmul.f32 0.6931472, %v3413_v25  ;;  %v2845_v32 = vsub.f32 %v4205_v55, %v2834_v23  ;;  %2851 = vst.msk [vmem:[#allocation18 + $0x2] sm:$0x1] %vm2784_vm4, %v2843_v24 }
0x2d33   :  { %v2840_v33 = vmul.f32 0.6931472, %v3415_v29  ;;  %v2846_v34 = vsub.f32 %v4213_v58, %v2836_v26  ;;  %2852 = vst.msk [vmem:[#allocation18 + $0x3] sm:$0x1] %vm2784_vm4, %v2844_v28 }
0x2d34   :  { %v2847_v35 = vsub.f32 %v4215_v59, %v2838_v31  ;;  %2853 = vst.msk [vmem:[#allocation18 + $0x4] sm:$0x1] %vm2784_vm4, %v2845_v32 }
0x2d35   :  { %v2848_v36 = vsub.f32 %v4220_v62, %v2840_v33  ;;  %2854 = vst.msk [vmem:[#allocation18 + $0x5] sm:$0x1] %vm2784_vm4, %v2846_v34 }
0x2d36   :  { %2855 = vst.msk [vmem:[#allocation18 + $0x6] sm:$0x1] %vm2784_vm4, %v2847_v35 }
0x2d37   :  { %2856 = vst.msk [vmem:[#allocation18 + $0x7] sm:$0x1] %vm2784_vm4, %v2848_v36 }
0x2d38   :  { %3587 = shalt.err (!%p3584_p2)
}
0x2d39   :  { %2868 = dma.vmem_to_hbm [thread:$0]  %s2863_s21, 128, %s4266_s11, [#allocation8], %s3610_s26, %s3610_s26, %s3611_s27  }
0x2d3a   :  { %3604 = dma.done.wait [#allocation8], 128  }
0x2d3b   :  { %3605 = vsyncadd [#allocation8], 4294967168 }
0x2d3c   :  { %3606 = dma.done.wait [#allocation20], 128  }
0x2d3d   :  { %3607 = vsyncadd [#allocation20], 4294967168 }
0x2d3e   :  { %2887 = vsyncpa [#allocation7], 1 }
0x2d3f   :  { %2888 = vsyncpa [#allocation10], 1 }
0x2d40   :  { %2889 = vsyncpa [#allocation13], 1 }
0x2d41   :  { %2890 = vsyncpa [#allocation16], 1 }
0x2d42   :  { %2891 = vsyncpa [#allocation8], 1 }
0x2d43   :  { %2892 = vsyncpa [#allocation20], 1 }

</bundles_post_ra>
